<compile_context>
chip_gen: v6e
topology: v6e:2x2x1
jax: 0.10.0
libtpu: 0.0.40
codegen_flags: <defaults>
</compile_context>

<pallas_src>
import numpy as np
import jax
import jax.numpy as jnp
from jax.experimental import pallas as pl
from jax.experimental.pallas import tpu as pltpu

# ---- model dims (from the PyTorch module) ----
STATE_DIMS = 2
HIDDEN1 = 16
H_DIMS = 8
ACTION_DIMS = 8
GATE_DIMS = 4 * H_DIMS            # 32

# ---- in-kernel activation-slab layout (lane width 64) ----
ACT_W = 64
HX_OFF = 16                        # hx at cols 16:24  (must match Whh rows in LSTM block)
X_OFF = 24                         # x  at cols 24:26  (zero rows in every weight block)

# ---- packed weight-slab layout (rows x 64 lanes, rows multiple of 8) ----
W1_ROW = 0                         # (64,64): rows 24:26, cols 0:16  = w1.T
W2_ROW = 64                        # (64,64): rows 0:16,  cols 0:16  = w2.T
LSTM_ROW = 128                     # (64,64): rows 0:16 = w_ih.T, rows 16:24 = w_hh.T
HEAD_ROW = 192                     # (8,64):  cols 0:8 = w_action.T, col 8 = w_value.T
BIAS_ROW = 200                     # (1,64):  cols 0:32 = b_ih + b_hh   (gate order i,f,o,g)
SLAB_ROWS = 208

# ---- packed output-slab layout (lane width 64, single unmasked lane-dense store) ----
OUT_W = 64
OUT_PROB_OFF = 0                   # cols 0:8
OUT_VAL_COL = 8                    # col 8
OUT_HX_OFF = 16                    # cols 16:24
OUT_CX_OFF = 24                    # cols 24:32

MAX_TILE_ROWS = 1024               # past the ~85%-of-roofline knee; tiny vs VMEM everywhere


def _round_up(x, m):
    return ((x + m - 1) // m) * m


# ----------------------------------------------------------------------------
# shared in-kernel forward body (operates on in-register (B, *) values)
# ----------------------------------------------------------------------------
def _forward_body(x, hx, cx, w_ref):
    f32 = jnp.float32
    b = x.shape[0]

    # assemble the 64-lane activation slab in-register (no wrapper HBM round trip)
    act = jnp.concatenate([
        jnp.zeros((b, HX_OFF), f32),                 # cols 0:16  (h1/h2 space)
        hx,                                          # cols 16:24
        x,                                           # cols 24:26
        jnp.zeros((b, ACT_W - (X_OFF + STATE_DIMS)), f32),
    ], axis=1)                                       # (b, 64)

    w1 = w_ref[W1_ROW:W1_ROW + ACT_W, :]             # (64, 64)
    w2 = w_ref[W2_ROW:W2_ROW + ACT_W, :]             # (64, 64)
    wl = w_ref[LSTM_ROW:LSTM_ROW + ACT_W, :]         # (64, 64)
    wh = w_ref[HEAD_ROW:HEAD_ROW + H_DIMS, :]        # (8, 64)
    bias = w_ref[BIAS_ROW:BIAS_ROW + 1, :]           # (1, 64)

    # affine1 + relu (x lives at cols 24:26; hx hits zero weight rows)
    h1 = jnp.maximum(jnp.dot(act, w1, preferred_element_type=jnp.float32), 0.0)
    # affine2 + relu (data in cols 0:16, zeros elsewhere)
    h2 = jnp.maximum(jnp.dot(h1, w2, preferred_element_type=jnp.float32), 0.0)

    # fused LSTM matmul: z has h2 in cols 0:16 and hx in cols 16:24
    # (x region of `act` multiplies all-zero rows of the LSTM block)
    z = h2 + act
    gates = jnp.dot(z, wl, preferred_element_type=jnp.float32) + bias   # cols 0:32, [i,f,o,g]

    sig = jax.nn.sigmoid(gates[:, 0:3 * H_DIMS])     # one sigmoid pass over i,f,o
    i_g = sig[:, 0 * H_DIMS:1 * H_DIMS]
    f_g = sig[:, 1 * H_DIMS:2 * H_DIMS]
    o_g = sig[:, 2 * H_DIMS:3 * H_DIMS]
    g_g = jnp.tanh(gates[:, 3 * H_DIMS:4 * H_DIMS])
    c_new = f_g * cx + i_g * g_g
    h_new = o_g * jnp.tanh(c_new)

    # fused action + value heads: cols 0:8 = logits, col 8 = value
    y = jnp.dot(h_new, wh, preferred_element_type=jnp.float32)          # (b, 64)
    logits = y[:, 0:ACTION_DIMS]
    value = y[:, ACTION_DIMS:ACTION_DIMS + 1]
    m = jnp.max(logits, axis=-1, keepdims=True)
    e = jnp.exp(logits - m)
    prob = e * pl.reciprocal(jnp.sum(e, axis=-1, keepdims=True), approx=False)

    # single lane-dense output slab, assembled in-register -> ONE unmasked store
    out_slab = jnp.concatenate([
        prob,                                              # cols 0:8
        value,                                             # col 8
        jnp.zeros((b, OUT_HX_OFF - (OUT_VAL_COL + 1)), f32),
        h_new,                                             # cols 16:24
        c_new,                                             # cols 24:32
        jnp.zeros((b, OUT_W - (OUT_CX_OFF + H_DIMS)), f32),
    ], axis=1)                                             # (b, 64)
    return out_slab, h_new, c_new


# ----------------------------------------------------------------------------
# single-step kernel (batch tiled over a "parallel" grid axis)
# ----------------------------------------------------------------------------
def actor_critic_kernel(x_ref, hx_ref, cx_ref, w_ref, out_ref):
    out_slab, _, _ = _forward_body(x_ref[...], hx_ref[...], cx_ref[...], w_ref)
    out_ref[...] = out_slab


# ----------------------------------------------------------------------------
# rollout kernel: time grid axis ("arbitrary"), hx/cx resident in VMEM scratch
# ----------------------------------------------------------------------------
def actor_critic_rollout_kernel(x_ref, hx0_ref, cx0_ref, w_ref, out_ref, h_st, c_st):
    @pl.when(pl.program_id(0) == 0)
    def _():
        h_st[...] = hx0_ref[...]
        c_st[...] = cx0_ref[...]

    out_slab, h_new, c_new = _forward_body(x_ref[0], h_st[...], c_st[...], w_ref)
    h_st[...] = h_new
    c_st[...] = c_new
    out_ref[0] = out_slab


# ----------------------------------------------------------------------------
# packing / wrappers
# ----------------------------------------------------------------------------
def _reorder_gates(w):
    """PyTorch gate order [i, f, g, o] -> packed order [i, f, o, g] (sigmoids contiguous)."""
    return jnp.concatenate([w[0 * H_DIMS:1 * H_DIMS],
                            w[1 * H_DIMS:2 * H_DIMS],
                            w[3 * H_DIMS:4 * H_DIMS],
                            w[2 * H_DIMS:3 * H_DIMS]], axis=0)


def pack_params(params):
    """Pack all weights/biases into one (208, 64) f32 slab. Done once, off the hot path."""
    f32 = jnp.float32
    w_ih_r = _reorder_gates(params["w_ih"].astype(f32))          # (32, 16)
    w_hh_r = _reorder_gates(params["w_hh"].astype(f32))          # (32, 8)
    b_r = _reorder_gates((params["b_ih"] + params["b_hh"]).astype(f32))   # (32,)

    slab = jnp.zeros((SLAB_ROWS, ACT_W), f32)
    slab = slab.at[W1_ROW + X_OFF:W1_ROW + X_OFF + STATE_DIMS, 0:HIDDEN1].set(
        params["w1"].T.astype(f32))
    slab = slab.at[W2_ROW:W2_ROW + HIDDEN1, 0:HIDDEN1].set(params["w2"].T.astype(f32))
    slab = slab.at[LSTM_ROW:LSTM_ROW + HIDDEN1, 0:GATE_DIMS].set(w_ih_r.T)
    slab = slab.at[LSTM_ROW + HX_OFF:LSTM_ROW + HX_OFF + H_DIMS, 0:GATE_DIMS].set(w_hh_r.T)
    slab = slab.at[HEAD_ROW:HEAD_ROW + H_DIMS, 0:ACTION_DIMS].set(params["w_action"].T.astype(f32))
    slab = slab.at[HEAD_ROW:HEAD_ROW + H_DIMS, ACTION_DIMS:ACTION_DIMS + 1].set(
        params["w_value"].T.astype(f32))
    slab = slab.at[BIAS_ROW, 0:GATE_DIMS].set(b_r)
    return slab


def _choose_tile(B, block_b):
    """Pick batch tile: default = whole padded batch in one grid step (capped)."""
    bp8 = _round_up(max(B, 1), 8)
    if block_b is None:
        n_tiles = -(-bp8 // MAX_TILE_ROWS)          # ceil
        tb = _round_up(-(-bp8 // n_tiles), 8)
    else:
        tb = _round_up(min(block_b, bp8), 8)
        n_tiles = -(-bp8 // tb)
    return tb, tb * n_tiles


def _pad_rows(a, Bp):
    a = a.astype(jnp.float32)
    B = a.shape[0]
    return jnp.pad(a, ((0, Bp - B),) + ((0, 0),) * (a.ndim - 1)) if Bp > B else a


def actor_critic_forward(x, weight_slab, hx, cx, *, block_b=None):
    """x: (B,2); hx,cx: (B,8); weight_slab: (208,64) from pack_params.
    Returns (action_prob (B,8), state_value (B,1), hx_new (B,8), cx_new (B,8))."""
    f32 = jnp.float32
    B = x.shape[0]
    tb, Bp = _choose_tile(B, block_b)
    xp, hxp, cxp = _pad_rows(x, Bp), _pad_rows(hx, Bp), _pad_rows(cx, Bp)

    out = pl.pallas_call(
        actor_critic_kernel,
        out_shape=jax.ShapeDtypeStruct((Bp, OUT_W), f32),
        grid=(Bp // tb,),
        in_specs=[
            pl.BlockSpec((tb, STATE_DIMS), lambda i: (i, 0)),        # x tile
            pl.BlockSpec((tb, H_DIMS), lambda i: (i, 0)),            # hx tile
            pl.BlockSpec((tb, H_DIMS), lambda i: (i, 0)),            # cx tile
            pl.BlockSpec((SLAB_ROWS, ACT_W), lambda i: (0, 0)),      # weight slab, resident
        ],
        out_specs=pl.BlockSpec((tb, OUT_W), lambda i: (i, 0)),
        compiler_params=pltpu.CompilerParams(
            dimension_semantics=("parallel",)),
    )(xp, hxp, cxp, weight_slab)

    prob = out[:B, OUT_PROB_OFF:OUT_PROB_OFF + ACTION_DIMS]
    value = out[:B, OUT_VAL_COL:OUT_VAL_COL + 1]
    hx_new = out[:B, OUT_HX_OFF:OUT_HX_OFF + H_DIMS]
    cx_new = out[:B, OUT_CX_OFF:OUT_CX_OFF + H_DIMS]
    return prob, value, hx_new, cx_new


def actor_critic_rollout(x_seq, weight_slab, hx0, cx0):
    """Sequential RL rollout: x_seq (T,B,2), hx0/cx0 (B,8).
    One pallas_call: weights stay resident, hx/cx carried in VMEM scratch across steps.
    Returns (prob (T,B,8), value (T,B,1), hx_T (B,8), cx_T (B,8))."""
    f32 = jnp.float32
    T, B, _ = x_seq.shape
    Bp = _round_up(B, 8)
    x_p = _pad_rows(x_seq.astype(f32).transpose(1, 0, 2), Bp).transpose(1, 0, 2) \
        if Bp > B else x_seq.astype(f32)
    hx_p, cx_p = _pad_rows(hx0, Bp), _pad_rows(cx0, Bp)

    out = pl.pallas_call(
        actor_critic_rollout_kernel,
        out_shape=jax.ShapeDtypeStruct((T, Bp, OUT_W), f32),
        grid=(T,),
        in_specs=[
            pl.BlockSpec((1, Bp, STATE_DIMS), lambda t: (t, 0, 0)),  # x_t
            pl.BlockSpec((Bp, H_DIMS), lambda t: (0, 0)),            # hx0 (read at t==0)
            pl.BlockSpec((Bp, H_DIMS), lambda t: (0, 0)),            # cx0 (read at t==0)
            pl.BlockSpec((SLAB_ROWS, ACT_W), lambda t: (0, 0)),      # weight slab, resident
        ],
        out_specs=pl.BlockSpec((1, Bp, OUT_W), lambda t: (t, 0, 0)),
        scratch_shapes=[pltpu.VMEM((Bp, H_DIMS), f32),               # carried hx
                        pltpu.VMEM((Bp, H_DIMS), f32)],              # carried cx
        compiler_params=pltpu.CompilerParams(
            dimension_semantics=("arbitrary",)),
    )(x_p, hx_p, cx_p, weight_slab)

    prob = out[:, :B, OUT_PROB_OFF:OUT_PROB_OFF + ACTION_DIMS]
    value = out[:, :B, OUT_VAL_COL:OUT_VAL_COL + 1]
    hx_T = out[-1, :B, OUT_HX_OFF:OUT_HX_OFF + H_DIMS]
    cx_T = out[-1, :B, OUT_CX_OFF:OUT_CX_OFF + H_DIMS]
    return prob, value, hx_T, cx_T


# ----------------------------------------------------------------------------
# init + pure-JAX reference
# ----------------------------------------------------------------------------
def init_params(key):
    """Deterministic init matching the PyTorch module's parameter shapes."""
    ks = jax.random.split(key, 8)

    def xavier_normal(k, shape):  # shape = (out, in)
        fan_out, fan_in = shape
        std = np.sqrt(2.0 / (fan_in + fan_out))
        return (std * jax.random.normal(k, shape)).astype(jnp.float32)

    def lstm_uniform(k, shape):   # PyTorch LSTMCell default: U(-1/sqrt(H), 1/sqrt(H))
        bound = 1.0 / np.sqrt(H_DIMS)
        return jax.random.uniform(k, shape, jnp.float32, -bound, bound)

    return {
        "w1": xavier_normal(ks[0], (HIDDEN1, STATE_DIMS)),        # affine1.weight (16, 2)
        "w2": xavier_normal(ks[1], (HIDDEN1, HIDDEN1)),           # affine2.weight (16, 16)
        "w_ih": lstm_uniform(ks[2], (GATE_DIMS, HIDDEN1)),        # lstmcell.weight_ih (32, 16)
        "w_hh": lstm_uniform(ks[3], (GATE_DIMS, H_DIMS)),         # lstmcell.weight_hh (32, 8)
        "b_ih": lstm_uniform(ks[4], (GATE_DIMS,)),                # lstmcell.bias_ih (32,)
        "b_hh": lstm_uniform(ks[5], (GATE_DIMS,)),                # lstmcell.bias_hh (32,)
        "w_action": xavier_normal(ks[6], (ACTION_DIMS, H_DIMS)),  # action_head.weight (8, 8)
        "w_value": xavier_normal(ks[7], (1, H_DIMS)),             # value_head.weight (1, 8)
    }


def reference_forward(inputs, params, hx, cx):
    """Pure-JAX reference mirroring the PyTorch forward (vectorized over batch rows)."""
    x = jnp.maximum(inputs @ params["w1"].T, 0.0)
    x = jnp.maximum(x @ params["w2"].T, 0.0)
    gates = x @ params["w_ih"].T + params["b_ih"] + hx @ params["w_hh"].T + params["b_hh"]
    i, f, g, o = jnp.split(gates, 4, axis=-1)
    i, f, g, o = jax.nn.sigmoid(i), jax.nn.sigmoid(f), jnp.tanh(g), jax.nn.sigmoid(o)
    c_new = f * cx + i * g
    h_new = o * jnp.tanh(c_new)
    prob = jax.nn.softmax(h_new @ params["w_action"].T, axis=-1)
    value = h_new @ params["w_value"].T
    return prob, value, h_new, c_new


def reference_rollout(x_seq, params, hx, cx):
    probs, values = [], []
    for t in range(x_seq.shape[0]):
        p, v, hx, cx = reference_forward(x_seq[t], params, hx, cx)
        probs.append(p)
        values.append(v)
    return jnp.stack(probs), jnp.stack(values), hx, cx


if __name__ == "__main__":
    key = jax.random.PRNGKey(0)
    k_params, k_x, k_h, k_c, k_seq = jax.random.split(key, 5)

    params = init_params(k_params)
    wslab = pack_params(params)          # packed once, outside the hot path

    # ---- batched single-step forward (one grid tile covering the whole batch) ----
    B = 256
    x = jax.random.normal(k_x, (B, STATE_DIMS), jnp.float32)
    hx0 = 0.1 * jax.random.normal(k_h, (B, H_DIMS), jnp.float32)
    cx0 = 0.1 * jax.random.normal(k_c, (B, H_DIMS), jnp.float32)

    prob, value, hx1, cx1 = actor_critic_forward(x, wslab, hx0, cx0)
    jax.block_until_ready((prob, value, hx1, cx1))

    r_prob, r_value, r_hx, r_cx = reference_forward(x, params, hx0, cx0)
    np.testing.assert_allclose(np.asarray(prob), np.asarray(r_prob), rtol=1e-5, atol=1e-5)
    np.testing.assert_allclose(np.asarray(value), np.asarray(r_value), rtol=1e-5, atol=1e-5)
    np.testing.assert_allclose(np.asarray(hx1), np.asarray(r_hx), rtol=1e-5, atol=1e-5)
    np.testing.assert_allclose(np.asarray(cx1), np.asarray(r_cx), rtol=1e-5, atol=1e-5)
    np.testing.assert_allclose(np.asarray(jnp.sum(prob, axis=-1)), np.ones(B), rtol=1e-5, atol=1e-5)

    # step 2 (exercise the recurrent state feedback)
    prob2, value2, hx2, cx2 = actor_critic_forward(x, wslab, hx1, cx1)
    r_prob2, r_value2, r_hx2, r_cx2 = reference_forward(x, params, r_hx, r_cx)
    np.testing.assert_allclose(np.asarray(prob2), np.asarray(r_prob2), rtol=1e-5, atol=1e-5)
    np.testing.assert_allclose(np.asarray(value2), np.asarray(r_value2), rtol=1e-5, atol=1e-5)
    np.testing.assert_allclose(np.asarray(hx2), np.asarray(r_hx2), rtol=1e-5, atol=1e-5)
    np.testing.assert_allclose(np.asarray(cx2), np.asarray(r_cx2), rtol=1e-5, atol=1e-5)

    # explicit multi-tile grid still works (2 "parallel" tiles of 128)
    probm, valuem, _, _ = actor_critic_forward(x, wslab, hx0, cx0, block_b=128)
    np.testing.assert_allclose(np.asarray(probm), np.asarray(r_prob), rtol=1e-5, atol=1e-5)
    np.testing.assert_allclose(np.asarray(valuem), np.asarray(r_value), rtol=1e-5, atol=1e-5)

    # original module's batch=1 usage (padded internally)
    p1, v1, h1b, c1b = actor_critic_forward(x[:1], wslab, hx0[:1], cx0[:1])
    np.testing.assert_allclose(np.asarray(p1), np.asarray(r_prob[:1]), rtol=1e-5, atol=1e-5)
    np.testing.assert_allclose(np.asarray(v1), np.asarray(r_value[:1]), rtol=1e-5, atol=1e-5)

    # ---- fused sequential rollout (weights resident, hx/cx in VMEM scratch) ----
    T, Br = 8, 64
    x_seq = jax.random.normal(k_seq, (T, Br, STATE_DIMS), jnp.float32)
    rprob, rvalue, rhxT, rcxT = actor_critic_rollout(x_seq, wslab, hx0[:Br], cx0[:Br])
    jax.block_until_ready((rprob, rvalue, rhxT, rcxT))
    g_prob, g_value, g_hxT, g_cxT = reference_rollout(x_seq, params, hx0[:Br], cx0[:Br])
    np.testing.assert_allclose(np.asarray(rprob), np.asarray(g_prob), rtol=1e-4, atol=1e-4)
    np.testing.assert_allclose(np.asarray(rvalue), np.asarray(g_value), rtol=1e-4, atol=1e-4)
    np.testing.assert_allclose(np.asarray(rhxT), np.asarray(g_hxT), rtol=1e-4, atol=1e-4)
    np.testing.assert_allclose(np.asarray(rcxT), np.asarray(g_cxT), rtol=1e-4, atol=1e-4)

    print("KERNEL_OK")
</pallas_src>

<mosaic_0001>
module attributes {stable_mosaic.version = 11 : i64} {
  func.func @actor_critic_kernel(%arg0: i32, %arg1: memref<256x2xf32, #tpu.memory_space<vmem>>, %arg2: memref<256x8xf32, #tpu.memory_space<vmem>>, %arg3: memref<256x8xf32, #tpu.memory_space<vmem>>, %arg4: memref<208x64xf32, #tpu.memory_space<vmem>>, %arg5: memref<256x64xf32, #tpu.memory_space<vmem>>) attributes {dimension_semantics = [#tpu.dimension_semantics<parallel>], iteration_bounds = array<i64: 1>, scalar_prefetch = 0 : i64, scratch_operands = 0 : i64, tpu.core_type = #tpu.core_type<tc>, window_params = [{transform_indices = @transform_0, window_bounds = array<i64: 256, 2>}, {transform_indices = @transform_1, window_bounds = array<i64: 256, 8>}, {transform_indices = @transform_2, window_bounds = array<i64: 256, 8>}, {pipeline_mode = #tpu.pipeline_mode<synchronous>, transform_indices = @transform_3, window_bounds = array<i64: 208, 64>}, {transform_indices = @transform_4, window_bounds = array<i64: 256, 64>}]} {
    %c0 = arith.constant 0 : index
    %c0_0 = arith.constant 0 : index
    %0 = vector.load %arg1[%c0, %c0_0] : memref<256x2xf32, #tpu.memory_space<vmem>>, vector<256x2xf32>
    %c0_1 = arith.constant 0 : index
    %c0_2 = arith.constant 0 : index
    %1 = vector.load %arg2[%c0_1, %c0_2] : memref<256x8xf32, #tpu.memory_space<vmem>>, vector<256x8xf32>
    %c0_3 = arith.constant 0 : index
    %c0_4 = arith.constant 0 : index
    %2 = vector.load %arg3[%c0_3, %c0_4] : memref<256x8xf32, #tpu.memory_space<vmem>>, vector<256x8xf32>
    %cst = arith.constant 0.000000e+00 : f32
    %3 = vector.broadcast %cst : f32 to vector<256x16xf32>
    %cst_5 = arith.constant 0.000000e+00 : f32
    %4 = vector.broadcast %cst_5 : f32 to vector<256x38xf32>
    %5 = tpu.concatenate %3, %1, %0, %4 in 1 : vector<256x16xf32>, vector<256x8xf32>, vector<256x2xf32>, vector<256x38xf32> -> vector<256x64xf32>
    %c0_6 = arith.constant 0 : index
    %c0_7 = arith.constant 0 : index
    %6 = vector.load %arg4[%c0_6, %c0_7] : memref<208x64xf32, #tpu.memory_space<vmem>>, vector<64x64xf32>
    %c64 = arith.constant 64 : index
    %c0_8 = arith.constant 0 : index
    %7 = vector.load %arg4[%c64, %c0_8] : memref<208x64xf32, #tpu.memory_space<vmem>>, vector<64x64xf32>
    %c128 = arith.constant 128 : index
    %c0_9 = arith.constant 0 : index
    %8 = vector.load %arg4[%c128, %c0_9] : memref<208x64xf32, #tpu.memory_space<vmem>>, vector<64x64xf32>
    %c192 = arith.constant 192 : index
    %c0_10 = arith.constant 0 : index
    %9 = vector.load %arg4[%c192, %c0_10] : memref<208x64xf32, #tpu.memory_space<vmem>>, vector<8x64xf32>
    %c200 = arith.constant 200 : index
    %c0_11 = arith.constant 0 : index
    %10 = vector.load %arg4[%c200, %c0_11] : memref<208x64xf32, #tpu.memory_space<vmem>>, vector<1x64xf32>
    %cst_12 = arith.constant dense<0.000000e+00> : vector<256x64xf32>
    %11 = tpu.matmul %5, %6, %cst_12 {dimension_numbers = #tpu.dot_dimension_numbers<[1], [0], [0], [1], [0, 0, 1, 1], [], []>} : vector<256x64xf32>, vector<64x64xf32>, vector<256x64xf32> -> vector<256x64xf32>
    %cst_13 = arith.constant 0.000000e+00 : f32
    %12 = vector.broadcast %cst_13 : f32 to vector<256x64xf32>
    %13 = arith.maximumf %11, %12 : vector<256x64xf32>
    %cst_14 = arith.constant dense<0.000000e+00> : vector<256x64xf32>
    %14 = tpu.matmul %13, %7, %cst_14 {dimension_numbers = #tpu.dot_dimension_numbers<[1], [0], [0], [1], [0, 0, 1, 1], [], []>} : vector<256x64xf32>, vector<64x64xf32>, vector<256x64xf32> -> vector<256x64xf32>
    %cst_15 = arith.constant 0.000000e+00 : f32
    %15 = vector.broadcast %cst_15 : f32 to vector<256x64xf32>
    %16 = arith.maximumf %14, %15 : vector<256x64xf32>
    %17 = arith.addf %16, %5 : vector<256x64xf32>
    %cst_16 = arith.constant dense<0.000000e+00> : vector<256x64xf32>
    %18 = tpu.matmul %17, %8, %cst_16 {dimension_numbers = #tpu.dot_dimension_numbers<[1], [0], [0], [1], [0, 0, 1, 1], [], []>} : vector<256x64xf32>, vector<64x64xf32>, vector<256x64xf32> -> vector<256x64xf32>
    %19 = vector.broadcast %10 : vector<1x64xf32> to vector<256x64xf32>
    %20 = arith.addf %18, %19 : vector<256x64xf32>
    %21 = vector.extract_strided_slice %20 {offsets = [0, 0], sizes = [256, 24], strides = [1, 1]} : vector<256x64xf32> to vector<256x24xf32>
    %22 = arith.negf %21 : vector<256x24xf32>
    %23 = math.exp %22 : vector<256x24xf32>
    %cst_17 = arith.constant 1.000000e+00 : f32
    %24 = vector.broadcast %cst_17 : f32 to vector<256x24xf32>
    %25 = arith.addf %24, %23 : vector<256x24xf32>
    %26 = arith.divf %24, %25 : vector<256x24xf32>
    %27 = vector.extract_strided_slice %26 {offsets = [0, 0], sizes = [256, 8], strides = [1, 1]} : vector<256x24xf32> to vector<256x8xf32>
    %28 = vector.extract_strided_slice %26 {offsets = [0, 8], sizes = [256, 8], strides = [1, 1]} : vector<256x24xf32> to vector<256x8xf32>
    %29 = vector.extract_strided_slice %26 {offsets = [0, 16], sizes = [256, 8], strides = [1, 1]} : vector<256x24xf32> to vector<256x8xf32>
    %30 = vector.extract_strided_slice %20 {offsets = [0, 24], sizes = [256, 8], strides = [1, 1]} : vector<256x64xf32> to vector<256x8xf32>
    %31 = math.tanh %30 : vector<256x8xf32>
    %32 = arith.mulf %28, %2 : vector<256x8xf32>
    %33 = arith.mulf %27, %31 : vector<256x8xf32>
    %34 = arith.addf %32, %33 : vector<256x8xf32>
    %35 = math.tanh %34 : vector<256x8xf32>
    %36 = arith.mulf %29, %35 : vector<256x8xf32>
    %cst_18 = arith.constant dense<0.000000e+00> : vector<256x64xf32>
    %37 = tpu.matmul %36, %9, %cst_18 {dimension_numbers = #tpu.dot_dimension_numbers<[1], [0], [0], [1], [0, 0, 1, 1], [], []>} : vector<256x8xf32>, vector<8x64xf32>, vector<256x64xf32> -> vector<256x64xf32>
    %38 = vector.extract_strided_slice %37 {offsets = [0, 0], sizes = [256, 8], strides = [1, 1]} : vector<256x64xf32> to vector<256x8xf32>
    %39 = vector.extract_strided_slice %37 {offsets = [0, 8], sizes = [256, 1], strides = [1, 1]} : vector<256x64xf32> to vector<256x1xf32>
    %cst_19 = arith.constant dense<0xFF800000> : vector<256xf32>
    %40 = vector.multi_reduction <maximumf>, %38, %cst_19 [1] : vector<256x8xf32> to vector<256xf32>
    %41 = vector.shape_cast %40 : vector<256xf32> to vector<256x1xf32>
    %42 = vector.broadcast %41 : vector<256x1xf32> to vector<256x8xf32>
    %43 = arith.subf %38, %42 : vector<256x8xf32>
    %44 = math.exp %43 : vector<256x8xf32>
    %cst_20 = arith.constant dense<0.000000e+00> : vector<256xf32>
    %45 = vector.multi_reduction <add>, %44, %cst_20 [1] : vector<256x8xf32> to vector<256xf32>
    %46 = vector.shape_cast %45 : vector<256xf32> to vector<256x1xf32>
    %47 = tpu.reciprocal %46 : vector<256x1xf32> -> vector<256x1xf32>
    %48 = vector.broadcast %47 : vector<256x1xf32> to vector<256x8xf32>
    %49 = arith.mulf %44, %48 : vector<256x8xf32>
    %cst_21 = arith.constant 0.000000e+00 : f32
    %50 = vector.broadcast %cst_21 : f32 to vector<256x7xf32>
    %cst_22 = arith.constant 0.000000e+00 : f32
    %51 = vector.broadcast %cst_22 : f32 to vector<256x32xf32>
    %52 = tpu.concatenate %49, %39, %50, %36, %34, %51 in 1 : vector<256x8xf32>, vector<256x1xf32>, vector<256x7xf32>, vector<256x8xf32>, vector<256x8xf32>, vector<256x32xf32> -> vector<256x64xf32>
    %c0_23 = arith.constant 0 : index
    %c0_24 = arith.constant 0 : index
    %53 = vector.load %arg5[%c0_23, %c0_24] : memref<256x64xf32, #tpu.memory_space<vmem>>, vector<256x64xf32>
    tpu.vector_store %arg5[%c0_23, %c0_24], %52 {strides = array<i32>} : memref<256x64xf32, #tpu.memory_space<vmem>>, vector<256x64xf32>,
    return
  }
  func.func @transform_0(%arg0: i32) -> (i32, i32) {
    %c0_i32 = arith.constant 0 : i32
    %c0_i32_0 = arith.constant 0 : i32
    return %arg0, %c0_i32 : i32, i32
  }
  func.func @transform_1(%arg0: i32) -> (i32, i32) {
    %c0_i32 = arith.constant 0 : i32
    %c0_i32_0 = arith.constant 0 : i32
    return %arg0, %c0_i32 : i32, i32
  }
  func.func @transform_2(%arg0: i32) -> (i32, i32) {
    %c0_i32 = arith.constant 0 : i32
    %c0_i32_0 = arith.constant 0 : i32
    return %arg0, %c0_i32 : i32, i32
  }
  func.func @transform_3(%arg0: i32) -> (i32, i32) {
    %c0_i32 = arith.constant 0 : i32
    %c0_i32_0 = arith.constant 0 : i32
    %c0_i32_1 = arith.constant 0 : i32
    return %c0_i32, %c0_i32_0 : i32, i32
  }
  func.func @transform_4(%arg0: i32) -> (i32, i32) {
    %c0_i32 = arith.constant 0 : i32
    %c0_i32_0 = arith.constant 0 : i32
    return %arg0, %c0_i32 : i32, i32
  }
}

</mosaic_0001>

<bundles_post_ra>
// kernel: tpu_custom_call.1
= control target key start
LH: loop header
LB: loop body
LE: loop exit
PB: predicated region body
PF: predicated region fallthrough
CT: control target
= control target key end

     0   :  { %s4463_s19 = smov 16   ;;  %s4464_s20 = smov 24   ;;  %vm369_vm0 = vcmask 130048   ;;  %vm402_vm1 = vcmask 195584   ;;  %vm435_vm2 = vcmask 211968   ;;  %vm494_vm3 = vcmask 523264   ;;  %s6871_s1 = inlined_call_operand.vmem [shape: f32[256,8], index: 1, kind: input, shape index: {}]   ;;  %s6872_s0 = inlined_call_operand.vmem [shape: f32[256,2], index: 0, kind: input, shape index: {}]   ;;  %s6873_s3 = inlined_call_operand.vmem [shape: f32[208,64], index: 3, kind: input, shape index: {}]   ;;  %s6874_s2 = inlined_call_operand.vmem [shape: f32[256,8], index: 2, kind: input, shape index: {}]   ;;  %s6875_s4 = inlined_call_operand.vmem [shape: f32[256,64], index: 4, kind: output, shape index: {}]  }
   0x1   :  { %v49_v0 = vld [vmem:[%s6871_s1] sm:$0xff]  ;;  %v50_v2 = vld [vmem:[%s6871_s1 + $0x8] sm:$0xff]  ;;  %v51_v4 = vld [vmem:[%s6871_s1 + $0x10] sm:$0xff]  ;;  %s4465_s23 = smov 8   ;;  %s4466_s6 = smov 104   ;;  %vm2550_vm4 = vcmask 64512  }
   0x2   :  { %v17_v1 = vld [vmem:[%s6872_s0] sm:$0xff]  ;;  %145 = vrot.lane.b32.xlu0 %v49_v0, %s4463_s19  ;;  %v18_v3 = vld [vmem:[%s6872_s0 + $0x8] sm:$0xff]  ;;  %v52_v5 = vld [vmem:[%s6871_s1 + $0x18] sm:$0xff]  ;;  %vm3352_vm5 = vcmask 72704   ;;  %vm3449_vm6 = vcmask 261120  }
   0x3   :  { %273 = vrot.lane.b32.xlu1 %v17_v1, %s4464_s20  ;;  %v19_v6 = vld [vmem:[%s6872_s0 + $0x10] sm:$0xff]  ;;  %v20_v7 = vld [vmem:[%s6872_s0 + $0x18] sm:$0xff]  ;;  %v53_v8 = vld [vmem:[%s6871_s1 + $0x20] sm:$0xff] }
   0x4   :  { %v54_v9 = vld [vmem:[%s6871_s1 + $0x28] sm:$0xff]  ;;  %v21_v10 = vld [vmem:[%s6872_s0 + $0x20] sm:$0xff]  ;;  %v475_v12 = vld [vmem:[%s6873_s3 + $0x38] sm:$0xff] }
   0x5   :  { %v22_v11 = vld [vmem:[%s6872_s0 + $0x28] sm:$0xff]  ;;  %3832 = vmatprep.subr.mxu0 %v475_v12  ;;  %v474_v13 = vld [vmem:[%s6873_s3 + $0x30] sm:$0xff]  ;;  %v56_v15 = vld [vmem:[%s6871_s1 + $0x38] sm:$0xff] }
   0x6   :  { %147 = vrot.lane.b32.xlu0 %v50_v2, %s4463_s19  ;;  %v55_v14 = vld [vmem:[%s6871_s1 + $0x30] sm:$0xff]  ;;  %3833 = vmatpush3.msra.mxu0 %v475_v12  ;;  %v473_v16 = vld [vmem:[%s6873_s3 + $0x28] sm:$0xff]  ;;  %v472_v17 = vld [vmem:[%s6873_s3 + $0x20] sm:$0xff] }
   0x7   :  { %275 = vrot.lane.b32.xlu1 %v18_v3, %s4464_s20  ;;  %3834 = vmatprep.subr.mxu0 %v474_v13  ;;  %v23_v18 = vld [vmem:[%s6872_s0 + $0x30] sm:$0xff]  ;;  %v24_v19 = vld [vmem:[%s6872_s0 + $0x38] sm:$0xff]  ;;  %v57_v21 = vld [vmem:[%s6871_s1 + $0x40] sm:$0xff] }
   0x8   :  { %3835 = vmatpush3.msra.mxu0 %v474_v13  ;;  %v471_v20 = vld [vmem:[%s6873_s3 + $0x18] sm:$0xff]  ;;  %v58_v22 = vld [vmem:[%s6871_s1 + $0x48] sm:$0xff]  ;;  %v470_v23 = vld [vmem:[%s6873_s3 + $0x10] sm:$0xff] }
   0x9   :  { %3836 = vmatprep.subr.mxu0 %v473_v16  ;;  %v469_v24 = vld [vmem:[%s6873_s3 + $0x8] sm:$0xff]  ;;  %v25_v25 = vld [vmem:[%s6872_s0 + $0x40] sm:$0xff]  ;;  %v59_v28 = vld [vmem:[%s6871_s1 + $0x50] sm:$0xff] }
   0xa   :  { %149 = vrot.lane.b32.xlu0 %v51_v4, %s4463_s19  ;;  %3837 = vmatpush3.msra.mxu0 %v473_v16  ;;  %v26_v26 = vld [vmem:[%s6872_s0 + $0x48] sm:$0xff]  ;;  %v468_v27 = vld [vmem:[%s6873_s3] sm:$0xff]  ;;  %v60_v29 = vld [vmem:[%s6871_s1 + $0x58] sm:$0xff] }
   0xb   :  { %151 = vrot.lane.b32.xlu1 %v52_v5, %s4463_s19  ;;  %3838 = vmatprep.subr.mxu0 %v472_v17  ;;  %v27_v30 = vld [vmem:[%s6872_s0 + $0x50] sm:$0xff]  ;;  %v28_v31 = vld [vmem:[%s6872_s0 + $0x58] sm:$0xff]  ;;  %v61_v32 = vld [vmem:[%s6871_s1 + $0x60] sm:$0xff] }
   0xc   :  { %3839 = vmatpush3.msra.mxu0 %v472_v17  ;;  %v62_v33 = vld [vmem:[%s6871_s1 + $0x68] sm:$0xff]  ;;  %v29_v34 = vld [vmem:[%s6872_s0 + $0x60] sm:$0xff]  ;;  %v63_v36 = vld [vmem:[%s6871_s1 + $0x70] sm:$0xff] }
   0xd   :  { %3840 = vmatprep.subr.mxu0 %v471_v20  ;;  %v30_v35 = vld [vmem:[%s6872_s0 + $0x68] sm:$0xff]  ;;  %v64_v37 = vld [vmem:[%s6871_s1 + $0x78] sm:$0xff]  ;;  %v31_v38 = vld [vmem:[%s6872_s0 + $0x70] sm:$0xff] }
   0xe   :  { %277 = vrot.lane.b32.xlu0 %v19_v6, %s4464_s20  ;;  %3841 = vmatpush3.msra.mxu0 %v471_v20  ;;  %v32_v39 = vld [vmem:[%s6872_s0 + $0x78] sm:$0xff]  ;;  %v65_v40 = vld [vmem:[%s6871_s1 + $0x80] sm:$0xff]  ;;  %v66_v41 = vld [vmem:[%s6871_s1 + $0x88] sm:$0xff] }
   0xf   :  { %279 = vrot.lane.b32.xlu1 %v20_v7, %s4464_s20  ;;  %3842 = vmatprep.subr.mxu0 %v470_v23  ;;  %v33_v42 = vld [vmem:[%s6872_s0 + $0x80] sm:$0xff]  ;;  %v34_v43 = vld [vmem:[%s6872_s0 + $0x88] sm:$0xff]  ;;  %v67_v44 = vld [vmem:[%s6871_s1 + $0x90] sm:$0xff] }
  0x10   :  { %3843 = vmatpush3.msra.mxu0 %v470_v23  ;;  %v68_v45 = vld [vmem:[%s6871_s1 + $0x98] sm:$0xff]  ;;  %v35_v46 = vld [vmem:[%s6872_s0 + $0x90] sm:$0xff]  ;;  %v69_v48 = vld [vmem:[%s6871_s1 + $0xa0] sm:$0xff] }
  0x11   :  { %3844 = vmatprep.subr.mxu0 %v469_v24  ;;  %v36_v47 = vld [vmem:[%s6872_s0 + $0x98] sm:$0xff]  ;;  %v70_v49 = vld [vmem:[%s6871_s1 + $0xa8] sm:$0xff]  ;;  %v37_v50 = vld [vmem:[%s6872_s0 + $0xa0] sm:$0xff] }
  0x12   :  { %153 = vrot.lane.b32.xlu0 %v53_v8, %s4463_s19  ;;  %3845 = vmatpush3.msra.mxu0 %v469_v24  ;;  %v38_v51 = vld [vmem:[%s6872_s0 + $0xa8] sm:$0xff]  ;;  %v71_v52 = vld [vmem:[%s6871_s1 + $0xb0] sm:$0xff]  ;;  %v72_v53 = vld [vmem:[%s6871_s1 + $0xb8] sm:$0xff] }
  0x13   :  { %155 = vrot.lane.b32.xlu1 %v54_v9, %s4463_s19  ;;  %3846 = vmatprep.subr.mxu0 %v468_v27  ;;  %v39_v54 = vld [vmem:[%s6872_s0 + $0xb0] sm:$0xff]  ;;  %v40_v55 = vld [vmem:[%s6872_s0 + $0xb8] sm:$0xff]  ;;  %v73_v56 = vld [vmem:[%s6871_s1 + $0xc0] sm:$0xff] }
  0x14   :  { %3847 = vmatpush3.msra.mxu0 %v468_v27  ;;  %v74_v57 = vld [vmem:[%s6871_s1 + $0xc8] sm:$0xff]  ;;  %v41_v58 = vld [vmem:[%s6872_s0 + $0xc0] sm:$0xff]  ;;  %v75_v60 = vld [vmem:[%s6871_s1 + $0xd0] sm:$0xff] }
  0x15   :  { %v42_v59 = vld [vmem:[%s6872_s0 + $0xc8] sm:$0xff]  ;;  %v76_v61 = vld [vmem:[%s6871_s1 + $0xd8] sm:$0xff]  ;;  %v43_v62 = vld [vmem:[%s6872_s0 + $0xd0] sm:$0xff] }
  0x16   :  { %281 = vrot.lane.b32.xlu0 %v21_v10, %s4464_s20  ;;  %v44_v63 = vld [vmem:[%s6872_s0 + $0xd8] sm:$0xff]  ;;  %v77_v0 = vld [vmem:[%s6871_s1 + $0xe0] sm:$0xff]  ;;  %v78_v1 = vld [vmem:[%s6871_s1 + $0xe8] sm:$0xff] }
  0x17   :  { %283 = vrot.lane.b32.xlu1 %v22_v11, %s4464_s20  ;;  %v45_v2 = vld [vmem:[%s6872_s0 + $0xe0] sm:$0xff]  ;;  %v46_v3 = vld [vmem:[%s6872_s0 + $0xe8] sm:$0xff]  ;;  %v483_v6 = vld [vmem:[%s6873_s3 + $0x78] sm:$0xff] }
  0x18   :  { %3896 = vmatprep.subr.mxu1 %v483_v6  ;;  %v482_v8 = vld [vmem:[%s6873_s3 + $0x70] sm:$0xff]  ;;  %v80_v12 = vld [vmem:[%s6871_s1 + $0xf8] sm:$0xff] }
  0x19   :  { %v79_v11 = vld [vmem:[%s6871_s1 + $0xf0] sm:$0xff]  ;;  %3897 = vmatpush3.msra.mxu1 %v483_v6  ;;  %v479_v24 = vld [vmem:[%s6873_s3 + $0x58] sm:$0xff] }
  0x1a   :  { %157 = vrot.lane.b32.xlu0 %v55_v14, %s4463_s19  ;;  %3898 = vmatprep.subr.mxu1 %v482_v8  ;;  %v47_v20 = vld [vmem:[%s6872_s0 + $0xf0] sm:$0xff] }
  0x1b   :  { %159 = vrot.lane.b32.xlu1 %v56_v15, %s4463_s19  ;;  %v481_v15 = vld [vmem:[%s6873_s3 + $0x68] sm:$0xff]  ;;  %3899 = vmatpush3.msra.mxu1 %v482_v8 }
  0x1c   :  { %3900 = vmatprep.subr.mxu1 %v481_v15 }
  0x1d   :  { %3901 = vmatpush3.msra.mxu1 %v481_v15 }
  0x1e   :  { %285 = vrot.lane.b32.xlu0 %v23_v18, %s4464_s20  ;;  %v480_v18 = vld [vmem:[%s6873_s3 + $0x60] sm:$0xff] }
  0x1f   :  { %287 = vrot.lane.b32.xlu1 %v24_v19, %s4464_s20  ;;  %3902 = vmatprep.subr.mxu1 %v480_v18 }
  0x20   :  { %3903 = vmatpush3.msra.mxu1 %v480_v18 }
  0x21   :  { %3904 = vmatprep.subr.mxu1 %v479_v24 }
  0x22   :  { %161 = vrot.lane.b32.xlu0 %v57_v21, %s4463_s19  ;;  %v48_v21 = vld [vmem:[%s6872_s0 + $0xf8] sm:$0xff]  ;;  %3905 = vmatpush3.msra.mxu1 %v479_v24 }
  0x23   :  { %163 = vrot.lane.b32.xlu1 %v58_v22, %s4463_s19 }
  0x26   :  { %289 = vrot.lane.b32.xlu0 %v25_v25, %s4464_s20 }
  0x27   :  { %291 = vrot.lane.b32.xlu1 %v26_v26, %s4464_s20 }
  0x2a   :  { %165 = vrot.lane.b32.xlu0 %v59_v28, %s4463_s19 }
  0x2b   :  { %167 = vrot.lane.b32.xlu1 %v60_v29, %s4463_s19 }
  0x2e   :  { %293 = vrot.lane.b32.xlu0 %v27_v30, %s4464_s20 }
  0x2f   :  { %295 = vrot.lane.b32.xlu1 %v28_v31, %s4464_s20 }
  0x32   :  { %169 = vrot.lane.b32.xlu0 %v61_v32, %s4463_s19 }
  0x33   :  { %171 = vrot.lane.b32.xlu1 %v62_v33, %s4463_s19 }
  0x36   :  { %297 = vrot.lane.b32.xlu0 %v29_v34, %s4464_s20 }
  0x37   :  { %299 = vrot.lane.b32.xlu1 %v30_v35, %s4464_s20 }
  0x3a   :  { %173 = vrot.lane.b32.xlu0 %v63_v36, %s4463_s19 }
  0x3b   :  { %175 = vrot.lane.b32.xlu1 %v64_v37, %s4463_s19 }
  0x3e   :  { %301 = vrot.lane.b32.xlu0 %v31_v38, %s4464_s20 }
  0x3f   :  { %303 = vrot.lane.b32.xlu1 %v32_v39, %s4464_s20 }
  0x42   :  { %177 = vrot.lane.b32.xlu0 %v65_v40, %s4463_s19 }
  0x43   :  { %179 = vrot.lane.b32.xlu1 %v66_v41, %s4463_s19 }
  0x46   :  { %305 = vrot.lane.b32.xlu0 %v33_v42, %s4464_s20 }
  0x47   :  { %307 = vrot.lane.b32.xlu1 %v34_v43, %s4464_s20 }
  0x4a   :  { %181 = vrot.lane.b32.xlu0 %v67_v44, %s4463_s19 }
  0x4b   :  { %183 = vrot.lane.b32.xlu1 %v68_v45, %s4463_s19 }
  0x4e   :  { %309 = vrot.lane.b32.xlu0 %v35_v46, %s4464_s20 }
  0x4f   :  { %311 = vrot.lane.b32.xlu1 %v36_v47, %s4464_s20 }
  0x52   :  { %185 = vrot.lane.b32.xlu0 %v69_v48, %s4463_s19 }
  0x53   :  { %187 = vrot.lane.b32.xlu1 %v70_v49, %s4463_s19 }
  0x56   :  { %313 = vrot.lane.b32.xlu0 %v37_v50, %s4464_s20 }
  0x57   :  { %315 = vrot.lane.b32.xlu1 %v38_v51, %s4464_s20 }
  0x5a   :  { %189 = vrot.lane.b32.xlu0 %v71_v52, %s4463_s19 }
  0x5b   :  { %191 = vrot.lane.b32.xlu1 %v72_v53, %s4463_s19 }
  0x5e   :  { %317 = vrot.lane.b32.xlu0 %v39_v54, %s4464_s20 }
  0x5f   :  { %319 = vrot.lane.b32.xlu1 %v40_v55, %s4464_s20 }
  0x62   :  { %193 = vrot.lane.b32.xlu0 %v73_v56, %s4463_s19 }
  0x63   :  { %195 = vrot.lane.b32.xlu1 %v74_v57, %s4463_s19 }
  0x66   :  { %321 = vrot.lane.b32.xlu0 %v41_v58, %s4464_s20 }
  0x67   :  { %323 = vrot.lane.b32.xlu1 %v42_v59, %s4464_s20 }
  0x6a   :  { %197 = vrot.lane.b32.xlu0 %v75_v60, %s4463_s19 }
  0x6b   :  { %199 = vrot.lane.b32.xlu1 %v76_v61, %s4463_s19 }
  0x6e   :  { %325 = vrot.lane.b32.xlu0 %v43_v62, %s4464_s20 }
  0x6f   :  { %327 = vrot.lane.b32.xlu1 %v44_v63, %s4464_s20 }
  0x72   :  { %201 = vrot.lane.b32.xlu0 %v77_v0, %s4463_s19 }
  0x73   :  { %203 = vrot.lane.b32.xlu1 %v78_v1, %s4463_s19 }
  0x74   :  { %v146_v4 = vpop.permute.xlu0 %145 }
  0x75   :  { %v274_v5 = vpop.permute.xlu1 %273  ;;  %v370_v7 = vsel %vm369_vm0, 0.0, %v146_v4 }
  0x76   :  { %329 = vrot.lane.b32.xlu0 %v45_v2, %s4464_s20  ;;  %v403_v9 = vsel %vm402_vm1, %v370_v7, %v274_v5 }
  0x77   :  { %331 = vrot.lane.b32.xlu1 %v46_v3, %s4464_s20  ;;  %v4766_v10 = vsel %vm435_vm2, %v403_v9, 0.0 }
  0x78   :  { %v148_v13 = vpop.permute.xlu0 %147  ;;  %3848 = vmatprep.mubr.msk.f32.mxu0 %vm494_vm3, %v4766_v10 }
  0x79   :  { %v276_v14 = vpop.permute.xlu1 %275  ;;  %v371_v16 = vsel %vm369_vm0, 0.0, %v148_v13 }
  0x7a   :  { %v404_v17 = vsel %vm402_vm1, %v371_v16, %v276_v14  ;;  %205 = vrot.lane.b32.xlu0 %v79_v11, %s4463_s19 }
  0x7b   :  { %207 = vrot.lane.b32.xlu1 %v80_v12, %s4463_s19  ;;  %v4787_v19 = vsel %vm435_vm2, %v404_v17, 0.0 }
  0x7c   :  { %v150_v22 = vpop.permute.xlu0 %149  ;;  %3849 = vmatmul.mubr.msk.f32.vlgmr.msra.gmra.mxu0 %vm494_vm3, %v4787_v19 }
  0x7d   :  { %v152_v23 = vpop.permute.xlu1 %151  ;;  %v372_v25 = vsel %vm369_vm0, 0.0, %v150_v22 }
  0x7e   :  { %333 = vrot.lane.b32.xlu0 %v47_v20, %s4464_s20  ;;  %v373_v26 = vsel %vm369_vm0, 0.0, %v152_v23 }
  0x7f   :  { %335 = vrot.lane.b32.xlu1 %v48_v21, %s4464_s20 }
  0x80   :  { %v278_v27 = vpop.permute.xlu0 %277 }
  0x81   :  { %v280_v28 = vpop.permute.xlu1 %279  ;;  %v405_v29 = vsel %vm402_vm1, %v372_v25, %v278_v27 }
  0x82   :  { %v406_v30 = vsel %vm402_vm1, %v373_v26, %v280_v28  ;;  %v4807_v31 = vsel %vm435_vm2, %v405_v29, 0.0 }
  0x83   :  { %v4810_v32 = vsel %vm435_vm2, %v406_v30, 0.0  ;;  %3851 = vmatprep.mubr.msk.f32.mxu0 %vm494_vm3, %v4807_v31 }
  0x84   :  { %v154_v33 = vpop.permute.xlu0 %153  ;;  %3852 = vmatmul.mubr.msk.f32.gmra.mxu0 %vm494_vm3, %v4810_v32 }
  0x85   :  { %v156_v34 = vpop.permute.xlu1 %155  ;;  %v374_v35 = vsel %vm369_vm0, 0.0, %v154_v33 }
  0x86   :  { %v375_v36 = vsel %vm369_vm0, 0.0, %v156_v34 }
  0x88   :  { %v282_v37 = vpop.permute.xlu0 %281 }
  0x89   :  { %v284_v38 = vpop.permute.xlu1 %283  ;;  %v407_v39 = vsel %vm402_vm1, %v374_v35, %v282_v37 }
  0x8a   :  { %v408_v40 = vsel %vm402_vm1, %v375_v36, %v284_v38  ;;  %v4821_v41 = vsel %vm435_vm2, %v407_v39, 0.0 }
  0x8b   :  { %v4824_v42 = vsel %vm435_vm2, %v408_v40, 0.0  ;;  %3854 = vmatprep.mubr.msk.f32.mxu0 %vm494_vm3, %v4821_v41 }
  0x8c   :  { %v158_v43 = vpop.permute.xlu0 %157  ;;  %3855 = vmatmul.mubr.msk.f32.gmra.mxu0 %vm494_vm3, %v4824_v42 }
  0x8d   :  { %v160_v44 = vpop.permute.xlu1 %159  ;;  %v376_v45 = vsel %vm369_vm0, 0.0, %v158_v43 }
  0x8e   :  { %v377_v46 = vsel %vm369_vm0, 0.0, %v160_v44 }
  0x90   :  { %v286_v47 = vpop.permute.xlu0 %285 }
  0x91   :  { %v288_v48 = vpop.permute.xlu1 %287  ;;  %v409_v49 = vsel %vm402_vm1, %v376_v45, %v286_v47  ;;  %v478_v45 = vld [vmem:[%s6873_s3 + $0x50] sm:$0xff] }
  0x92   :  { %v410_v50 = vsel %vm402_vm1, %v377_v46, %v288_v48  ;;  %v4835_v51 = vsel %vm435_vm2, %v409_v49, 0.0  ;;  %3906 = vmatprep.subr.mxu1 %v478_v45  ;;  %v477_v48 = vld [vmem:[%s6873_s3 + $0x48] sm:$0xff]  ;;  %v476_v49 = vld [vmem:[%s6873_s3 + $0x40] sm:$0xff] }
  0x93   :  { %v4838_v52 = vsel %vm435_vm2, %v410_v50, 0.0  ;;  %3857 = vmatprep.mubr.msk.f32.mxu0 %vm494_vm3, %v4835_v51  ;;  %3907 = vmatpush3.msra.mxu1 %v478_v45 }
  0x94   :  { %v162_v53 = vpop.permute.xlu0 %161  ;;  %3858 = vmatmul.mubr.msk.f32.gmra.mxu0 %vm494_vm3, %v4838_v52  ;;  %3908 = vmatprep.subr.mxu1 %v477_v48 }
  0x95   :  { %v164_v54 = vpop.permute.xlu1 %163  ;;  %v378_v55 = vsel %vm369_vm0, 0.0, %v162_v53  ;;  %3909 = vmatpush3.msra.mxu1 %v477_v48 }
  0x96   :  { %v379_v56 = vsel %vm369_vm0, 0.0, %v164_v54  ;;  %3910 = vmatprep.subr.mxu1 %v476_v49 }
  0x97   :  { %3911 = vmatpush3.msra.mxu1 %v476_v49 }
  0x98   :  { %v290_v57 = vpop.permute.xlu0 %289 }
  0x99   :  { %v292_v58 = vpop.permute.xlu1 %291  ;;  %v411_v59 = vsel %vm402_vm1, %v378_v55, %v290_v57 }
  0x9a   :  { %v412_v60 = vsel %vm402_vm1, %v379_v56, %v292_v58  ;;  %v4849_v61 = vsel %vm435_vm2, %v411_v59, 0.0 }
  0x9b   :  { %v4852_v62 = vsel %vm435_vm2, %v412_v60, 0.0  ;;  %3860 = vmatprep.mubr.msk.f32.mxu0 %vm494_vm3, %v4849_v61 }
  0x9c   :  { %v166_v63 = vpop.permute.xlu0 %165  ;;  %3861 = vmatmul.mubr.msk.f32.gmra.mxu0 %vm494_vm3, %v4852_v62 }
  0x9d   :  { %v168_v0 = vpop.permute.xlu1 %167  ;;  %v380_v1 = vsel %vm369_vm0, 0.0, %v166_v63 }
  0x9e   :  { %v381_v2 = vsel %vm369_vm0, 0.0, %v168_v0 }
  0xa0   :  { %v294_v3 = vpop.permute.xlu0 %293 }
  0xa1   :  { %v296_v4 = vpop.permute.xlu1 %295  ;;  %v413_v5 = vsel %vm402_vm1, %v380_v1, %v294_v3 }
  0xa2   :  { %v414_v6 = vsel %vm402_vm1, %v381_v2, %v296_v4  ;;  %v4863_v7 = vsel %vm435_vm2, %v413_v5, 0.0 }
  0xa3   :  { %v4866_v8 = vsel %vm435_vm2, %v414_v6, 0.0  ;;  %3863 = vmatprep.mubr.msk.f32.mxu0 %vm494_vm3, %v4863_v7 }
  0xa4   :  { %v170_v9 = vpop.permute.xlu0 %169  ;;  %3864 = vmatmul.mubr.msk.f32.gmra.mxu0 %vm494_vm3, %v4866_v8 }
  0xa5   :  { %v172_v11 = vpop.permute.xlu1 %171  ;;  %v382_v12 = vsel %vm369_vm0, 0.0, %v170_v9 }
  0xa6   :  { %v383_v13 = vsel %vm369_vm0, 0.0, %v172_v11 }
  0xa8   :  { %v298_v14 = vpop.permute.xlu0 %297 }
  0xa9   :  { %v300_v15 = vpop.permute.xlu1 %299  ;;  %v415_v16 = vsel %vm402_vm1, %v382_v12, %v298_v14 }
  0xaa   :  { %v416_v17 = vsel %vm402_vm1, %v383_v13, %v300_v15  ;;  %v4877_v18 = vsel %vm435_vm2, %v415_v16, 0.0 }
  0xab   :  { %v4880_v20 = vsel %vm435_vm2, %v416_v17, 0.0  ;;  %3866 = vmatprep.mubr.msk.f32.mxu0 %vm494_vm3, %v4877_v18 }
  0xac   :  { %v174_v21 = vpop.permute.xlu0 %173  ;;  %3867 = vmatmul.mubr.msk.f32.gmra.mxu0 %vm494_vm3, %v4880_v20 }
  0xad   :  { %v176_v22 = vpop.permute.xlu1 %175  ;;  %v384_v23 = vsel %vm369_vm0, 0.0, %v174_v21 }
  0xae   :  { %v385_v24 = vsel %vm369_vm0, 0.0, %v176_v22 }
  0xb0   :  { %v302_v25 = vpop.permute.xlu0 %301 }
  0xb1   :  { %v304_v26 = vpop.permute.xlu1 %303  ;;  %v417_v27 = vsel %vm402_vm1, %v384_v23, %v302_v25 }
  0xb2   :  { %v418_v28 = vsel %vm402_vm1, %v385_v24, %v304_v26  ;;  %v4891_v29 = vsel %vm435_vm2, %v417_v27, 0.0 }
  0xb3   :  { %v4894_v30 = vsel %vm435_vm2, %v418_v28, 0.0  ;;  %3869 = vmatprep.mubr.msk.f32.mxu0 %vm494_vm3, %v4891_v29 }
  0xb4   :  { %v178_v33 = vpop.permute.xlu0 %177  ;;  %3870 = vmatmul.mubr.msk.f32.gmra.mxu0 %vm494_vm3, %v4894_v30 }
  0xb5   :  { %v180_v34 = vpop.permute.xlu1 %179  ;;  %v386_v35 = vsel %vm369_vm0, 0.0, %v178_v33 }
  0xb6   :  { %v387_v36 = vsel %vm369_vm0, 0.0, %v180_v34 }
  0xb8   :  { %v306_v37 = vpop.permute.xlu0 %305 }
  0xb9   :  { %v308_v38 = vpop.permute.xlu1 %307  ;;  %v419_v39 = vsel %vm402_vm1, %v386_v35, %v306_v37 }
  0xba   :  { %v420_v40 = vsel %vm402_vm1, %v387_v36, %v308_v38  ;;  %v4905_v43 = vsel %vm435_vm2, %v419_v39, 0.0 }
  0xbb   :  { %v4908_v44 = vsel %vm435_vm2, %v420_v40, 0.0  ;;  %3872 = vmatprep.mubr.msk.f32.mxu0 %vm494_vm3, %v4905_v43 }
  0xbc   :  { %v182_v46 = vpop.permute.xlu0 %181  ;;  %3873 = vmatmul.mubr.msk.f32.gmra.mxu0 %vm494_vm3, %v4908_v44 }
  0xbd   :  { %v184_v47 = vpop.permute.xlu1 %183  ;;  %v388_v50 = vsel %vm369_vm0, 0.0, %v182_v46 }
  0xbe   :  { %v389_v53 = vsel %vm369_vm0, 0.0, %v184_v47 }
  0xc0   :  { %v310_v54 = vpop.permute.xlu0 %309 }
  0xc1   :  { %v312_v55 = vpop.permute.xlu1 %311  ;;  %v421_v56 = vsel %vm402_vm1, %v388_v50, %v310_v54 }
  0xc2   :  { %v422_v57 = vsel %vm402_vm1, %v389_v53, %v312_v55  ;;  %v4928_v58 = vsel %vm435_vm2, %v421_v56, 0.0 }
  0xc3   :  { %v4931_v59 = vsel %vm435_vm2, %v422_v57, 0.0  ;;  %3875 = vmatprep.mubr.msk.f32.mxu0 %vm494_vm3, %v4928_v58 }
  0xc4   :  { %v186_v60 = vpop.permute.xlu0 %185  ;;  %3876 = vmatmul.mubr.msk.f32.gmra.mxu0 %vm494_vm3, %v4931_v59 }
  0xc5   :  { %v188_v63 = vpop.permute.xlu1 %187  ;;  %v390_v0 = vsel %vm369_vm0, 0.0, %v186_v60 }
  0xc6   :  { %v391_v1 = vsel %vm369_vm0, 0.0, %v188_v63 }
  0xc8   :  { %v314_v2 = vpop.permute.xlu0 %313 }
  0xc9   :  { %v316_v3 = vpop.permute.xlu1 %315  ;;  %v423_v4 = vsel %vm402_vm1, %v390_v0, %v314_v2 }
  0xca   :  { %v424_v5 = vsel %vm402_vm1, %v391_v1, %v316_v3  ;;  %v4942_v6 = vsel %vm435_vm2, %v423_v4, 0.0 }
  0xcb   :  { %v4945_v9 = vsel %vm435_vm2, %v424_v5, 0.0  ;;  %3878 = vmatprep.mubr.msk.f32.mxu0 %vm494_vm3, %v4942_v6 }
  0xcc   :  { %v190_v11 = vpop.permute.xlu0 %189  ;;  %3879 = vmatmul.mubr.msk.f32.gmra.mxu0 %vm494_vm3, %v4945_v9 }
  0xcd   :  { %v192_v12 = vpop.permute.xlu1 %191  ;;  %v392_v13 = vsel %vm369_vm0, 0.0, %v190_v11 }
  0xce   :  { %v393_v14 = vsel %vm369_vm0, 0.0, %v192_v12 }
  0xd0   :  { %v318_v15 = vpop.permute.xlu0 %317 }
  0xd1   :  { %v320_v16 = vpop.permute.xlu1 %319  ;;  %v425_v17 = vsel %vm402_vm1, %v392_v13, %v318_v15 }
  0xd2   :  { %v426_v21 = vsel %vm402_vm1, %v393_v14, %v320_v16  ;;  %v4956_v22 = vsel %vm435_vm2, %v425_v17, 0.0 }
  0xd3   :  { %v4959_v23 = vsel %vm435_vm2, %v426_v21, 0.0  ;;  %3881 = vmatprep.mubr.msk.f32.mxu0 %vm494_vm3, %v4956_v22 }
  0xd4   :  { %v194_v24 = vpop.permute.xlu0 %193  ;;  %3882 = vmatmul.mubr.msk.f32.gmra.mxu0 %vm494_vm3, %v4959_v23 }
  0xd5   :  { %v196_v25 = vpop.permute.xlu1 %195  ;;  %v394_v26 = vsel %vm369_vm0, 0.0, %v194_v24  ;;  %v491_v24 = vld [vmem:[%s6873_s3 + $0xb8] sm:$0xff] }
  0xd6   :  { %v395_v27 = vsel %vm369_vm0, 0.0, %v196_v25  ;;  %v490_v25 = vld [vmem:[%s6873_s3 + $0xb0] sm:$0xff]  ;;  %3960 = vmatprep.subr.mxu0 %v491_v24 }
  0xd7   :  { %3961 = vmatpush3.msra.mxu0 %v491_v24 }
  0xd8   :  { %v322_v28 = vpop.permute.xlu0 %321  ;;  %3962 = vmatprep.subr.mxu0 %v490_v25 }
  0xd9   :  { %v324_v33 = vpop.permute.xlu1 %323  ;;  %v427_v34 = vsel %vm402_vm1, %v394_v26, %v322_v28  ;;  %3963 = vmatpush3.msra.mxu0 %v490_v25 }
  0xda   :  { %v428_v35 = vsel %vm402_vm1, %v395_v27, %v324_v33  ;;  %v4970_v36 = vsel %vm435_vm2, %v427_v34, 0.0  ;;  %v489_v27 = vld [vmem:[%s6873_s3 + $0xa8] sm:$0xff]  ;;  %v488_v33 = vld [vmem:[%s6873_s3 + $0xa0] sm:$0xff] }
  0xdb   :  { %v4973_v37 = vsel %vm435_vm2, %v428_v35, 0.0  ;;  %3884 = vmatprep.mubr.msk.f32.mxu0 %vm494_vm3, %v4970_v36  ;;  %3964 = vmatprep.subr.mxu0 %v489_v27 }
  0xdc   :  { %v198_v38 = vpop.permute.xlu0 %197  ;;  %3885 = vmatmul.mubr.msk.f32.gmra.mxu0 %vm494_vm3, %v4973_v37 }
  0xdd   :  { %v200_v39 = vpop.permute.xlu1 %199  ;;  %v396_v40 = vsel %vm369_vm0, 0.0, %v198_v38  ;;  %3965 = vmatpush3.msra.mxu0 %v489_v27 }
  0xde   :  { %v397_v45 = vsel %vm369_vm0, 0.0, %v200_v39  ;;  %3966 = vmatprep.subr.mxu0 %v488_v33 }
  0xdf   :  { %3967 = vmatpush3.msra.mxu0 %v488_v33 }
  0xe0   :  { %v326_v46 = vpop.permute.xlu0 %325 }
  0xe1   :  { %v328_v47 = vpop.permute.xlu1 %327  ;;  %v429_v48 = vsel %vm402_vm1, %v396_v40, %v326_v46 }
  0xe2   :  { %v430_v49 = vsel %vm402_vm1, %v397_v45, %v328_v47  ;;  %v4984_v50 = vsel %vm435_vm2, %v429_v48, 0.0 }
  0xe3   :  { %v4987_v53 = vsel %vm435_vm2, %v430_v49, 0.0  ;;  %3887 = vmatprep.mubr.msk.f32.mxu0 %vm494_vm3, %v4984_v50 }
  0xe4   :  { %v202_v54 = vpop.permute.xlu0 %201  ;;  %3888 = vmatmul.mubr.msk.f32.gmra.mxu0 %vm494_vm3, %v4987_v53 }
  0xe5   :  { %v204_v55 = vpop.permute.xlu1 %203  ;;  %v398_v56 = vsel %vm369_vm0, 0.0, %v202_v54 }
  0xe6   :  { %v399_v57 = vsel %vm369_vm0, 0.0, %v204_v55 }
  0xe8   :  { %v330_v60 = vpop.permute.xlu0 %329 }
  0xe9   :  { %v332_v63 = vpop.permute.xlu1 %331  ;;  %v431_v0 = vsel %vm402_vm1, %v398_v56, %v330_v60 }
  0xea   :  { %v432_v1 = vsel %vm402_vm1, %v399_v57, %v332_v63  ;;  %v4998_v2 = vsel %vm435_vm2, %v431_v0, 0.0 }
  0xeb   :  { %v5001_v3 = vsel %vm435_vm2, %v432_v1, 0.0  ;;  %3890 = vmatprep.mubr.msk.f32.mxu0 %vm494_vm3, %v4998_v2 }
  0xec   :  { %v206_v4 = vpop.permute.xlu0 %205  ;;  %3891 = vmatmul.mubr.msk.f32.gmra.mxu0 %vm494_vm3, %v5001_v3 }
  0xed   :  { %v208_v5 = vpop.permute.xlu1 %207  ;;  %v400_v11 = vsel %vm369_vm0, 0.0, %v206_v4 }
  0xee   :  { %v401_v12 = vsel %vm369_vm0, 0.0, %v208_v5 }
  0xf0   :  { %v334_v13 = vpop.permute.xlu0 %333 }
  0xf1   :  { %v336_v14 = vpop.permute.xlu1 %335  ;;  %v433_v15 = vsel %vm402_vm1, %v400_v11, %v334_v13 }
  0xf2   :  { %v434_v16 = vsel %vm402_vm1, %v401_v12, %v336_v14  ;;  %v5012_v17 = vsel %vm435_vm2, %v433_v15, 0.0 }
  0xf3   :  { %v5015_v21 = vsel %vm435_vm2, %v434_v16, 0.0  ;;  %3893 = vmatprep.mubr.msk.f32.mxu0 %vm494_vm3, %v5012_v17 }
  0xf4   :  { %3894 = vmatmul.mubr.msk.f32.gmra.mxu0 %vm494_vm3, %v5015_v21 }
 0x13c   :  { %v3850_v26 = vpop.f32.mrf.mxu0 }
 0x13d   :  { %v817_v35 = vmax.f32 %v3850_v26, 0.0 }
 0x13e   :  { %v657_v28 = vpop.f32.mrf.mxu0 }
 0x13f   :  { %v816_v34 = vmax.f32 %v657_v28, 0.0 }
 0x141   :  { %3912 = vmatprep.mubr.msk.f32.mxu1 %vm494_vm3, %v816_v34 }
 0x142   :  { %3913 = vmatmul.mubr.msk.f32.vlgmr.msra.gmra.mxu1 %vm494_vm3, %v817_v35 }
 0x144   :  { %v3853_v38 = vpop.f32.mrf.mxu0 }
 0x145   :  { %v819_v45 = vmax.f32 %v3853_v38, 0.0  ;;  %v487_v38 = vld [vmem:[%s6873_s3 + $0x98] sm:$0xff] }
 0x146   :  { %v667_v39 = vpop.f32.mrf.mxu0  ;;  %3968 = vmatprep.subr.mxu0 %v487_v38 }
 0x147   :  { %v818_v40 = vmax.f32 %v667_v39, 0.0  ;;  %3969 = vmatpush3.msra.mxu0 %v487_v38  ;;  %v486_v39 = vld [vmem:[%s6873_s3 + $0x90] sm:$0xff]  ;;  %v82_v38 = vld [vmem:[%s6874_s2 + $0x8] sm:$0xff] }
 0x148   :  { %3970 = vmatprep.subr.mxu0 %v486_v39  ;;  %1816 = vrot.lane.b32.xlu1 %v82_v38, %s4465_s23 }
 0x149   :  { %3915 = vmatprep.mubr.msk.f32.mxu1 %vm494_vm3, %v818_v40  ;;  %3971 = vmatpush3.msra.mxu0 %v486_v39  ;;  %v81_v39 = vld [vmem:[%s6874_s2] sm:$0xff] }
 0x14a   :  { %3916 = vmatmul.mubr.msk.f32.gmra.mxu1 %vm494_vm3, %v819_v45  ;;  %v485_v45 = vld [vmem:[%s6873_s3 + $0x88] sm:$0xff]  ;;  %1814 = vrot.lane.b32.xlu0 %v81_v39, %s4465_s23 }
 0x14b   :  { %3972 = vmatprep.subr.mxu0 %v485_v45 }
 0x14c   :  { %v3856_v46 = vpop.f32.mrf.mxu0  ;;  %3973 = vmatpush3.msra.mxu0 %v485_v45 }
 0x14d   :  { %v821_v49 = vmax.f32 %v3856_v46, 0.0 }
 0x14e   :  { %v677_v47 = vpop.f32.mrf.mxu0 }
 0x14f   :  { %v820_v48 = vmax.f32 %v677_v47, 0.0 }
 0x151   :  { %3918 = vmatprep.mubr.msk.f32.mxu1 %vm494_vm3, %v820_v48  ;;  %v484_v48 = vld [vmem:[%s6873_s3 + $0x80] sm:$0xff] }
 0x152   :  { %3919 = vmatmul.mubr.msk.f32.gmra.mxu1 %vm494_vm3, %v821_v49  ;;  %3974 = vmatprep.subr.mxu0 %v484_v48 }
 0x153   :  { %3975 = vmatpush3.msra.mxu0 %v484_v48 }
 0x154   :  { %v3859_v54 = vpop.f32.mrf.mxu0 }
 0x155   :  { %v823_v57 = vmax.f32 %v3859_v54, 0.0 }
 0x156   :  { %v687_v55 = vpop.f32.mrf.mxu0 }
 0x157   :  { %v822_v56 = vmax.f32 %v687_v55, 0.0 }
 0x159   :  { %3921 = vmatprep.mubr.msk.f32.mxu1 %vm494_vm3, %v822_v56 }
 0x15a   :  { %3922 = vmatmul.mubr.msk.f32.gmra.mxu1 %vm494_vm3, %v823_v57 }
 0x15c   :  { %v3862_v60 = vpop.f32.mrf.mxu0 }
 0x15d   :  { %v825_v1 = vmax.f32 %v3862_v60, 0.0 }
 0x15e   :  { %v697_v63 = vpop.f32.mrf.mxu0 }
 0x15f   :  { %v824_v0 = vmax.f32 %v697_v63, 0.0 }
 0x161   :  { %3924 = vmatprep.mubr.msk.f32.mxu1 %vm494_vm3, %v824_v0 }
 0x162   :  { %3925 = vmatmul.mubr.msk.f32.gmra.mxu1 %vm494_vm3, %v825_v1 }
 0x164   :  { %v3865_v4 = vpop.f32.mrf.mxu0 }
 0x165   :  { %v827_v12 = vmax.f32 %v3865_v4, 0.0 }
 0x166   :  { %v707_v5 = vpop.f32.mrf.mxu0 }
 0x167   :  { %v826_v11 = vmax.f32 %v707_v5, 0.0 }
 0x169   :  { %3927 = vmatprep.mubr.msk.f32.mxu1 %vm494_vm3, %v826_v11 }
 0x16a   :  { %3928 = vmatmul.mubr.msk.f32.gmra.mxu1 %vm494_vm3, %v827_v12 }
 0x16c   :  { %v3868_v13 = vpop.f32.mrf.mxu0 }
 0x16d   :  { %v829_v16 = vmax.f32 %v3868_v13, 0.0 }
 0x16e   :  { %v717_v14 = vpop.f32.mrf.mxu0 }
 0x16f   :  { %v828_v15 = vmax.f32 %v717_v14, 0.0 }
 0x171   :  { %3930 = vmatprep.mubr.msk.f32.mxu1 %vm494_vm3, %v828_v15 }
 0x172   :  { %3931 = vmatmul.mubr.msk.f32.gmra.mxu1 %vm494_vm3, %v829_v16 }
 0x174   :  { %v3871_v24 = vpop.f32.mrf.mxu0 }
 0x175   :  { %v831_v27 = vmax.f32 %v3871_v24, 0.0 }
 0x176   :  { %v727_v25 = vpop.f32.mrf.mxu0 }
 0x177   :  { %v830_v26 = vmax.f32 %v727_v25, 0.0 }
 0x179   :  { %3933 = vmatprep.mubr.msk.f32.mxu1 %vm494_vm3, %v830_v26 }
 0x17a   :  { %3934 = vmatmul.mubr.msk.f32.gmra.mxu1 %vm494_vm3, %v831_v27 }
 0x17c   :  { %v3874_v28 = vpop.f32.mrf.mxu0 }
 0x17d   :  { %v833_v35 = vmax.f32 %v3874_v28, 0.0 }
 0x17e   :  { %v737_v33 = vpop.f32.mrf.mxu0 }
 0x17f   :  { %v832_v34 = vmax.f32 %v737_v33, 0.0 }
 0x181   :  { %3936 = vmatprep.mubr.msk.f32.mxu1 %vm494_vm3, %v832_v34 }
 0x182   :  { %3937 = vmatmul.mubr.msk.f32.gmra.mxu1 %vm494_vm3, %v833_v35 }
 0x184   :  { %v3877_v40 = vpop.f32.mrf.mxu0 }
 0x185   :  { %v835_v49 = vmax.f32 %v3877_v40, 0.0  ;;  %v84_v40 = vld [vmem:[%s6874_s2 + $0x18] sm:$0xff] }
 0x186   :  { %v747_v46 = vpop.f32.mrf.mxu0  ;;  %1820 = vrot.lane.b32.xlu1 %v84_v40, %s4465_s23 }
 0x187   :  { %v834_v47 = vmax.f32 %v747_v46, 0.0  ;;  %v83_v46 = vld [vmem:[%s6874_s2 + $0x10] sm:$0xff] }
 0x188   :  { %1818 = vrot.lane.b32.xlu0 %v83_v46, %s4465_s23 }
 0x189   :  { %3939 = vmatprep.mubr.msk.f32.mxu1 %vm494_vm3, %v834_v47  ;;  %v86_v47 = vld [vmem:[%s6874_s2 + $0x28] sm:$0xff] }
 0x18a   :  { %3940 = vmatmul.mubr.msk.f32.gmra.mxu1 %vm494_vm3, %v835_v49  ;;  %1824 = vrot.lane.b32.xlu1 %v86_v47, %s4465_s23  ;;  %v99_v47 = vld [vmem:[%s6874_s2 + $0x90] sm:$0xff] }
 0x18c   :  { %v3880_v54 = vpop.f32.mrf.mxu0 }
 0x18d   :  { %v837_v57 = vmax.f32 %v3880_v54, 0.0  ;;  %v85_v54 = vld [vmem:[%s6874_s2 + $0x20] sm:$0xff] }
 0x18e   :  { %v757_v55 = vpop.f32.mrf.mxu0  ;;  %1822 = vrot.lane.b32.xlu0 %v85_v54, %s4465_s23 }
 0x18f   :  { %v836_v56 = vmax.f32 %v757_v55, 0.0 }
 0x191   :  { %3942 = vmatprep.mubr.msk.f32.mxu1 %vm494_vm3, %v836_v56 }
 0x192   :  { %3943 = vmatmul.mubr.msk.f32.gmra.mxu1 %vm494_vm3, %v837_v57  ;;  %v88_v57 = vld [vmem:[%s6874_s2 + $0x38] sm:$0xff] }
 0x193   :  { %1828 = vrot.lane.b32.xlu1 %v88_v57, %s4465_s23 }
 0x194   :  { %v3883_v60 = vpop.f32.mrf.mxu0 }
 0x195   :  { %v839_v1 = vmax.f32 %v3883_v60, 0.0 }
 0x196   :  { %v767_v63 = vpop.f32.mrf.mxu0 }
 0x197   :  { %v838_v0 = vmax.f32 %v767_v63, 0.0  ;;  %v87_v63 = vld [vmem:[%s6874_s2 + $0x30] sm:$0xff] }
 0x198   :  { %1826 = vrot.lane.b32.xlu0 %v87_v63, %s4465_s23 }
 0x199   :  { %3945 = vmatprep.mubr.msk.f32.mxu1 %vm494_vm3, %v838_v0 }
 0x19a   :  { %3946 = vmatmul.mubr.msk.f32.gmra.mxu1 %vm494_vm3, %v839_v1 }
 0x19c   :  { %v3886_v4 = vpop.f32.mrf.mxu0 }
 0x19d   :  { %v841_v12 = vmax.f32 %v3886_v4, 0.0 }
 0x19e   :  { %v777_v5 = vpop.f32.mrf.mxu0 }
 0x19f   :  { %v840_v11 = vmax.f32 %v777_v5, 0.0 }
 0x1a1   :  { %3948 = vmatprep.mubr.msk.f32.mxu1 %vm494_vm3, %v840_v11 }
 0x1a2   :  { %3949 = vmatmul.mubr.msk.f32.gmra.mxu1 %vm494_vm3, %v841_v12  ;;  %v92_v12 = vld [vmem:[%s6874_s2 + $0x58] sm:$0xff] }
 0x1a4   :  { %v3889_v13 = vpop.f32.mrf.mxu0 }
 0x1a5   :  { %v843_v16 = vmax.f32 %v3889_v13, 0.0 }
 0x1a6   :  { %v787_v14 = vpop.f32.mrf.mxu0 }
 0x1a7   :  { %v842_v15 = vmax.f32 %v787_v14, 0.0  ;;  %v91_v14 = vld [vmem:[%s6874_s2 + $0x50] sm:$0xff] }
 0x1a9   :  { %3951 = vmatprep.mubr.msk.f32.mxu1 %vm494_vm3, %v842_v15 }
 0x1aa   :  { %3952 = vmatmul.mubr.msk.f32.gmra.mxu1 %vm494_vm3, %v843_v16 }
 0x1ac   :  { %v3892_v24 = vpop.f32.mrf.mxu0 }
 0x1ad   :  { %v845_v27 = vmax.f32 %v3892_v24, 0.0 }
 0x1ae   :  { %v797_v25 = vpop.f32.mrf.mxu0 }
 0x1af   :  { %v844_v26 = vmax.f32 %v797_v25, 0.0 }
 0x1b1   :  { %3954 = vmatprep.mubr.msk.f32.mxu1 %vm494_vm3, %v844_v26 }
 0x1b2   :  { %3955 = vmatmul.mubr.msk.f32.gmra.mxu1 %vm494_vm3, %v845_v27  ;;  %v96_v27 = vld [vmem:[%s6874_s2 + $0x78] sm:$0xff] }
 0x1b4   :  { %v3895_v28 = vpop.f32.mrf.mxu0 }
 0x1b5   :  { %v847_v35 = vmax.f32 %v3895_v28, 0.0 }
 0x1b6   :  { %v807_v33 = vpop.f32.mrf.mxu0 }
 0x1b7   :  { %v846_v34 = vmax.f32 %v807_v33, 0.0  ;;  %v95_v33 = vld [vmem:[%s6874_s2 + $0x70] sm:$0xff] }
 0x1b9   :  { %3957 = vmatprep.mubr.msk.f32.mxu1 %vm494_vm3, %v846_v34 }
 0x1ba   :  { %3958 = vmatmul.mubr.msk.f32.gmra.mxu1 %vm494_vm3, %v847_v35 }
 0x202   :  { %v3914_v45 = vpop.f32.mrf.mxu1 }
 0x203   :  { %v1170_v48 = vmax.f32 %v3914_v45, 0.0  ;;  %v100_v45 = vld [vmem:[%s6874_s2 + $0x98] sm:$0xff] }
 0x204   :  { %v1010_v49 = vpop.f32.mrf.mxu1 }
 0x205   :  { %v1169_v55 = vmax.f32 %v1010_v49, 0.0  ;;  %v1202_v60 = vadd.f32 %v1170_v48, %v4787_v19  ;;  %v89_v19 = vld [vmem:[%s6874_s2 + $0x40] sm:$0xff] }
 0x206   :  { %1830 = vrot.lane.b32.xlu0 %v89_v19, %s4465_s23 }
 0x207   :  { %v1201_v56 = vadd.f32 %v1169_v55, %v4766_v10  ;;  %v90_v10 = vld [vmem:[%s6874_s2 + $0x48] sm:$0xff] }
 0x208   :  { %1832 = vrot.lane.b32.xlu1 %v90_v10, %s4465_s23 }
 0x209   :  { %3976 = vmatprep.mubr.msk.f32.mxu0 %vm494_vm3, %v1201_v56 }
 0x20a   :  { %v3917_v0 = vpop.f32.mrf.mxu1  ;;  %3977 = vmatmul.mubr.msk.f32.vlgmr.msra.gmra.mxu0 %vm494_vm3, %v1202_v60  ;;  %1834 = vrot.lane.b32.xlu0 %v91_v14, %s4465_s23  ;;  %v103_v60 = vld [vmem:[%s6874_s2 + $0xb0] sm:$0xff] }
 0x20b   :  { %v1172_v1 = vmax.f32 %v3917_v0, 0.0 }
 0x20c   :  { %v1020_v4 = vpop.f32.mrf.mxu1  ;;  %1836 = vrot.lane.b32.xlu1 %v92_v12, %s4465_s23 }
 0x20d   :  { %v1171_v5 = vmax.f32 %v1020_v4, 0.0  ;;  %v1204_v13 = vadd.f32 %v1172_v1, %v4810_v32  ;;  %v93_v32 = vld [vmem:[%s6874_s2 + $0x60] sm:$0xff] }
 0x20e   :  { %1838 = vrot.lane.b32.xlu0 %v93_v32, %s4465_s23 }
 0x20f   :  { %v1203_v11 = vadd.f32 %v1171_v5, %v4807_v31  ;;  %v94_v31 = vld [vmem:[%s6874_s2 + $0x68] sm:$0xff] }
 0x210   :  { %1840 = vrot.lane.b32.xlu1 %v94_v31, %s4465_s23 }
 0x211   :  { %3979 = vmatprep.mubr.msk.f32.mxu0 %vm494_vm3, %v1203_v11 }
 0x212   :  { %v3920_v15 = vpop.f32.mrf.mxu1  ;;  %3980 = vmatmul.mubr.msk.f32.gmra.mxu0 %vm494_vm3, %v1204_v13  ;;  %1842 = vrot.lane.b32.xlu0 %v95_v33, %s4465_s23 }
 0x213   :  { %v1174_v16 = vmax.f32 %v3920_v15, 0.0 }
 0x214   :  { %v1030_v24 = vpop.f32.mrf.mxu1  ;;  %1844 = vrot.lane.b32.xlu1 %v96_v27, %s4465_s23 }
 0x215   :  { %v1173_v25 = vmax.f32 %v1030_v24, 0.0  ;;  %v1206_v28 = vadd.f32 %v1174_v16, %v4824_v42  ;;  %v97_v42 = vld [vmem:[%s6874_s2 + $0x80] sm:$0xff] }
 0x216   :  { %1846 = vrot.lane.b32.xlu0 %v97_v42, %s4465_s23 }
 0x217   :  { %v1205_v26 = vadd.f32 %v1173_v25, %v4821_v41  ;;  %v98_v41 = vld [vmem:[%s6874_s2 + $0x88] sm:$0xff] }
 0x218   :  { %1848 = vrot.lane.b32.xlu1 %v98_v41, %s4465_s23 }
 0x219   :  { %3982 = vmatprep.mubr.msk.f32.mxu0 %vm494_vm3, %v1205_v26 }
 0x21a   :  { %v3923_v34 = vpop.f32.mrf.mxu1  ;;  %3983 = vmatmul.mubr.msk.f32.gmra.mxu0 %vm494_vm3, %v1206_v28  ;;  %1850 = vrot.lane.b32.xlu0 %v99_v47, %s4465_s23 }
 0x21b   :  { %v1176_v35 = vmax.f32 %v3923_v34, 0.0  ;;  %v106_v34 = vld [vmem:[%s6874_s2 + $0xc8] sm:$0xff] }
 0x21c   :  { %v1040_v38 = vpop.f32.mrf.mxu1  ;;  %1852 = vrot.lane.b32.xlu1 %v100_v45, %s4465_s23 }
 0x21d   :  { %v1175_v39 = vmax.f32 %v1040_v38, 0.0  ;;  %v1208_v46 = vadd.f32 %v1176_v35, %v4838_v52  ;;  %v101_v52 = vld [vmem:[%s6874_s2 + $0xa0] sm:$0xff]  ;;  %v107_v35 = vld [vmem:[%s6874_s2 + $0xd0] sm:$0xff] }
 0x21e   :  { %1854 = vrot.lane.b32.xlu0 %v101_v52, %s4465_s23 }
 0x21f   :  { %v1207_v40 = vadd.f32 %v1175_v39, %v4835_v51  ;;  %v102_v51 = vld [vmem:[%s6874_s2 + $0xa8] sm:$0xff] }
 0x220   :  { %1856 = vrot.lane.b32.xlu1 %v102_v51, %s4465_s23 }
 0x221   :  { %3985 = vmatprep.mubr.msk.f32.mxu0 %vm494_vm3, %v1207_v40  ;;  %v109_v40 = vld [vmem:[%s6874_s2 + $0xe0] sm:$0xff] }
 0x222   :  { %v3926_v48 = vpop.f32.mrf.mxu1  ;;  %3986 = vmatmul.mubr.msk.f32.gmra.mxu0 %vm494_vm3, %v1208_v46  ;;  %1858 = vrot.lane.b32.xlu0 %v103_v60, %s4465_s23  ;;  %v110_v46 = vld [vmem:[%s6874_s2 + $0xe8] sm:$0xff] }
 0x223   :  { %v1178_v49 = vmax.f32 %v3926_v48, 0.0  ;;  %v111_v48 = vld [vmem:[%s6874_s2 + $0xf0] sm:$0xff] }
 0x224   :  { %v1050_v54 = vpop.f32.mrf.mxu1 }
 0x225   :  { %v1177_v55 = vmax.f32 %v1050_v54, 0.0  ;;  %v1210_v57 = vadd.f32 %v1178_v49, %v4852_v62 }
 0x227   :  { %v1209_v56 = vadd.f32 %v1177_v55, %v4849_v61 }
 0x229   :  { %3988 = vmatprep.mubr.msk.f32.mxu0 %vm494_vm3, %v1209_v56 }
 0x22a   :  { %v3929_v63 = vpop.f32.mrf.mxu1  ;;  %3989 = vmatmul.mubr.msk.f32.gmra.mxu0 %vm494_vm3, %v1210_v57 }
 0x22b   :  { %v1180_v0 = vmax.f32 %v3929_v63, 0.0 }
 0x22c   :  { %v1060_v10 = vpop.f32.mrf.mxu1 }
 0x22d   :  { %v1179_v1 = vmax.f32 %v1060_v10, 0.0  ;;  %v1212_v4 = vadd.f32 %v1180_v0, %v4866_v8 }
 0x22f   :  { %v1211_v61 = vadd.f32 %v1179_v1, %v4863_v7 }
 0x231   :  { %3991 = vmatprep.mubr.msk.f32.mxu0 %vm494_vm3, %v1211_v61 }
 0x232   :  { %v3932_v62 = vpop.f32.mrf.mxu1  ;;  %3992 = vmatmul.mubr.msk.f32.gmra.mxu0 %vm494_vm3, %v1212_v4 }
 0x233   :  { %v1182_v19 = vmax.f32 %v3932_v62, 0.0 }
 0x234   :  { %v1070_v5 = vpop.f32.mrf.mxu1 }
 0x235   :  { %v1181_v11 = vmax.f32 %v1070_v5, 0.0  ;;  %v1214_v13 = vadd.f32 %v1182_v19, %v4880_v20 }
 0x237   :  { %v1213_v12 = vadd.f32 %v1181_v11, %v4877_v18 }
 0x239   :  { %3994 = vmatprep.mubr.msk.f32.mxu0 %vm494_vm3, %v1213_v12 }
 0x23a   :  { %v3935_v14 = vpop.f32.mrf.mxu1  ;;  %3995 = vmatmul.mubr.msk.f32.gmra.mxu0 %vm494_vm3, %v1214_v13 }
 0x23b   :  { %v1184_v7 = vmax.f32 %v3935_v14, 0.0 }
 0x23c   :  { %v1080_v15 = vpop.f32.mrf.mxu1 }
 0x23d   :  { %v1183_v8 = vmax.f32 %v1080_v15, 0.0  ;;  %v1216_v16 = vadd.f32 %v1184_v7, %v4894_v30 }
 0x23f   :  { %v1215_v31 = vadd.f32 %v1183_v8, %v4891_v29  ;;  %v104_v29 = vld [vmem:[%s6874_s2 + $0xb8] sm:$0xff] }
 0x240   :  { %1860 = vrot.lane.b32.xlu1 %v104_v29, %s4465_s23 }
 0x241   :  { %3997 = vmatprep.mubr.msk.f32.mxu0 %vm494_vm3, %v1215_v31 }
 0x242   :  { %v3938_v24 = vpop.f32.mrf.mxu1  ;;  %3998 = vmatmul.mubr.msk.f32.gmra.mxu0 %vm494_vm3, %v1216_v16 }
 0x243   :  { %v1186_v18 = vmax.f32 %v3938_v24, 0.0 }
 0x244   :  { %v1090_v32 = vpop.f32.mrf.mxu1  ;;  %1864 = vrot.lane.b32.xlu1 %v106_v34, %s4465_s23 }
 0x245   :  { %v1185_v20 = vmax.f32 %v1090_v32, 0.0  ;;  %v1218_v26 = vadd.f32 %v1186_v18, %v4908_v44 }
 0x247   :  { %v1217_v25 = vadd.f32 %v1185_v20, %v4905_v43  ;;  %v105_v43 = vld [vmem:[%s6874_s2 + $0xc0] sm:$0xff] }
 0x248   :  { %1862 = vrot.lane.b32.xlu0 %v105_v43, %s4465_s23 }
 0x249   :  { %4000 = vmatprep.mubr.msk.f32.mxu0 %vm494_vm3, %v1217_v25 }
 0x24a   :  { %v3941_v27 = vpop.f32.mrf.mxu1  ;;  %4001 = vmatmul.mubr.msk.f32.gmra.mxu0 %vm494_vm3, %v1218_v26 }
 0x24b   :  { %v1188_v30 = vmax.f32 %v3941_v27, 0.0 }
 0x24c   :  { %v1100_v28 = vpop.f32.mrf.mxu1  ;;  %1866 = vrot.lane.b32.xlu0 %v107_v35, %s4465_s23 }
 0x24d   :  { %v1187_v33 = vmax.f32 %v1100_v28, 0.0  ;;  %v1220_v41 = vadd.f32 %v1188_v30, %v4931_v59 }
 0x24f   :  { %v1219_v44 = vadd.f32 %v1187_v33, %v4928_v58  ;;  %v108_v58 = vld [vmem:[%s6874_s2 + $0xd8] sm:$0xff] }
 0x250   :  { %1868 = vrot.lane.b32.xlu1 %v108_v58, %s4465_s23  ;;  %1870 = vrot.lane.b32.xlu0 %v109_v40, %s4465_s23 }
 0x251   :  { %4003 = vmatprep.mubr.msk.f32.mxu0 %vm494_vm3, %v1219_v44 }
 0x252   :  { %v3944_v38 = vpop.f32.mrf.mxu1  ;;  %4004 = vmatmul.mubr.msk.f32.gmra.mxu0 %vm494_vm3, %v1220_v41 }
 0x253   :  { %v1190_v42 = vmax.f32 %v3944_v38, 0.0 }
 0x254   :  { %v1110_v39 = vpop.f32.mrf.mxu1  ;;  %1872 = vrot.lane.b32.xlu1 %v110_v46, %s4465_s23  ;;  %1874 = vrot.lane.b32.xlu0 %v111_v48, %s4465_s23 }
 0x255   :  { %v1189_v59 = vmax.f32 %v1110_v39, 0.0  ;;  %v1222_v47 = vadd.f32 %v1190_v42, %v4945_v9 }
 0x257   :  { %v1221_v45 = vadd.f32 %v1189_v59, %v4942_v6 }
 0x259   :  { %4006 = vmatprep.mubr.msk.f32.mxu0 %vm494_vm3, %v1221_v45 }
 0x25a   :  { %v3947_v51 = vpop.f32.mrf.mxu1  ;;  %4007 = vmatmul.mubr.msk.f32.gmra.mxu0 %vm494_vm3, %v1222_v47 }
 0x25b   :  { %v1192_v6 = vmax.f32 %v3947_v51, 0.0 }
 0x25c   :  { %v1120_v49 = vpop.f32.mrf.mxu1 }
 0x25d   :  { %v1191_v54 = vmax.f32 %v1120_v49, 0.0  ;;  %v1224_v9 = vadd.f32 %v1192_v6, %v4959_v23 }
 0x25f   :  { %v1223_v52 = vadd.f32 %v1191_v54, %v4956_v22 }
 0x261   :  { %4009 = vmatprep.mubr.msk.f32.mxu0 %vm494_vm3, %v1223_v52 }
 0x262   :  { %v3950_v55 = vpop.f32.mrf.mxu1  ;;  %4010 = vmatmul.mubr.msk.f32.gmra.mxu0 %vm494_vm3, %v1224_v9  ;;  %v5334_v9 = vpop.permute.xlu0 %1814 }
 0x263   :  { %v1194_v56 = vmax.f32 %v3950_v55, 0.0 }
 0x264   :  { %v1130_v57 = vpop.f32.mrf.mxu1 }
 0x265   :  { %v1193_v60 = vmax.f32 %v1130_v57, 0.0  ;;  %v1226_v0 = vadd.f32 %v1194_v56, %v4973_v37 }
 0x267   :  { %v1225_v63 = vadd.f32 %v1193_v60, %v4970_v36  ;;  %v5342_v60 = vpop.permute.xlu0 %1818 }
 0x269   :  { %4012 = vmatprep.mubr.msk.f32.mxu0 %vm494_vm3, %v1225_v63 }
 0x26a   :  { %v3953_v10 = vpop.f32.mrf.mxu1  ;;  %4013 = vmatmul.mubr.msk.f32.gmra.mxu0 %vm494_vm3, %v1226_v0  ;;  %v5344_v0 = vpop.permute.xlu1 %1816 }
 0x26b   :  { %v1196_v22 = vmax.f32 %v3953_v10, 0.0 }
 0x26c   :  { %v1140_v1 = vpop.f32.mrf.mxu1 }
 0x26d   :  { %v1195_v23 = vmax.f32 %v1140_v1, 0.0  ;;  %v1228_v4 = vadd.f32 %v1196_v22, %v4987_v53  ;;  %v5350_v1 = vpop.permute.xlu0 %1822 }
 0x26f   :  { %v1227_v61 = vadd.f32 %v1195_v23, %v4984_v50  ;;  %v5352_v23 = vpop.permute.xlu1 %1820 }
 0x271   :  { %4015 = vmatprep.mubr.msk.f32.mxu0 %vm494_vm3, %v1227_v61 }
 0x272   :  { %v3956_v62 = vpop.f32.mrf.mxu1  ;;  %4016 = vmatmul.mubr.msk.f32.gmra.mxu0 %vm494_vm3, %v1228_v4 }
 0x273   :  { %v1198_v36 = vmax.f32 %v3956_v62, 0.0 }
 0x274   :  { %v1150_v19 = vpop.f32.mrf.mxu1 }
 0x275   :  { %v1197_v37 = vmax.f32 %v1150_v19, 0.0  ;;  %v1230_v11 = vadd.f32 %v1198_v36, %v5001_v3  ;;  %v5360_v36 = vpop.permute.xlu0 %1826 }
 0x277   :  { %v1229_v5 = vadd.f32 %v1197_v37, %v4998_v2  ;;  %v5268_v2 = vld [vmem:[%s6873_s3 + $0xc8] ss:$0 sm:$0xff]  ;;  %v5362_v37 = vpop.permute.xlu1 %1824 }
 0x279   :  { %4018 = vmatprep.mubr.msk.f32.mxu0 %vm494_vm3, %v1229_v5 }
 0x27a   :  { %v3959_v12 = vpop.f32.mrf.mxu1  ;;  %4019 = vmatmul.mubr.msk.f32.gmra.mxu0 %vm494_vm3, %v1230_v11 }
 0x27b   :  { %v1200_v50 = vmax.f32 %v3959_v12, 0.0  ;;  %v5368_v12 = vpop.permute.xlu0 %1830 }
 0x27c   :  { %v1160_v13 = vpop.f32.mrf.mxu1 }
 0x27d   :  { %v1199_v53 = vmax.f32 %v1160_v13, 0.0  ;;  %v1232_v7 = vadd.f32 %v1200_v50, %v5015_v21  ;;  %v5370_v50 = vpop.permute.xlu1 %1828 }
 0x27f   :  { %v1231_v14 = vadd.f32 %v1199_v53, %v5012_v17 }
 0x281   :  { %4021 = vmatprep.mubr.msk.f32.mxu0 %vm494_vm3, %v1231_v14 }
 0x282   :  { %4022 = vmatmul.mubr.msk.f32.gmra.mxu0 %vm494_vm3, %v1232_v7 }
 0x2ca   :  { %v3978_v3 = vpop.f32.mrf.mxu0 }
 0x2cb   :  { %v5271_v15 = vadd.f32 %v3978_v3, %v5268_v2  ;;  %v5378_v3 = vpop.permute.xlu0 %1834 }
 0x2cc   :  { %v1399_v8 = vpop.f32.mrf.mxu0 }
 0x2cd   :  { %4079 = vtanh.f32 %v5271_v15  ;;  %v5275_v17 = vadd.f32 %v5268_v2, %v1399_v8  ;;  %v5380_v8 = vpop.permute.xlu1 %1832 }
 0x2cf   :  { %4081 = vtanh.f32 %v5275_v17 }
 0x2d2   :  { %v3981_v21 = vpop.f32.mrf.mxu0 }
 0x2d3   :  { %v5279_v31 = vadd.f32 %v3981_v21, %v5268_v2 }
 0x2d4   :  { %v1409_v16 = vpop.f32.mrf.mxu0 }
 0x2d5   :  { %4083 = vtanh.f32 %v5279_v31  ;;  %v5283_v24 = vadd.f32 %v5268_v2, %v1409_v16 }
 0x2d7   :  { %4085 = vtanh.f32 %v5283_v24 }
 0x2da   :  { %v4080_v18 = vpop.eup %4079  ;;  %v3984_v32 = vpop.f32.mrf.mxu0 }
 0x2db   :  { %v5287_v20 = vadd.f32 %v3984_v32, %v5268_v2  ;;  %1976 = vrot.lane.b32.xlu1 %v4080_v18, %s4466_s6  ;;  %v5386_v18 = vpop.permute.xlu0 %1838  ;;  %v5388_v32 = vpop.permute.xlu1 %1836 }
 0x2dc   :  { %v1419_v25 = vpop.f32.mrf.mxu0  ;;  %v4082_v26 = vpop.eup %4081 }
 0x2dd   :  { %4087 = vtanh.f32 %v5287_v20  ;;  %1974 = vrot.lane.b32.xlu0 %v4082_v26, %s4466_s6  ;;  %v5293_v27 = vadd.f32 %v5268_v2, %v1419_v25 }
 0x2df   :  { %4089 = vtanh.f32 %v5293_v27 }
 0x2e2   :  { %v4084_v29 = vpop.eup %4083  ;;  %v3987_v30 = vpop.f32.mrf.mxu0 }
 0x2e3   :  { %v5297_v28 = vadd.f32 %v3987_v30, %v5268_v2  ;;  %1980 = vrot.lane.b32.xlu1 %v4084_v29, %s4466_s6 }
 0x2e4   :  { %v1429_v33 = vpop.f32.mrf.mxu0  ;;  %v4086_v43 = vpop.eup %4085 }
 0x2e5   :  { %4091 = vtanh.f32 %v5297_v28  ;;  %1978 = vrot.lane.b32.xlu0 %v4086_v43, %s4466_s6  ;;  %v5303_v44 = vadd.f32 %v5268_v2, %v1429_v33  ;;  %v5396_v33 = vpop.permute.xlu0 %1842  ;;  %v5399_v43 = vpop.permute.xlu1 %1840 }
 0x2e7   :  { %4093 = vtanh.f32 %v5303_v44 }
 0x2ea   :  { %v4088_v34 = vpop.eup %4087  ;;  %v3990_v41 = vpop.f32.mrf.mxu0 }
 0x2eb   :  { %v5307_v35 = vadd.f32 %v3990_v41, %v5268_v2  ;;  %1984 = vrot.lane.b32.xlu1 %v4088_v34, %s4466_s6 }
 0x2ec   :  { %v1439_v38 = vpop.f32.mrf.mxu0  ;;  %v4090_v42 = vpop.eup %4089 }
 0x2ed   :  { %4095 = vtanh.f32 %v5307_v35  ;;  %v5312_v58 = vadd.f32 %v5268_v2, %v1439_v38  ;;  %1982 = vrot.lane.b32.xlu0 %v4090_v42, %s4466_s6  ;;  %v5404_v38 = vpop.permute.xlu0 %1846  ;;  %v5407_v42 = vpop.permute.xlu1 %1844 }
 0x2ef   :  { %4097 = vtanh.f32 %v5312_v58 }
 0x2f2   :  { %v4092_v39 = vpop.eup %4091  ;;  %v3993_v59 = vpop.f32.mrf.mxu0 }
 0x2f3   :  { %v5317_v40 = vadd.f32 %v3993_v59, %v5268_v2  ;;  %1988 = vrot.lane.b32.xlu1 %v4092_v39, %s4466_s6 }
 0x2f4   :  { %v1449_v45 = vpop.f32.mrf.mxu0  ;;  %v4094_v47 = vpop.eup %4093 }
 0x2f5   :  { %4099 = vtanh.f32 %v5317_v40  ;;  %v5322_v46 = vadd.f32 %v5268_v2, %v1449_v45  ;;  %1986 = vrot.lane.b32.xlu0 %v4094_v47, %s4466_s6 }
 0x2f7   :  { %4101 = vtanh.f32 %v5322_v46 }
 0x2fa   :  { %v4096_v48 = vpop.eup %4095  ;;  %v3996_v51 = vpop.f32.mrf.mxu0 }
 0x2fb   :  { %v5327_v6 = vadd.f32 %v3996_v51, %v5268_v2  ;;  %1992 = vrot.lane.b32.xlu1 %v4096_v48, %s4466_s6  ;;  %v5415_v48 = vpop.permute.xlu1 %1848  ;;  %v3616_v51 = vmul.f32 -1.442695, %v5271_v15 }
 0x2fc   :  { %v1459_v49 = vpop.f32.mrf.mxu0  ;;  %v4098_v52 = vpop.eup %4097 }
 0x2fd   :  { %4103 = vtanh.f32 %v5327_v6  ;;  %v5332_v54 = vadd.f32 %v5268_v2, %v1459_v49  ;;  %1990 = vrot.lane.b32.xlu0 %v4098_v52, %s4466_s6  ;;  %v5418_v49 = vpop.permute.xlu0 %1850 }
 0x2ff   :  { %4105 = vtanh.f32 %v5332_v54 }
 0x302   :  { %v4100_v55 = vpop.eup %4099  ;;  %v3999_v56 = vpop.f32.mrf.mxu0 }
 0x303   :  { %v5339_v57 = vadd.f32 %v3999_v56, %v5268_v2  ;;  %1996 = vrot.lane.b32.xlu1 %v4100_v55, %s4466_s6  ;;  %v3615_v56 = vmul.f32 -1.442695, %v5275_v17  ;;  %v3618_v17 = vmul.f32 -1.442695, %v5279_v31 }
 0x304   :  { %v1469_v63 = vpop.f32.mrf.mxu0  ;;  %v4102_v22 = vpop.eup %4101 }
 0x305   :  { %4107 = vtanh.f32 %v5339_v57  ;;  %v5348_v10 = vadd.f32 %v5268_v2, %v1469_v63  ;;  %1994 = vrot.lane.b32.xlu0 %v4102_v22, %s4466_s6  ;;  %v5425_v63 = vpop.permute.xlu1 %1852 }
 0x307   :  { %4109 = vtanh.f32 %v5348_v10 }
 0x30a   :  { %v4104_v61 = vpop.eup %4103  ;;  %v4002_v4 = vpop.f32.mrf.mxu0 }
 0x30b   :  { %v5357_v62 = vadd.f32 %v4002_v4, %v5268_v2  ;;  %2000 = vrot.lane.b32.xlu1 %v4104_v61, %s4466_s6 }
 0x30c   :  { %v1479_v19 = vpop.f32.mrf.mxu0  ;;  %v4106_v11 = vpop.eup %4105 }
 0x30d   :  { %4111 = vtanh.f32 %v5357_v62  ;;  %v5366_v5 = vadd.f32 %v5268_v2, %v1479_v19  ;;  %1998 = vrot.lane.b32.xlu0 %v4106_v11, %s4466_s6  ;;  %v5432_v19 = vpop.permute.xlu0 %1854 }
 0x30f   :  { %4113 = vtanh.f32 %v5366_v5 }
 0x312   :  { %v4108_v13 = vpop.eup %4107  ;;  %v4005_v53 = vpop.f32.mrf.mxu0 }
 0x313   :  { %v5375_v14 = vadd.f32 %v4005_v53, %v5268_v2  ;;  %2004 = vrot.lane.b32.xlu1 %v4108_v13, %s4466_s6  ;;  %v5439_v13 = vpop.permute.xlu1 %1856 }
 0x314   :  { %v1489_v7 = vpop.f32.mrf.mxu0  ;;  %v4110_v16 = vpop.eup %4109 }
 0x315   :  { %4115 = vtanh.f32 %v5375_v14  ;;  %v5384_v21 = vadd.f32 %v5268_v2, %v1489_v7  ;;  %2002 = vrot.lane.b32.xlu0 %v4110_v16, %s4466_s6  ;;  %v3617_v7 = vmul.f32 -1.442695, %v5283_v24 }
 0x317   :  { %4117 = vtanh.f32 %v5384_v21 }
 0x31a   :  { %v4112_v25 = vpop.eup %4111  ;;  %v4008_v26 = vpop.f32.mrf.mxu0 }
 0x31b   :  { %v5393_v29 = vadd.f32 %v4008_v26, %v5268_v2  ;;  %2008 = vrot.lane.b32.xlu1 %v4112_v25, %s4466_s6  ;;  %v5443_v26 = vpop.permute.xlu0 %1858 }
 0x31c   :  { %v1499_v30 = vpop.f32.mrf.mxu0  ;;  %v4114_v41 = vpop.eup %4113 }
 0x31d   :  { %4119 = vtanh.f32 %v5393_v29  ;;  %v5402_v34 = vadd.f32 %v5268_v2, %v1499_v30  ;;  %2006 = vrot.lane.b32.xlu0 %v4114_v41, %s4466_s6  ;;  %v5451_v41 = vpop.permute.xlu1 %1860 }
 0x31f   :  { %4121 = vtanh.f32 %v5402_v34 }
 0x322   :  { %v4116_v39 = vpop.eup %4115  ;;  %v4011_v59 = vpop.f32.mrf.mxu0 }
 0x323   :  { %v5411_v45 = vadd.f32 %v4011_v59, %v5268_v2  ;;  %2012 = vrot.lane.b32.xlu1 %v4116_v39, %s4466_s6 }
 0x324   :  { %v1509_v47 = vpop.f32.mrf.mxu0  ;;  %v4118_v55 = vpop.eup %4117 }
 0x325   :  { %4123 = vtanh.f32 %v5411_v45  ;;  %v5421_v52 = vadd.f32 %v5268_v2, %v1509_v47  ;;  %2010 = vrot.lane.b32.xlu0 %v4118_v55, %s4466_s6  ;;  %v3620_v47 = vmul.f32 -1.442695, %v5287_v20 }
 0x326   :  { %4125 = vpow2.f32 %v3616_v51  ;;  %v5457_v51 = vpop.permute.xlu0 %1862 }
 0x327   :  { %4127 = vtanh.f32 %v5421_v52  ;;  %6937 = vst [vmem:[#allocation2_spill] sm:$0xff] %v5457_v51 }
 0x328   :  { %4129 = vpow2.f32 %v3615_v56 }
 0x32a   :  { %v4120_v22 = vpop.eup %4119  ;;  %v4014_v61 = vpop.f32.mrf.mxu0 }
 0x32b   :  { %v5429_v4 = vadd.f32 %v4014_v61, %v5268_v2  ;;  %2016 = vrot.lane.b32.xlu1 %v4120_v22, %s4466_s6 }
 0x32c   :  { %v1519_v15 = vpop.f32.mrf.mxu0  ;;  %v4122_v53 = vpop.eup %4121 }
 0x32d   :  { %4131 = vtanh.f32 %v5429_v4  ;;  %v5437_v11 = vadd.f32 %v5268_v2, %v1519_v15  ;;  %2014 = vrot.lane.b32.xlu0 %v4122_v53, %s4466_s6  ;;  %v5465_v15 = vpop.permute.xlu1 %1864 }
 0x32e   :  { %4133 = vpow2.f32 %v3618_v17 }
 0x32f   :  { %4135 = vtanh.f32 %v5437_v11 }
 0x330   :  { %4137 = vpow2.f32 %v3617_v7  ;;  %v3619_v7 = vmul.f32 -1.442695, %v5293_v27 }
 0x332   :  { %v4124_v16 = vpop.eup %4123  ;;  %v4017_v25 = vpop.f32.mrf.mxu0 }
 0x333   :  { %v5447_v30 = vadd.f32 %v4017_v25, %v5268_v2  ;;  %2020 = vrot.lane.b32.xlu1 %v4124_v16, %s4466_s6  ;;  %v4126_v24 = vpop.eup %4125  ;;  %v5469_v16 = vpop.permute.xlu0 %1866 }
 0x334   :  { %v1529_v31 = vpop.f32.mrf.mxu0  ;;  %v4128_v59 = vpop.eup %4127  ;;  %v1655_v17 = vadd.f32 1.0, %v4126_v24  ;;  %6938 = vst [vmem:[#allocation3_spill] sm:$0xff] %v5469_v16 }
 0x335   :  { %4139 = vtanh.f32 %v5447_v30  ;;  %v5454_v39 = vadd.f32 %v5268_v2, %v1529_v31  ;;  %v4130_v55 = vpop.eup %4129  ;;  %2018 = vrot.lane.b32.xlu0 %v4128_v59, %s4466_s6  ;;  %v5476_v24 = vpop.permute.xlu1 %1868 }
 0x336   :  { %v1654_v20 = vadd.f32 1.0, %v4130_v55  ;;  %6939 = vst [vmem:[#allocation4_spill] sm:$0xff] %v5476_v24 }
 0x337   :  { %4141 = vtanh.f32 %v5454_v39 }
 0x338   :  { %4143 = vpow2.f32 %v3620_v47 }
 0x339   :  { %v5490_v16 = vpop.permute.xlu1 %1872 }
 0x33a   :  { %v4132_v56 = vpop.eup %4131  ;;  %v4020_v22 = vpop.f32.mrf.mxu0  ;;  %6941 = vst [vmem:[#allocation6_spill] sm:$0xff] %v5490_v16 }
 0x33b   :  { %v5462_v61 = vadd.f32 %v4020_v22, %v5268_v2  ;;  %2024 = vrot.lane.b32.xlu1 %v4132_v56, %s4466_s6  ;;  %v4134_v25 = vpop.eup %4133  ;;  %v3622_v56 = vmul.f32 -1.442695, %v5297_v28  ;;  %v5483_v28 = vpop.permute.xlu0 %1870 }
 0x33c   :  { %v1539_v53 = vpop.f32.mrf.mxu0  ;;  %v4136_v59 = vpop.eup %4135  ;;  %6940 = vst [vmem:[#allocation5_spill] sm:$0xff] %v5483_v28 }
 0x33d   :  { %4145 = vtanh.f32 %v5462_v61  ;;  %v5472_v31 = vadd.f32 %v5268_v2, %v1539_v53  ;;  %v4138_v22 = vpop.eup %4137  ;;  %2022 = vrot.lane.b32.xlu0 %v4136_v59, %s4466_s6  ;;  %v1657_v53 = vadd.f32 1.0, %v4134_v25  ;;  %v3621_v59 = vmul.f32 -1.442695, %v5303_v44 }
 0x33e   :  { %4147 = vrcp.f32 %v1655_v17 }
 0x33f   :  { %4149 = vrcp.f32 %v1654_v20  ;;  %v1656_v20 = vadd.f32 1.0, %v4138_v22 }
 0x340   :  { %4151 = vpow2.f32 %v3619_v7 }
 0x341   :  { %4153 = vtanh.f32 %v5472_v31 }
 0x342   :  { %v4140_v47 = vpop.eup %4139  ;;  %v4023_v55 = vpop.f32.mrf.mxu0  ;;  %4155 = vpow2.f32 %v3622_v56 }
 0x343   :  { %v5480_v27 = vadd.f32 %v4023_v55, %v5268_v2  ;;  %2028 = vrot.lane.b32.xlu1 %v4140_v47, %s4466_s6  ;;  %v3624_v55 = vmul.f32 -1.442695, %v5307_v35  ;;  %v5494_v56 = vpop.permute.xlu0 %1874  ;;  %v3623_v35 = vmul.f32 -1.442695, %v5312_v58 }
 0x344   :  { %v1549_v17 = vpop.f32.mrf.mxu0  ;;  %v4142_v24 = vpop.eup %4141  ;;  %6942 = vst [vmem:[#allocation7_spill] sm:$0xff] %v5494_v56 }
 0x345   :  { %4157 = vtanh.f32 %v5480_v27  ;;  %v5488_v7 = vadd.f32 %v5268_v2, %v1549_v17  ;;  %v4144_v47 = vpop.eup %4143  ;;  %2026 = vrot.lane.b32.xlu0 %v4142_v24, %s4466_s6 }
 0x346   :  { %4159 = vrcp.f32 %v1657_v53  ;;  %v1659_v2 = vadd.f32 1.0, %v4144_v47 }
 0x347   :  { %4161 = vrcp.f32 %v1656_v20 }
 0x348   :  { %4163 = vpow2.f32 %v3621_v59  ;;  %v3626_v59 = vmul.f32 -1.442695, %v5317_v40  ;;  %v112_v40 = vld [vmem:[%s6874_s2 + $0xf8] sm:$0xff] }
 0x349   :  { %4165 = vtanh.f32 %v5488_v7 }
 0x34a   :  { %v4146_v25 = vpop.eup %4145  ;;  %4167 = vpow2.f32 %v3624_v55 }
 0x34b   :  { %2032 = vrot.lane.b32.xlu1 %v4146_v25, %s4466_s6  ;;  %v5498_v44 = vpop.eup %4147  ;;  %4169 = vrcp.f32 %v1659_v2 }
 0x34c   :  { %v5500_v53 = vpop.eup %4149  ;;  %4171 = vpow2.f32 %v3623_v35 }
 0x34d   :  { %v1977_v22 = vpop.permute.xlu1 %1976  ;;  %v4152_v24 = vpop.eup %4151  ;;  %4173 = vpow2.f32 %v3626_v59 }
 0x34e   :  { %v2071_v17 = vmul.f32 %v5498_v44, %v1977_v22  ;;  %v4154_v20 = vpop.eup %4153  ;;  %v1658_v47 = vadd.f32 1.0, %v4152_v24  ;;  %v3625_v22 = vmul.f32 -1.442695, %v5322_v46  ;;  %v3628_v24 = vmul.f32 -1.442695, %v5327_v6 }
 0x34f   :  { %v1975_v56 = vpop.permute.xlu0 %1974  ;;  %v4156_v25 = vpop.eup %4155  ;;  %2030 = vrot.lane.b32.xlu0 %v4154_v20, %s4466_s6 }
 0x350   :  { %2136 = vrot.lane.b32.xlu1 %v2071_v17, %s4465_s23  ;;  %v2070_v28 = vmul.f32 %v5500_v53, %v1975_v56  ;;  %v1661_v16 = vadd.f32 1.0, %v4156_v25  ;;  %4175 = vrcp.f32 %v1658_v47 }
 0x352   :  { %v4158_v55 = vpop.eup %4157  ;;  %4177 = vrcp.f32 %v1661_v16  ;;  %v3627_v16 = vmul.f32 -1.442695, %v5332_v54 }
 0x353   :  { %v5509_v58 = vpop.eup %4159  ;;  %2036 = vrot.lane.b32.xlu0 %v4158_v55, %s4466_s6  ;;  %4179 = vpow2.f32 %v3625_v22  ;;  %v3630_v22 = vmul.f32 -1.442695, %v5339_v57 }
 0x354   :  { %2134 = vrot.lane.b32.xlu1 %v2070_v28, %s4465_s23  ;;  %6943 = vst [vmem:[#allocation8_spill] sm:$0xff] %v5509_v58  ;;  %v5515_v2 = vpop.eup %4161  ;;  %4181 = vpow2.f32 %v3628_v24 }
 0x355   :  { %v4164_v35 = vpop.eup %4163  ;;  %v1981_v17 = vpop.permute.xlu1 %1980 }
 0x356   :  { %v4166_v56 = vpop.eup %4165  ;;  %v1660_v25 = vadd.f32 1.0, %v4164_v35  ;;  %v2073_v55 = vmul.f32 %v5509_v58, %v1981_v17 }
 0x357   :  { %v1979_v28 = vpop.permute.xlu0 %1978  ;;  %v4168_v20 = vpop.eup %4167  ;;  %2034 = vrot.lane.b32.xlu0 %v4166_v56, %s4466_s6 }
 0x358   :  { %1876 = vrot.lane.b32.xlu1 %v112_v40, %s4465_s23  ;;  %v2072_v59 = vmul.f32 %v5515_v2, %v1979_v28  ;;  %v1663_v47 = vadd.f32 1.0, %v4168_v20  ;;  %v5524_v46 = vpop.eup %4169  ;;  %4183 = vrcp.f32 %v1660_v25 }
 0x359   :  { %v4172_v28 = vpop.eup %4171 }
 0x35a   :  { %4185 = vrcp.f32 %v1663_v47  ;;  %v4174_v35 = vpop.eup %4173  ;;  %v1662_v17 = vadd.f32 1.0, %v4172_v28 }
 0x35b   :  { %2138 = vrot.lane.b32.xlu0 %v2072_v59, %s4465_s23  ;;  %4187 = vpow2.f32 %v3627_v16  ;;  %v1665_v20 = vadd.f32 1.0, %v4174_v35 }
 0x35c   :  { %2140 = vrot.lane.b32.xlu1 %v2073_v55, %s4465_s23  ;;  %4189 = vpow2.f32 %v3630_v22  ;;  %v3629_v55 = vmul.f32 -1.442695, %v5348_v10 }
 0x35d   :  { %v1985_v6 = vpop.permute.xlu1 %1984  ;;  %v5531_v56 = vpop.eup %4175  ;;  %4191 = vrcp.f32 %v1662_v17 }
 0x35e   :  { %v2075_v40 = vmul.f32 %v5524_v46, %v1985_v6  ;;  %4193 = vrcp.f32 %v1665_v20  ;;  %v3632_v6 = vmul.f32 -1.442695, %v5357_v62  ;;  %v3631_v20 = vmul.f32 -1.442695, %v5366_v5 }
 0x35f   :  { %v1983_v24 = vpop.permute.xlu0 %1982  ;;  %v5534_v25 = vpop.eup %4177  ;;  %4195 = vpow2.f32 %v3629_v55 }
 0x360   :  { %2144 = vrot.lane.b32.xlu1 %v2075_v40, %s4465_s23  ;;  %v2074_v59 = vmul.f32 %v5531_v56, %v1983_v24  ;;  %v4180_v47 = vpop.eup %4179  ;;  %4197 = vpow2.f32 %v3632_v6 }
 0x361   :  { %v4182_v16 = vpop.eup %4181  ;;  %v1664_v40 = vadd.f32 1.0, %v4180_v47 }
 0x362   :  { %2142 = vrot.lane.b32.xlu0 %v2074_v59, %s4465_s23  ;;  %v1667_v35 = vadd.f32 1.0, %v4182_v16 }
 0x363   :  { %4199 = vrcp.f32 %v1664_v40 }
 0x364   :  { %4201 = vrcp.f32 %v1667_v35  ;;  %v3633_v35 = vmul.f32 -1.442695, %v5384_v21 }
 0x365   :  { %v1989_v54 = vpop.permute.xlu1 %1988  ;;  %v5541_v28 = vpop.eup %4183  ;;  %4203 = vpow2.f32 %v3631_v20 }
 0x366   :  { %v2077_v57 = vmul.f32 %v5534_v25, %v1989_v54  ;;  %v3634_v54 = vmul.f32 -1.442695, %v5375_v14 }
 0x367   :  { %v1987_v22 = vpop.permute.xlu0 %1986  ;;  %v5544_v17 = vpop.eup %4185 }
 0x368   :  { %2148 = vrot.lane.b32.xlu1 %v2077_v57, %s4465_s23  ;;  %v2076_v10 = vmul.f32 %v5541_v28, %v1987_v22  ;;  %v4188_v59 = vpop.eup %4187  ;;  %4205 = vpow2.f32 %v3634_v54 }
 0x369   :  { %v4190_v55 = vpop.eup %4189  ;;  %v1666_v57 = vadd.f32 1.0, %v4188_v59 }
 0x36a   :  { %2146 = vrot.lane.b32.xlu0 %v2076_v10, %s4465_s23  ;;  %v5551_v47 = vpop.eup %4191  ;;  %v1669_v16 = vadd.f32 1.0, %v4190_v55 }
 0x36b   :  { %v5554_v40 = vpop.eup %4193  ;;  %4207 = vrcp.f32 %v1666_v57 }
 0x36c   :  { %v4196_v10 = vpop.eup %4195  ;;  %4209 = vrcp.f32 %v1669_v16  ;;  %v3635_v16 = vmul.f32 -1.442695, %v5402_v34 }
 0x36d   :  { %v1993_v24 = vpop.permute.xlu1 %1992  ;;  %v4198_v20 = vpop.eup %4197  ;;  %4211 = vpow2.f32 %v3633_v35 }
 0x36e   :  { %v2079_v62 = vmul.f32 %v5544_v17, %v1993_v24  ;;  %v3636_v24 = vmul.f32 -1.442695, %v5393_v29  ;;  %v1671_v55 = vadd.f32 1.0, %v4198_v20 }
 0x36f   :  { %v1991_v6 = vpop.permute.xlu0 %1990 }
 0x370   :  { %2152 = vrot.lane.b32.xlu1 %v2079_v62, %s4465_s23  ;;  %v2078_v5 = vmul.f32 %v5551_v47, %v1991_v6  ;;  %v1668_v62 = vadd.f32 1.0, %v4196_v10  ;;  %v5561_v59 = vpop.eup %4199  ;;  %4213 = vpow2.f32 %v3636_v24 }
 0x371   :  { %v5564_v57 = vpop.eup %4201 }
 0x372   :  { %2150 = vrot.lane.b32.xlu0 %v2078_v5, %s4465_s23  ;;  %4215 = vrcp.f32 %v1668_v62  ;;  %v4204_v5 = vpop.eup %4203 }
 0x373   :  { %4217 = vrcp.f32 %v1671_v55  ;;  %v3637_v55 = vmul.f32 -1.442695, %v5421_v52 }
 0x374   :  { %4219 = vpow2.f32 %v3635_v16 }
 0x375   :  { %v1997_v22 = vpop.permute.xlu1 %1996  ;;  %v4206_v35 = vpop.eup %4205 }
 0x376   :  { %v2081_v14 = vmul.f32 %v5554_v40, %v1997_v22  ;;  %v3638_v22 = vmul.f32 -1.442695, %v5411_v45  ;;  %v1673_v20 = vadd.f32 1.0, %v4206_v35 }
 0x377   :  { %v1995_v54 = vpop.permute.xlu0 %1994 }
 0x378   :  { %2156 = vrot.lane.b32.xlu1 %v2081_v14, %s4465_s23  ;;  %v2080_v21 = vmul.f32 %v5561_v59, %v1995_v54  ;;  %v1670_v14 = vadd.f32 1.0, %v4204_v5  ;;  %v5571_v10 = vpop.eup %4207  ;;  %4221 = vpow2.f32 %v3638_v22 }
 0x379   :  { %v5574_v62 = vpop.eup %4209 }
 0x37a   :  { %2154 = vrot.lane.b32.xlu0 %v2080_v21, %s4465_s23  ;;  %4223 = vrcp.f32 %v1670_v14  ;;  %v4212_v21 = vpop.eup %4211 }
 0x37b   :  { %4225 = vrcp.f32 %v1673_v20 }
 0x37c   :  { %4227 = vpow2.f32 %v3637_v55 }
 0x37d   :  { %v2001_v6 = vpop.permute.xlu1 %2000  ;;  %v4214_v16 = vpop.eup %4213 }
 0x37e   :  { %v2083_v29 = vmul.f32 %v5564_v57, %v2001_v6  ;;  %v3640_v6 = vmul.f32 -1.442695, %v5429_v4  ;;  %v1675_v35 = vadd.f32 1.0, %v4214_v16 }
 0x37f   :  { %v1999_v24 = vpop.permute.xlu0 %1998  ;;  %v5581_v5 = vpop.eup %4215 }
 0x380   :  { %2160 = vrot.lane.b32.xlu1 %v2083_v29, %s4465_s23  ;;  %v2082_v34 = vmul.f32 %v5571_v10, %v1999_v24  ;;  %v1672_v29 = vadd.f32 1.0, %v4212_v21  ;;  %4229 = vpow2.f32 %v3640_v6  ;;  %v5584_v14 = vpop.eup %4217  ;;  %v3639_v24 = vmul.f32 -1.442695, %v5437_v11 }
 0x381   :  { %v4220_v20 = vpop.eup %4219 }
 0x382   :  { %2158 = vrot.lane.b32.xlu0 %v2082_v34, %s4465_s23  ;;  %4231 = vrcp.f32 %v1672_v29 }
 0x383   :  { %4233 = vrcp.f32 %v1675_v35  ;;  %v3641_v35 = vmul.f32 -1.442695, %v5454_v39 }
 0x384   :  { %4235 = vpow2.f32 %v3639_v24  ;;  %v3644_v24 = vmul.f32 -1.442695, %v5462_v61 }
 0x385   :  { %v2005_v54 = vpop.permute.xlu1 %2004  ;;  %v4222_v55 = vpop.eup %4221 }
 0x386   :  { %v2085_v45 = vmul.f32 %v5574_v62, %v2005_v54  ;;  %v3642_v54 = vmul.f32 -1.442695, %v5447_v30  ;;  %v1677_v16 = vadd.f32 1.0, %v4222_v55 }
 0x387   :  { %v2003_v22 = vpop.permute.xlu0 %2002  ;;  %v5591_v21 = vpop.eup %4223 }
 0x388   :  { %2164 = vrot.lane.b32.xlu1 %v2085_v45, %s4465_s23  ;;  %v2084_v52 = vmul.f32 %v5581_v5, %v2003_v22  ;;  %v1674_v45 = vadd.f32 1.0, %v4220_v20  ;;  %4237 = vpow2.f32 %v3642_v54  ;;  %v5594_v29 = vpop.eup %4225 }
 0x38a   :  { %2162 = vrot.lane.b32.xlu0 %v2084_v52, %s4465_s23  ;;  %4239 = vrcp.f32 %v1674_v45  ;;  %v4228_v52 = vpop.eup %4227 }
 0x38b   :  { %4241 = vrcp.f32 %v1677_v16  ;;  %v3643_v16 = vmul.f32 -1.442695, %v5472_v31 }
 0x38c   :  { %4243 = vpow2.f32 %v3641_v35 }
 0x38d   :  { %v2009_v34 = vpop.permute.xlu1 %2008  ;;  %4245 = vpow2.f32 %v3644_v24 }
 0x38e   :  { %v2087_v4 = vmul.f32 %v5584_v14, %v2009_v34  ;;  %v4230_v34 = vpop.eup %4229 }
 0x38f   :  { %v2007_v6 = vpop.permute.xlu0 %2006  ;;  %v5601_v20 = vpop.eup %4231  ;;  %v1679_v55 = vadd.f32 1.0, %v4230_v34 }
 0x390   :  { %2168 = vrot.lane.b32.xlu1 %v2087_v4, %s4465_s23  ;;  %v2086_v11 = vmul.f32 %v5591_v21, %v2007_v6  ;;  %v1676_v4 = vadd.f32 1.0, %v4228_v52  ;;  %v5604_v45 = vpop.eup %4233 }
 0x392   :  { %2166 = vrot.lane.b32.xlu0 %v2086_v11, %s4465_s23  ;;  %v4236_v11 = vpop.eup %4235  ;;  %4247 = vrcp.f32 %v1676_v4 }
 0x393   :  { %4249 = vrcp.f32 %v1679_v55  ;;  %v1678_v35 = vadd.f32 1.0, %v4236_v11  ;;  %v3645_v55 = vmul.f32 -1.442695, %v5488_v7 }
 0x394   :  { %4251 = vpow2.f32 %v3643_v16 }
 0x395   :  { %v2013_v22 = vpop.permute.xlu1 %2012  ;;  %4253 = vrcp.f32 %v1678_v35 }
 0x396   :  { %v2089_v30 = vmul.f32 %v5594_v29, %v2013_v22  ;;  %v4238_v22 = vpop.eup %4237 }
 0x397   :  { %v2011_v54 = vpop.permute.xlu0 %2010  ;;  %v5611_v52 = vpop.eup %4239  ;;  %v1681_v34 = vadd.f32 1.0, %v4238_v22 }
 0x398   :  { %2172 = vrot.lane.b32.xlu1 %v2089_v30, %s4465_s23  ;;  %v2088_v39 = vmul.f32 %v5601_v20, %v2011_v54  ;;  %v3646_v30 = vmul.f32 -1.442695, %v5480_v27  ;;  %v5614_v54 = vpop.eup %4241 }
 0x39a   :  { %2170 = vrot.lane.b32.xlu0 %v2088_v39, %s4465_s23  ;;  %4255 = vpow2.f32 %v3646_v30 }
 0x39b   :  { %4257 = vrcp.f32 %v1681_v34 }
 0x39c   :  { %4259 = vpow2.f32 %v3645_v55 }
 0x39d   :  { %v2017_v6 = vpop.permute.xlu1 %2016 }
 0x39e   :  { %v2091_v61 = vmul.f32 %v5604_v45, %v2017_v6  ;;  %v4244_v6 = vpop.eup %4243 }
 0x39f   :  { %v2015_v24 = vpop.permute.xlu0 %2014  ;;  %v4246_v27 = vpop.eup %4245  ;;  %v1680_v11 = vadd.f32 1.0, %v4244_v6 }
 0x3a0   :  { %2176 = vrot.lane.b32.xlu1 %v2091_v61, %s4465_s23  ;;  %v2090_v4 = vmul.f32 %v5611_v52, %v2015_v24  ;;  %v5620_v16 = vpop.eup %4247  ;;  %v1683_v22 = vadd.f32 1.0, %v4246_v27 }
 0x3a1   :  { %v5623_v30 = vpop.eup %4249  ;;  %4261 = vrcp.f32 %v1680_v11 }
 0x3a2   :  { %2174 = vrot.lane.b32.xlu0 %v2090_v4, %s4465_s23  ;;  %v4252_v34 = vpop.eup %4251  ;;  %4263 = vrcp.f32 %v1683_v22 }
 0x3a3   :  { %v5628_v4 = vpop.eup %4253 }
 0x3a4   :  { %6944 = vst [vmem:[#allocation9_spill] sm:$0xff] %v5628_v4 }
 0x3a5   :  { %v2021_v31 = vpop.permute.xlu1 %2020 }
 0x3a6   :  { %v2093_v39 = vmul.f32 %v5614_v54, %v2021_v31  ;;  %v1682_v31 = vadd.f32 1.0, %v4252_v34 }
 0x3a7   :  { %v2019_v61 = vpop.permute.xlu0 %2018  ;;  %v4256_v55 = vpop.eup %4255 }
 0x3a8   :  { %2180 = vrot.lane.b32.xlu1 %v2093_v39, %s4465_s23  ;;  %v2092_v35 = vmul.f32 %v5620_v16, %v2019_v61  ;;  %v5631_v27 = vpop.eup %4257  ;;  %4265 = vrcp.f32 %v1682_v31  ;;  %v1685_v11 = vadd.f32 1.0, %v4256_v55  ;;  %v1911_v55 = vmul.f32 %v5498_v44, %v5344_v0 }
 0x3aa   :  { %2178 = vrot.lane.b32.xlu0 %v2092_v35, %s4465_s23  ;;  %4267 = vrcp.f32 %v1685_v11 }
 0x3ad   :  { %v2025_v7 = vpop.permute.xlu1 %2024 }
 0x3ae   :  { %v2095_v24 = vmul.f32 %v5623_v30, %v2025_v7  ;;  %v4260_v7 = vpop.eup %4259 }
 0x3af   :  { %v2023_v39 = vpop.permute.xlu0 %2022  ;;  %v1684_v22 = vadd.f32 1.0, %v4260_v7 }
 0x3b0   :  { %2184 = vrot.lane.b32.xlu1 %v2095_v24, %s4465_s23  ;;  %v2094_v6 = vmul.f32 %v5628_v4, %v2023_v39  ;;  %v5636_v24 = vpop.eup %4261 }
 0x3b1   :  { %v5639_v39 = vpop.eup %4263  ;;  %4269 = vrcp.f32 %v1684_v22  ;;  %v1910_v22 = vmul.f32 %v5500_v53, %v5334_v9 }
 0x3b2   :  { %2182 = vrot.lane.b32.xlu0 %v2094_v6, %s4465_s23 }
 0x3b5   :  { %v2029_v61 = vpop.permute.xlu1 %2028 }
 0x3b6   :  { %v2097_v35 = vmul.f32 %v5631_v27, %v2029_v61  ;;  %v5646_v61 = vpop.eup %4265 }
 0x3b7   :  { %v2027_v34 = vpop.permute.xlu0 %2026 }
 0x3b8   :  { %2188 = vrot.lane.b32.xlu1 %v2097_v35, %s4465_s23  ;;  %v2096_v51 = vmul.f32 %v5636_v24, %v2027_v34 }
 0x3ba   :  { %2186 = vrot.lane.b32.xlu0 %v2096_v51, %s4465_s23 }
 0x3bd   :  { %v2033_v4 = vpop.permute.xlu1 %2032 }
 0x3be   :  { %v2099_v31 = vmul.f32 %v5639_v39, %v2033_v4  ;;  %v5655_v4 = vpop.eup %4267 }
 0x3c0   :  { %2192 = vrot.lane.b32.xlu1 %v2099_v31, %s4465_s23 }
 0x3c1   :  { %v2031_v11 = vpop.permute.xlu0 %2030 }
 0x3c2   :  { %v2137_v6 = vpop.permute.xlu1 %2136  ;;  %v2098_v7 = vmul.f32 %v5646_v61, %v2031_v11 }
 0x3c3   :  { %v5648_v35 = vadd.f32 %v2137_v6, %v1911_v55  ;;  %v5664_v6 = vpop.eup %4269 }
 0x3c4   :  { %2190 = vrot.lane.b32.xlu0 %v2098_v7, %s4465_s23  ;;  %v1913_v7 = vmul.f32 %v5509_v58, %v5352_v23 }
 0x3c5   :  { %6945 = vst [vmem:[#allocation10_spill] sm:$0xff] %v5648_v35  ;;  %4271 = vtanh.f32 %v5648_v35  ;;  %v2037_v34 = vpop.permute.xlu0 %2036 }
 0x3c6   :  { %v2135_v51 = vpop.permute.xlu1 %2134  ;;  %v2101_v31 = vmul.f32 %v5655_v4, %v2037_v34 }
 0x3c7   :  { %v5657_v0 = vadd.f32 %v2135_v51, %v1910_v22  ;;  %v1912_v22 = vmul.f32 %v5515_v2, %v5342_v60 }
 0x3c8   :  { %2196 = vrot.lane.b32.xlu1 %v2101_v31, %s4465_s23 }
 0x3c9   :  { %6946 = vst [vmem:[#allocation11_spill] sm:$0xff] %v5657_v0  ;;  %4273 = vtanh.f32 %v5657_v0  ;;  %v2035_v9 = vpop.permute.xlu0 %2034  ;;  %v1915_v0 = vmul.f32 %v5524_v46, %v5362_v37  ;;  %v1917_v37 = vmul.f32 %v5534_v25, %v5370_v50  ;;  %v1919_v50 = vmul.f32 %v5544_v17, %v5380_v8 }
 0x3ca   :  { %v5662_v55 = vpop.permute.xlu1 %1876  ;;  %v2100_v11 = vmul.f32 %v5664_v6, %v2035_v9  ;;  %v1921_v8 = vmul.f32 %v5554_v40, %v5388_v32  ;;  %v1923_v32 = vmul.f32 %v5564_v57, %v5399_v43  ;;  %v1925_v43 = vmul.f32 %v5574_v62, %v5407_v42 }
 0x3cb   :  { %v1927_v42 = vmul.f32 %v5584_v14, %v5415_v48  ;;  %v1929_v48 = vmul.f32 %v5594_v29, %v5425_v63  ;;  %v1931_v63 = vmul.f32 %v5604_v45, %v5439_v13  ;;  %v1933_v13 = vmul.f32 %v5614_v54, %v5451_v41 }
 0x3cc   :  { %2194 = vrot.lane.b32.xlu0 %v2100_v11, %s4465_s23  ;;  %v1914_v11 = vmul.f32 %v5531_v56, %v5350_v1  ;;  %v1916_v1 = vmul.f32 %v5541_v28, %v5360_v36  ;;  %v1918_v36 = vmul.f32 %v5551_v47, %v5368_v12  ;;  %v1920_v12 = vmul.f32 %v5561_v59, %v5378_v3 }
 0x3cd   :  { %v2139_v34 = vpop.permute.xlu0 %2138  ;;  %v1922_v3 = vmul.f32 %v5571_v10, %v5386_v18  ;;  %v1924_v18 = vmul.f32 %v5581_v5, %v5396_v33  ;;  %v1926_v33 = vmul.f32 %v5591_v21, %v5404_v38  ;;  %v1928_v38 = vmul.f32 %v5601_v20, %v5418_v49 }
 0x3ce   :  { %v2141_v51 = vpop.permute.xlu1 %2140  ;;  %v5674_v31 = vadd.f32 %v2139_v34, %v1912_v22  ;;  %v1930_v49 = vmul.f32 %v5611_v52, %v5432_v19  ;;  %v1932_v19 = vmul.f32 %v5620_v16, %v5443_v26  ;;  %v1935_v41 = vmul.f32 %v5623_v30, %v5465_v15  ;;  %v6951_v26 = vld [vmem:[#allocation2_spill] sm:$0xff]  ;;  %v6953_v15 = vld [vmem:[#allocation4_spill] sm:$0xff] }
 0x3cf   :  { %v5672_v35 = vadd.f32 %v2141_v51, %v1913_v7 }
 0x3d1   :  { %4275 = vtanh.f32 %v5672_v35 }
 0x3d2   :  { %v4272_v9 = vpop.eup %4271  ;;  %4277 = vtanh.f32 %v5674_v31  ;;  %v2145_v23 = vpop.permute.xlu1 %2144 }
 0x3d3   :  { %v5680_v58 = vadd.f32 %v2145_v23, %v1915_v0  ;;  %2328 = vrot.lane.b32.xlu1 %v4272_v9, %s4465_s23 }
 0x3d4   :  { %v2143_v7 = vpop.permute.xlu0 %2142 }
 0x3d5   :  { %4279 = vtanh.f32 %v5680_v58  ;;  %v5689_v22 = vadd.f32 %v2143_v7, %v1914_v11 }
 0x3d6   :  { %v4274_v60 = vpop.eup %4273 }
 0x3d7   :  { %2326 = vrot.lane.b32.xlu0 %v4274_v60, %s4465_s23  ;;  %4281 = vtanh.f32 %v5689_v22 }
 0x3da   :  { %v2149_v51 = vpop.permute.xlu1 %2148 }
 0x3db   :  { %v5692_v0 = vadd.f32 %v2149_v51, %v1917_v37 }
 0x3dc   :  { %v2147_v23 = vpop.permute.xlu0 %2146 }
 0x3dd   :  { %4283 = vtanh.f32 %v5692_v0  ;;  %v5701_v60 = vadd.f32 %v2147_v23, %v1916_v1 }
 0x3de   :  { %v4276_v34 = vpop.eup %4275 }
 0x3df   :  { %v4278_v9 = vpop.eup %4277  ;;  %2332 = vrot.lane.b32.xlu1 %v4276_v34, %s4465_s23  ;;  %4285 = vtanh.f32 %v5701_v60 }
 0x3e0   :  { %2330 = vrot.lane.b32.xlu0 %v4278_v9, %s4465_s23 }
 0x3e2   :  { %v4280_v11 = vpop.eup %4279  ;;  %v2153_v7 = vpop.permute.xlu1 %2152 }
 0x3e3   :  { %v5704_v37 = vadd.f32 %v2153_v7, %v1919_v50  ;;  %2336 = vrot.lane.b32.xlu1 %v4280_v11, %s4465_s23 }
 0x3e4   :  { %v4282_v51 = vpop.eup %4281  ;;  %v2151_v34 = vpop.permute.xlu0 %2150 }
 0x3e5   :  { %4287 = vtanh.f32 %v5704_v37  ;;  %v5712_v9 = vadd.f32 %v2151_v34, %v1918_v36  ;;  %2334 = vrot.lane.b32.xlu0 %v4282_v51, %s4465_s23 }
 0x3e7   :  { %4289 = vtanh.f32 %v5712_v9 }
 0x3ea   :  { %v4284_v1 = vpop.eup %4283  ;;  %v2157_v23 = vpop.permute.xlu1 %2156 }
 0x3eb   :  { %v5716_v50 = vadd.f32 %v2157_v23, %v1921_v8  ;;  %2340 = vrot.lane.b32.xlu1 %v4284_v1, %s4465_s23 }
 0x3ec   :  { %v4286_v11 = vpop.eup %4285  ;;  %v2155_v7 = vpop.permute.xlu0 %2154 }
 0x3ed   :  { %4291 = vtanh.f32 %v5716_v50  ;;  %v5724_v36 = vadd.f32 %v2155_v7, %v1920_v12  ;;  %2338 = vrot.lane.b32.xlu0 %v4286_v11, %s4465_s23 }
 0x3ef   :  { %4293 = vtanh.f32 %v5724_v36 }
 0x3f2   :  { %v4288_v51 = vpop.eup %4287  ;;  %v2161_v34 = vpop.permute.xlu1 %2160 }
 0x3f3   :  { %v5728_v8 = vadd.f32 %v2161_v34, %v1923_v32  ;;  %2344 = vrot.lane.b32.xlu1 %v4288_v51, %s4465_s23 }
 0x3f4   :  { %v4290_v1 = vpop.eup %4289  ;;  %v2159_v23 = vpop.permute.xlu0 %2158 }
 0x3f5   :  { %4295 = vtanh.f32 %v5728_v8  ;;  %v5736_v12 = vadd.f32 %v2159_v23, %v1922_v3  ;;  %2342 = vrot.lane.b32.xlu0 %v4290_v1, %s4465_s23 }
 0x3f7   :  { %4297 = vtanh.f32 %v5736_v12 }
 0x3fa   :  { %v4292_v11 = vpop.eup %4291  ;;  %v2165_v7 = vpop.permute.xlu1 %2164 }
 0x3fb   :  { %v5740_v32 = vadd.f32 %v2165_v7, %v1925_v43  ;;  %2348 = vrot.lane.b32.xlu1 %v4292_v11, %s4465_s23 }
 0x3fc   :  { %v4294_v51 = vpop.eup %4293  ;;  %v2163_v34 = vpop.permute.xlu0 %2162 }
 0x3fd   :  { %4299 = vtanh.f32 %v5740_v32  ;;  %v5748_v3 = vadd.f32 %v2163_v34, %v1924_v18  ;;  %2346 = vrot.lane.b32.xlu0 %v4294_v51, %s4465_s23 }
 0x3ff   :  { %4301 = vtanh.f32 %v5748_v3 }
 0x402   :  { %v4296_v1 = vpop.eup %4295  ;;  %v2169_v23 = vpop.permute.xlu1 %2168 }
 0x403   :  { %v5752_v43 = vadd.f32 %v2169_v23, %v1927_v42  ;;  %2352 = vrot.lane.b32.xlu1 %v4296_v1, %s4465_s23 }
 0x404   :  { %v4298_v11 = vpop.eup %4297  ;;  %v2167_v7 = vpop.permute.xlu0 %2166 }
 0x405   :  { %4303 = vtanh.f32 %v5752_v43  ;;  %v5760_v18 = vadd.f32 %v2167_v7, %v1926_v33  ;;  %2350 = vrot.lane.b32.xlu0 %v4298_v11, %s4465_s23 }
 0x407   :  { %4305 = vtanh.f32 %v5760_v18 }
 0x40a   :  { %v4300_v51 = vpop.eup %4299  ;;  %v2173_v34 = vpop.permute.xlu1 %2172 }
 0x40b   :  { %v5764_v42 = vadd.f32 %v2173_v34, %v1929_v48  ;;  %2356 = vrot.lane.b32.xlu1 %v4300_v51, %s4465_s23 }
 0x40c   :  { %v4302_v1 = vpop.eup %4301  ;;  %v2171_v23 = vpop.permute.xlu0 %2170 }
 0x40d   :  { %4307 = vtanh.f32 %v5764_v42  ;;  %v5772_v33 = vadd.f32 %v2171_v23, %v1928_v38  ;;  %2354 = vrot.lane.b32.xlu0 %v4302_v1, %s4465_s23 }
 0x40f   :  { %4309 = vtanh.f32 %v5772_v33 }
 0x412   :  { %v4304_v11 = vpop.eup %4303  ;;  %v2177_v7 = vpop.permute.xlu1 %2176 }
 0x413   :  { %v5776_v48 = vadd.f32 %v2177_v7, %v1931_v63  ;;  %2360 = vrot.lane.b32.xlu1 %v4304_v11, %s4465_s23 }
 0x414   :  { %v4306_v51 = vpop.eup %4305  ;;  %v2175_v34 = vpop.permute.xlu0 %2174 }
 0x415   :  { %6947 = vst [vmem:[#allocation12_spill] sm:$0xff] %v5776_v48  ;;  %4311 = vtanh.f32 %v5776_v48  ;;  %v5784_v38 = vadd.f32 %v2175_v34, %v1930_v49  ;;  %2358 = vrot.lane.b32.xlu0 %v4306_v51, %s4465_s23 }
 0x417   :  { %4313 = vtanh.f32 %v5784_v38 }
 0x41a   :  { %v4308_v1 = vpop.eup %4307  ;;  %v2181_v23 = vpop.permute.xlu1 %2180 }
 0x41b   :  { %v5788_v63 = vadd.f32 %v2181_v23, %v1933_v13  ;;  %2364 = vrot.lane.b32.xlu1 %v4308_v1, %s4465_s23  ;;  %v6952_v1 = vld [vmem:[#allocation9_spill] sm:$0xff] }
 0x41c   :  { %v4310_v11 = vpop.eup %4309  ;;  %v2179_v7 = vpop.permute.xlu0 %2178  ;;  %v1934_v23 = vmul.f32 %v6952_v1, %v6951_v26 }
 0x41d   :  { %6948 = vst [vmem:[#allocation13_spill] sm:$0xff] %v5788_v63  ;;  %4315 = vtanh.f32 %v5788_v63  ;;  %v5796_v49 = vadd.f32 %v2179_v7, %v1932_v19  ;;  %2362 = vrot.lane.b32.xlu0 %v4310_v11, %s4465_s23  ;;  %v1937_v19 = vmul.f32 %v5631_v27, %v6953_v15  ;;  %v6956_v15 = vld [vmem:[#allocation6_spill] sm:$0xff] }
 0x41f   :  { %6949 = vst [vmem:[#allocation14_spill] sm:$0xff] %v5796_v49  ;;  %4317 = vtanh.f32 %v5796_v49 }
 0x422   :  { %v4312_v51 = vpop.eup %4311  ;;  %v2185_v34 = vpop.permute.xlu1 %2184 }
 0x423   :  { %v5800_v13 = vadd.f32 %v2185_v34, %v1935_v41  ;;  %2368 = vrot.lane.b32.xlu1 %v4312_v51, %s4465_s23  ;;  %v6955_v51 = vld [vmem:[#allocation3_spill] sm:$0xff] }
 0x424   :  { %v4314_v63 = vpop.eup %4313  ;;  %v2183_v48 = vpop.permute.xlu0 %2182  ;;  %v1936_v34 = vmul.f32 %v5636_v24, %v6955_v51 }
 0x425   :  { %6950 = vst [vmem:[#allocation15_spill] sm:$0xff] %v5800_v13  ;;  %4319 = vtanh.f32 %v5800_v13  ;;  %v5808_v7 = vadd.f32 %v2183_v48, %v1934_v23  ;;  %2366 = vrot.lane.b32.xlu0 %v4314_v63, %s4465_s23  ;;  %v1939_v48 = vmul.f32 %v5639_v39, %v6956_v15  ;;  %v1941_v15 = vmul.f32 %v5655_v4, %v5662_v55 }
 0x427   :  { %6954 = vst [vmem:[#allocation2_spill] sm:$0xff] %v5808_v7  ;;  %4321 = vtanh.f32 %v5808_v7 }
 0x42a   :  { %v4316_v11 = vpop.eup %4315  ;;  %v2189_v49 = vpop.permute.xlu1 %2188 }
 0x42b   :  { %v5812_v41 = vadd.f32 %v2189_v49, %v1937_v19  ;;  %2372 = vrot.lane.b32.xlu1 %v4316_v11, %s4465_s23  ;;  %v492_v19 = vld [vmem:[%s6873_s3 + $0xc0] sm:$0xff]  ;;  %v6958_v11 = vld [vmem:[#allocation5_spill] sm:$0xff]  ;;  %s4467_s3 = smov 112  }
 0x42c   :  { %v4318_v26 = vpop.eup %4317  ;;  %v2187_v13 = vpop.permute.xlu0 %2186  ;;  %4024 = vmatprep.subr.mxu1 %v492_v19 }
 0x42d   :  { %4323 = vtanh.f32 %v5812_v41  ;;  %v5820_v23 = vadd.f32 %v2187_v13, %v1936_v34  ;;  %2370 = vrot.lane.b32.xlu0 %v4318_v26, %s4465_s23  ;;  %v1938_v13 = vmul.f32 %v5646_v61, %v6958_v11  ;;  %4025 = vmatpush3.msra.mxu1 %v492_v19  ;;  %v6959_v11 = vld [vmem:[#allocation7_spill] sm:$0xff] }
 0x42f   :  { %4325 = vtanh.f32 %v5820_v23 }
 0x432   :  { %v4320_v63 = vpop.eup %4319  ;;  %v2193_v7 = vpop.permute.xlu1 %2192 }
 0x433   :  { %v5824_v49 = vadd.f32 %v2193_v7, %v1939_v48  ;;  %2376 = vrot.lane.b32.xlu1 %v4320_v63, %s4465_s23 }
 0x434   :  { %v4322_v51 = vpop.eup %4321 }
 0x435   :  { %6957 = vst [vmem:[#allocation9_spill] sm:$0xff] %v5824_v49  ;;  %4327 = vtanh.f32 %v5824_v49  ;;  %2374 = vrot.lane.b32.xlu0 %v4322_v51, %s4465_s23  ;;  %v1940_v49 = vmul.f32 %v5664_v6, %v6959_v11 }
 0x436   :  { %v2191_v34 = vpop.permute.xlu0 %2190 }
 0x437   :  { %v5833_v26 = vadd.f32 %v2191_v34, %v1938_v13 }
 0x439   :  { %4329 = vtanh.f32 %v5833_v26 }
 0x43a   :  { %v4324_v7 = vpop.eup %4323  ;;  %v2197_v48 = vpop.permute.xlu1 %2196 }
 0x43b   :  { %2380 = vrot.lane.b32.xlu1 %v4324_v7, %s4465_s23  ;;  %v5840_v63 = vadd.f32 %v2197_v48, %v1941_v15 }
 0x43c   :  { %v4326_v19 = vpop.eup %4325 }
 0x43d   :  { %4331 = vtanh.f32 %v5840_v63  ;;  %2378 = vrot.lane.b32.xlu0 %v4326_v19, %s4465_s23 }
 0x43e   :  { %v2195_v13 = vpop.permute.xlu0 %2194 }
 0x43f   :  { %v5846_v51 = vadd.f32 %v2195_v13, %v1940_v49 }
 0x441   :  { %4333 = vtanh.f32 %v5846_v51 }
 0x442   :  { %v4328_v34 = vpop.eup %4327 }
 0x443   :  { %2384 = vrot.lane.b32.xlu1 %v4328_v34, %s4465_s23  ;;  %v6960_v34 = vld [vmem:[#allocation8_spill] sm:$0xff] }
 0x445   :  { %v2329_v48 = vpop.permute.xlu1 %2328 }
 0x446   :  { %v4330_v55 = vpop.eup %4329  ;;  %v5858_v49 = vmul.f32 %v5498_v44, %v2329_v48 }
 0x447   :  { %2382 = vrot.lane.b32.xlu0 %v4330_v55, %s4465_s23 }
 0x449   :  { %v2327_v7 = vpop.permute.xlu0 %2326 }
 0x44a   :  { %v5852_v15 = vmul.f32 %v5500_v53, %v2327_v7  ;;  %v4332_v11 = vpop.eup %4331 }
 0x44b   :  { %2388 = vrot.lane.b32.xlu0 %v4332_v11, %s4465_s23 }
 0x44c   :  { %2486 = vrot.lane.b32.xlu1 %v5852_v15, %s4467_s3 }
 0x44e   :  { %v4334_v19 = vpop.eup %4333 }
 0x44f   :  { %2386 = vrot.lane.b32.xlu0 %v4334_v19, %s4465_s23 }
 0x450   :  { %2488 = vrot.lane.b32.xlu1 %v5858_v49, %s4467_s3 }
 0x451   :  { %v2333_v13 = vpop.permute.xlu1 %2332 }
 0x452   :  { %v2331_v53 = vpop.permute.xlu0 %2330  ;;  %v5864_v55 = vmul.f32 %v6960_v34, %v2333_v13 }
 0x453   :  { %v5867_v7 = vmul.f32 %v5515_v2, %v2331_v53 }
 0x454   :  { %2492 = vrot.lane.b32.xlu1 %v5864_v55, %s4467_s3 }
 0x455   :  { %2490 = vrot.lane.b32.xlu0 %v5867_v7, %s4467_s3  ;;  %v2337_v44 = vpop.permute.xlu1 %2336 }
 0x456   :  { %v5874_v48 = vmul.f32 %v5524_v46, %v2337_v44 }
 0x457   :  { %v2335_v11 = vpop.permute.xlu0 %2334 }
 0x458   :  { %2496 = vrot.lane.b32.xlu1 %v5874_v48, %s4467_s3  ;;  %v5879_v19 = vmul.f32 %v5531_v56, %v2335_v11 }
 0x45a   :  { %2494 = vrot.lane.b32.xlu0 %v5879_v19, %s4467_s3 }
 0x45d   :  { %v2341_v13 = vpop.permute.xlu1 %2340 }
 0x45e   :  { %v5884_v2 = vmul.f32 %v5534_v25, %v2341_v13 }
 0x45f   :  { %v2339_v53 = vpop.permute.xlu0 %2338 }
 0x460   :  { %2500 = vrot.lane.b32.xlu1 %v5884_v2, %s4467_s3  ;;  %v5889_v46 = vmul.f32 %v5541_v28, %v2339_v53 }
 0x462   :  { %6961 = vst [vmem:[#allocation4_spill] sm:$0xff] %v5889_v46  ;;  %2498 = vrot.lane.b32.xlu0 %v5889_v46, %s4467_s3 }
 0x465   :  { %v2345_v34 = vpop.permute.xlu1 %2344 }
 0x466   :  { %v5894_v56 = vmul.f32 %v5544_v17, %v2345_v34 }
 0x467   :  { %v2343_v44 = vpop.permute.xlu0 %2342 }
 0x468   :  { %6962 = vst [vmem:[#allocation3_spill] sm:$0xff] %v5894_v56  ;;  %2504 = vrot.lane.b32.xlu1 %v5894_v56, %s4467_s3  ;;  %v5899_v25 = vmul.f32 %v5551_v47, %v2343_v44 }
 0x46a   :  { %6963 = vst [vmem:[#allocation6_spill] sm:$0xff] %v5899_v25  ;;  %2502 = vrot.lane.b32.xlu0 %v5899_v25, %s4467_s3 }
 0x46d   :  { %v2349_v11 = vpop.permute.xlu1 %2348 }
 0x46e   :  { %v5904_v28 = vmul.f32 %v5554_v40, %v2349_v11 }
 0x46f   :  { %v2347_v13 = vpop.permute.xlu0 %2346 }
 0x470   :  { %6964 = vst [vmem:[#allocation5_spill] sm:$0xff] %v5904_v28  ;;  %2508 = vrot.lane.b32.xlu1 %v5904_v28, %s4467_s3  ;;  %v5909_v17 = vmul.f32 %v5561_v59, %v2347_v13 }
 0x472   :  { %6965 = vst [vmem:[#allocation7_spill] sm:$0xff] %v5909_v17  ;;  %2506 = vrot.lane.b32.xlu0 %v5909_v17, %s4467_s3 }
 0x475   :  { %v2353_v53 = vpop.permute.xlu1 %2352 }
 0x476   :  { %v5914_v47 = vmul.f32 %v5564_v57, %v2353_v53 }
 0x477   :  { %v2351_v34 = vpop.permute.xlu0 %2350 }
 0x478   :  { %6966 = vst [vmem:[#allocation8_spill] sm:$0xff] %v5914_v47  ;;  %2512 = vrot.lane.b32.xlu1 %v5914_v47, %s4467_s3  ;;  %v5919_v40 = vmul.f32 %v5571_v10, %v2351_v34 }
 0x47a   :  { %6967 = vst [vmem:[#allocation16_spill] sm:$0xff] %v5919_v40  ;;  %2510 = vrot.lane.b32.xlu0 %v5919_v40, %s4467_s3 }
 0x47d   :  { %v2357_v44 = vpop.permute.xlu1 %2356 }
 0x47e   :  { %v5924_v59 = vmul.f32 %v5574_v62, %v2357_v44 }
 0x47f   :  { %v2355_v11 = vpop.permute.xlu0 %2354 }
 0x480   :  { %6968 = vst [vmem:[#allocation17_spill] sm:$0xff] %v5924_v59  ;;  %2516 = vrot.lane.b32.xlu1 %v5924_v59, %s4467_s3  ;;  %v5929_v57 = vmul.f32 %v5581_v5, %v2355_v11 }
 0x482   :  { %6969 = vst [vmem:[#allocation18_spill] sm:$0xff] %v5929_v57  ;;  %2514 = vrot.lane.b32.xlu0 %v5929_v57, %s4467_s3 }
 0x485   :  { %v2361_v13 = vpop.permute.xlu1 %2360 }
 0x486   :  { %v5934_v10 = vmul.f32 %v5584_v14, %v2361_v13 }
 0x487   :  { %v2359_v53 = vpop.permute.xlu0 %2358 }
 0x488   :  { %6970 = vst [vmem:[#allocation19_spill] sm:$0xff] %v5934_v10  ;;  %2520 = vrot.lane.b32.xlu1 %v5934_v10, %s4467_s3  ;;  %v5939_v62 = vmul.f32 %v5591_v21, %v2359_v53 }
 0x48a   :  { %6971 = vst [vmem:[#allocation20_spill] sm:$0xff] %v5939_v62  ;;  %2518 = vrot.lane.b32.xlu0 %v5939_v62, %s4467_s3 }
 0x48d   :  { %v2365_v34 = vpop.permute.xlu1 %2364 }
 0x48e   :  { %v5944_v5 = vmul.f32 %v5594_v29, %v2365_v34 }
 0x48f   :  { %v2363_v44 = vpop.permute.xlu0 %2362 }
 0x490   :  { %6972 = vst [vmem:[#allocation21_spill] sm:$0xff] %v5944_v5  ;;  %2524 = vrot.lane.b32.xlu1 %v5944_v5, %s4467_s3  ;;  %v5949_v14 = vmul.f32 %v5601_v20, %v2363_v44 }
 0x492   :  { %6973 = vst [vmem:[#allocation22_spill] sm:$0xff] %v5949_v14  ;;  %2522 = vrot.lane.b32.xlu0 %v5949_v14, %s4467_s3 }
 0x495   :  { %v2369_v11 = vpop.permute.xlu1 %2368 }
 0x496   :  { %v5954_v21 = vmul.f32 %v5604_v45, %v2369_v11 }
 0x497   :  { %v2367_v13 = vpop.permute.xlu0 %2366 }
 0x498   :  { %6974 = vst [vmem:[#allocation23_spill] sm:$0xff] %v5954_v21  ;;  %2528 = vrot.lane.b32.xlu1 %v5954_v21, %s4467_s3  ;;  %v5959_v29 = vmul.f32 %v5611_v52, %v2367_v13 }
 0x49a   :  { %6975 = vst [vmem:[#allocation24_spill] sm:$0xff] %v5959_v29  ;;  %2526 = vrot.lane.b32.xlu0 %v5959_v29, %s4467_s3 }
 0x49d   :  { %v2373_v53 = vpop.permute.xlu1 %2372 }
 0x49e   :  { %v5964_v20 = vmul.f32 %v5614_v54, %v2373_v53 }
 0x49f   :  { %v2371_v34 = vpop.permute.xlu0 %2370 }
 0x4a0   :  { %6976 = vst [vmem:[#allocation25_spill] sm:$0xff] %v5964_v20  ;;  %2532 = vrot.lane.b32.xlu1 %v5964_v20, %s4467_s3  ;;  %v5969_v45 = vmul.f32 %v5620_v16, %v2371_v34 }
 0x4a2   :  { %6977 = vst [vmem:[#allocation26_spill] sm:$0xff] %v5969_v45  ;;  %2530 = vrot.lane.b32.xlu0 %v5969_v45, %s4467_s3 }
 0x4a5   :  { %v2377_v44 = vpop.permute.xlu1 %2376 }
 0x4a6   :  { %v5974_v52 = vmul.f32 %v5623_v30, %v2377_v44 }
 0x4a7   :  { %v2375_v11 = vpop.permute.xlu0 %2374 }
 0x4a8   :  { %6978 = vst [vmem:[#allocation27_spill] sm:$0xff] %v5974_v52  ;;  %2536 = vrot.lane.b32.xlu1 %v5974_v52, %s4467_s3  ;;  %v5979_v54 = vmul.f32 %v6952_v1, %v2375_v11 }
 0x4aa   :  { %6979 = vst [vmem:[#allocation28_spill] sm:$0xff] %v5979_v54  ;;  %2534 = vrot.lane.b32.xlu0 %v5979_v54, %s4467_s3 }
 0x4ad   :  { %v2381_v13 = vpop.permute.xlu1 %2380 }
 0x4ae   :  { %v5984_v16 = vmul.f32 %v5631_v27, %v2381_v13 }
 0x4af   :  { %v2379_v53 = vpop.permute.xlu0 %2378 }
 0x4b0   :  { %6980 = vst [vmem:[#allocation29_spill] sm:$0xff] %v5984_v16  ;;  %2540 = vrot.lane.b32.xlu1 %v5984_v16, %s4467_s3  ;;  %v5989_v30 = vmul.f32 %v5636_v24, %v2379_v53 }
 0x4b2   :  { %6981 = vst [vmem:[#allocation30_spill] sm:$0xff] %v5989_v30  ;;  %2538 = vrot.lane.b32.xlu0 %v5989_v30, %s4467_s3 }
 0x4b5   :  { %v2385_v34 = vpop.permute.xlu1 %2384 }
 0x4b6   :  { %v5994_v1 = vmul.f32 %v5639_v39, %v2385_v34  ;;  %v6986_v34 = vld [vmem:[#allocation11_spill] sm:$0xff] }
 0x4b8   :  { %6982 = vst [vmem:[#allocation31_spill] sm:$0xff] %v5994_v1  ;;  %2544 = vrot.lane.b32.xlu1 %v5994_v1, %s4467_s3 }
 0x4b9   :  { %v2383_v44 = vpop.permute.xlu0 %2382 }
 0x4ba   :  { %v5999_v27 = vmul.f32 %v5646_v61, %v2383_v44 }
 0x4bc   :  { %6983 = vst [vmem:[#allocation32_spill] sm:$0xff] %v5999_v27  ;;  %2542 = vrot.lane.b32.xlu0 %v5999_v27, %s4467_s3 }
 0x4bd   :  { %v2389_v11 = vpop.permute.xlu0 %2388 }
 0x4be   :  { %v2487_v24 = vpop.permute.xlu1 %2486  ;;  %v6005_v13 = vmul.f32 %v5655_v4, %v2389_v11  ;;  %v6987_v4 = vld [vmem:[#allocation10_spill] sm:$0xff] }
 0x4bf   :  { %4026 = vmatprep.mubr.msk.f32.mxu1 %vm2550_vm4, %v2487_v24 }
 0x4c0   :  { %6984 = vst [vmem:[#allocation33_spill] sm:$0xff] %v6005_v13  ;;  %2548 = vrot.lane.b32.xlu1 %v6005_v13, %s4467_s3 }
 0x4c1   :  { %v2387_v53 = vpop.permute.xlu0 %2386 }
 0x4c2   :  { %v2489_v39 = vpop.permute.xlu1 %2488  ;;  %v6011_v61 = vmul.f32 %v5664_v6, %v2387_v53 }
 0x4c3   :  { %4027 = vmatmul.mubr.msk.f32.vlgmr.msra.gmra.mxu1 %vm2550_vm4, %v2489_v39 }
 0x4c4   :  { %6985 = vst [vmem:[#allocation34_spill] sm:$0xff] %v6011_v61  ;;  %2546 = vrot.lane.b32.xlu0 %v6011_v61, %s4467_s3  ;;  %3224 = vrot.lane.b32.xlu1 %v6986_v34, %s4463_s19 }
 0x4c6   :  { %v2493_v44 = vpop.permute.xlu1 %2492 }
 0x4c7   :  { %v2491_v24 = vpop.permute.xlu0 %2490 }
 0x4c8   :  { %4029 = vmatprep.mubr.msk.f32.mxu1 %vm2550_vm4, %v2491_v24  ;;  %3226 = vrot.lane.b32.xlu0 %v6987_v4, %s4463_s19 }
 0x4c9   :  { %4030 = vmatmul.mubr.msk.f32.gmra.mxu1 %vm2550_vm4, %v2493_v44  ;;  %3228 = vrot.lane.b32.xlu1 %v5674_v31, %s4463_s19 }
 0x4ca   :  { %v2497_v11 = vpop.permute.xlu1 %2496 }
 0x4cc   :  { %3232 = vrot.lane.b32.xlu0 %v5689_v22, %s4463_s19  ;;  %v2495_v6 = vpop.permute.xlu0 %2494 }
 0x4cd   :  { %3230 = vrot.lane.b32.xlu1 %v5672_v35, %s4463_s19  ;;  %4032 = vmatprep.mubr.msk.f32.mxu1 %vm2550_vm4, %v2495_v6 }
 0x4ce   :  { %4033 = vmatmul.mubr.msk.f32.gmra.mxu1 %vm2550_vm4, %v2497_v11 }
 0x4d0   :  { %3236 = vrot.lane.b32.xlu0 %v5701_v60, %s4463_s19 }
 0x4d1   :  { %3234 = vrot.lane.b32.xlu1 %v5680_v58, %s4463_s19 }
 0x4d2   :  { %v2501_v35 = vpop.permute.xlu1 %2500 }
 0x4d4   :  { %3240 = vrot.lane.b32.xlu0 %v5712_v9, %s4463_s19  ;;  %v2499_v31 = vpop.permute.xlu0 %2498 }
 0x4d5   :  { %3238 = vrot.lane.b32.xlu1 %v5692_v0, %s4463_s19  ;;  %4035 = vmatprep.mubr.msk.f32.mxu1 %vm2550_vm4, %v2499_v31 }
 0x4d6   :  { %4036 = vmatmul.mubr.msk.f32.gmra.mxu1 %vm2550_vm4, %v2501_v35 }
 0x4d8   :  { %3244 = vrot.lane.b32.xlu0 %v5724_v36, %s4463_s19  ;;  %v6989_v36 = vld [vmem:[#allocation12_spill] sm:$0xff] }
 0x4d9   :  { %3242 = vrot.lane.b32.xlu1 %v5704_v37, %s4463_s19 }
 0x4da   :  { %v2505_v22 = vpop.permute.xlu1 %2504 }
 0x4dc   :  { %3248 = vrot.lane.b32.xlu0 %v5736_v12, %s4463_s19  ;;  %v2503_v58 = vpop.permute.xlu0 %2502  ;;  %v6991_v12 = vld [vmem:[#allocation13_spill] sm:$0xff] }
 0x4dd   :  { %3246 = vrot.lane.b32.xlu1 %v5716_v50, %s4463_s19  ;;  %4038 = vmatprep.mubr.msk.f32.mxu1 %vm2550_vm4, %v2503_v58  ;;  %v6988_v50 = vld [vmem:[#allocation14_spill] sm:$0xff] }
 0x4de   :  { %4039 = vmatmul.mubr.msk.f32.gmra.mxu1 %vm2550_vm4, %v2505_v22 }
 0x4e0   :  { %3252 = vrot.lane.b32.xlu0 %v5748_v3, %s4463_s19 }
 0x4e1   :  { %3250 = vrot.lane.b32.xlu1 %v5728_v8, %s4463_s19  ;;  %v6990_v8 = vld [vmem:[#allocation2_spill] sm:$0xff] }
 0x4e2   :  { %v2509_v60 = vpop.permute.xlu1 %2508 }
 0x4e4   :  { %3256 = vrot.lane.b32.xlu0 %v5760_v18, %s4463_s19  ;;  %v2507_v0 = vpop.permute.xlu0 %2506 }
 0x4e5   :  { %3254 = vrot.lane.b32.xlu1 %v5740_v32, %s4463_s19  ;;  %4041 = vmatprep.mubr.msk.f32.mxu1 %vm2550_vm4, %v2507_v0 }
 0x4e6   :  { %4042 = vmatmul.mubr.msk.f32.gmra.mxu1 %vm2550_vm4, %v2509_v60 }
 0x4e8   :  { %3260 = vrot.lane.b32.xlu0 %v5772_v33, %s4463_s19 }
 0x4e9   :  { %3258 = vrot.lane.b32.xlu1 %v5752_v43, %s4463_s19  ;;  %v6992_v43 = vld [vmem:[#allocation15_spill] sm:$0xff] }
 0x4ea   :  { %v2513_v9 = vpop.permute.xlu1 %2512 }
 0x4ec   :  { %3264 = vrot.lane.b32.xlu0 %v5784_v38, %s4463_s19  ;;  %v2511_v37 = vpop.permute.xlu0 %2510 }
 0x4ed   :  { %3262 = vrot.lane.b32.xlu1 %v5764_v42, %s4463_s19  ;;  %4044 = vmatprep.mubr.msk.f32.mxu1 %vm2550_vm4, %v2511_v37 }
 0x4ee   :  { %4045 = vmatmul.mubr.msk.f32.gmra.mxu1 %vm2550_vm4, %v2513_v9 }
 0x4f0   :  { %3268 = vrot.lane.b32.xlu0 %v6988_v50, %s4463_s19 }
 0x4f1   :  { %3266 = vrot.lane.b32.xlu1 %v6989_v36, %s4463_s19 }
 0x4f2   :  { %v2517_v3 = vpop.permute.xlu1 %2516 }
 0x4f4   :  { %3272 = vrot.lane.b32.xlu0 %v6990_v8, %s4463_s19  ;;  %v2515_v32 = vpop.permute.xlu0 %2514 }
 0x4f5   :  { %3270 = vrot.lane.b32.xlu1 %v6991_v12, %s4463_s19  ;;  %4047 = vmatprep.mubr.msk.f32.mxu1 %vm2550_vm4, %v2515_v32 }
 0x4f6   :  { %4048 = vmatmul.mubr.msk.f32.gmra.mxu1 %vm2550_vm4, %v2517_v3 }
 0x4f8   :  { %3276 = vrot.lane.b32.xlu0 %v5820_v23, %s4463_s19 }
 0x4f9   :  { %3274 = vrot.lane.b32.xlu1 %v6992_v43, %s4463_s19 }
 0x4fa   :  { %v2521_v42 = vpop.permute.xlu1 %2520 }
 0x4fc   :  { %v2519_v18 = vpop.permute.xlu0 %2518 }
 0x4fd   :  { %3278 = vrot.lane.b32.xlu1 %v5812_v41, %s4463_s19  ;;  %4050 = vmatprep.mubr.msk.f32.mxu1 %vm2550_vm4, %v2519_v18 }
 0x4fe   :  { %4051 = vmatmul.mubr.msk.f32.gmra.mxu1 %vm2550_vm4, %v2521_v42 }
 0x502   :  { %v2525_v38 = vpop.permute.xlu1 %2524 }
 0x504   :  { %v2523_v33 = vpop.permute.xlu0 %2522 }
 0x505   :  { %4053 = vmatprep.mubr.msk.f32.mxu1 %vm2550_vm4, %v2523_v33 }
 0x506   :  { %4054 = vmatmul.mubr.msk.f32.gmra.mxu1 %vm2550_vm4, %v2525_v38 }
 0x50a   :  { %v2529_v23 = vpop.permute.xlu1 %2528 }
 0x50c   :  { %v2527_v39 = vpop.permute.xlu0 %2526 }
 0x50d   :  { %4056 = vmatprep.mubr.msk.f32.mxu1 %vm2550_vm4, %v2527_v39 }
 0x50e   :  { %4057 = vmatmul.mubr.msk.f32.gmra.mxu1 %vm2550_vm4, %v2529_v23 }
 0x512   :  { %v2533_v41 = vpop.permute.xlu1 %2532 }
 0x514   :  { %v2531_v53 = vpop.permute.xlu0 %2530 }
 0x515   :  { %4059 = vmatprep.mubr.msk.f32.mxu1 %vm2550_vm4, %v2531_v53 }
 0x516   :  { %4060 = vmatmul.mubr.msk.f32.gmra.mxu1 %vm2550_vm4, %v2533_v41 }
 0x51a   :  { %v2537_v44 = vpop.permute.xlu1 %2536 }
 0x51c   :  { %v2535_v34 = vpop.permute.xlu0 %2534 }
 0x51d   :  { %4062 = vmatprep.mubr.msk.f32.mxu1 %vm2550_vm4, %v2535_v34 }
 0x51e   :  { %4063 = vmatmul.mubr.msk.f32.gmra.mxu1 %vm2550_vm4, %v2537_v44 }
 0x522   :  { %v2541_v4 = vpop.permute.xlu1 %2540 }
 0x524   :  { %v2539_v24 = vpop.permute.xlu0 %2538 }
 0x525   :  { %4065 = vmatprep.mubr.msk.f32.mxu1 %vm2550_vm4, %v2539_v24 }
 0x526   :  { %4066 = vmatmul.mubr.msk.f32.gmra.mxu1 %vm2550_vm4, %v2541_v4 }
 0x52a   :  { %v2545_v11 = vpop.permute.xlu1 %2544 }
 0x52e   :  { %v2543_v6 = vpop.permute.xlu0 %2542 }
 0x52f   :  { %4068 = vmatprep.mubr.msk.f32.mxu1 %vm2550_vm4, %v2543_v6 }
 0x530   :  { %4069 = vmatmul.mubr.msk.f32.gmra.mxu1 %vm2550_vm4, %v2545_v11 }
 0x532   :  { %v2549_v35 = vpop.permute.xlu1 %2548 }
 0x536   :  { %v2547_v31 = vpop.permute.xlu0 %2546 }
 0x537   :  { %4071 = vmatprep.mubr.msk.f32.mxu1 %vm2550_vm4, %v2547_v31 }
 0x538   :  { %4072 = vmatmul.mubr.msk.f32.gmra.mxu1 %vm2550_vm4, %v2549_v35 }
 0x583   :  { %v6101_v58 = vpop.f32.mrf.mxu1 }
 0x584   :  { %v2843_v22 = vsel %vm2550_vm4, %v6101_v58, -inf }
 0x585   :  { %2844 = vmax.xlane.f32.xlu1 %v2843_v22  ;;  %v6105_v0 = vpop.f32.mrf.mxu1 }
 0x586   :  { %v2840_v60 = vsel %vm2550_vm4, %v6105_v0, -inf }
 0x587   :  { %2841 = vmax.xlane.f32.xlu0 %v2840_v60 }
 0x589   :  { %v6109_v37 = vpop.f32.mrf.mxu1 }
 0x58a   :  { %v2849_v9 = vsel %vm2550_vm4, %v6109_v37, -inf }
 0x58b   :  { %v6113_v50 = vpop.f32.mrf.mxu1  ;;  %2850 = vmax.xlane.f32.xlu0 %v2849_v9  ;;  %v6163_v9 = vpop.permute.xlu1 %3224 }
 0x58c   :  { %v2846_v36 = vsel %vm2550_vm4, %v6113_v50, -inf }
 0x58e   :  { %v6117_v8 = vpop.f32.mrf.mxu1 }
 0x58f   :  { %2847 = vmax.xlane.f32.xlu0 %v2846_v36  ;;  %v2855_v12 = vsel %vm2550_vm4, %v6117_v8, -inf }
 0x590   :  { %v6121_v32 = vpop.f32.mrf.mxu1 }
 0x591   :  { %v2852_v3 = vsel %vm2550_vm4, %v6121_v32, -inf }
 0x592   :  { %2853 = vmax.xlane.f32.xlu1 %v2852_v3  ;;  %v6169_v3 = vpop.permute.xlu1 %3228 }
 0x593   :  { %2856 = vmax.xlane.f32.xlu0 %v2855_v12 }
 0x596   :  { %v6125_v43 = vpop.f32.mrf.mxu1 }
 0x597   :  { %v2861_v18 = vsel %vm2550_vm4, %v6125_v43, -inf }
 0x598   :  { %2862 = vmax.xlane.f32.xlu0 %v2861_v18  ;;  %v6129_v42 = vpop.f32.mrf.mxu1 }
 0x599   :  { %v2858_v33 = vsel %vm2550_vm4, %v6129_v42, -inf }
 0x59a   :  { %2859 = vmax.xlane.f32.xlu1 %v2858_v33  ;;  %v6173_v33 = vpop.permute.xlu0 %3226 }
 0x59e   :  { %v6133_v38 = vpop.f32.mrf.mxu1 }
 0x59f   :  { %v2867_v39 = vsel %vm2550_vm4, %v6133_v38, -inf }
 0x5a0   :  { %2868 = vmax.xlane.f32.xlu0 %v2867_v39  ;;  %v6137_v23 = vpop.f32.mrf.mxu1 }
 0x5a1   :  { %6993 = vst [vmem:[#allocation11_spill] sm:$0xff] %v6137_v23  ;;  %v2864_v53 = vsel %vm2550_vm4, %v6137_v23, -inf }
 0x5a2   :  { %2865 = vmax.xlane.f32.xlu1 %v2864_v53 }
 0x5a6   :  { %v6141_v41 = vpop.f32.mrf.mxu1 }
 0x5a7   :  { %6994 = vst [vmem:[#allocation10_spill] sm:$0xff] %v6141_v41  ;;  %v2873_v34 = vsel %vm2550_vm4, %v6141_v41, -inf }
 0x5a8   :  { %2874 = vmax.xlane.f32.xlu0 %v2873_v34  ;;  %v6145_v44 = vpop.f32.mrf.mxu1  ;;  %v6179_v34 = vpop.permute.xlu1 %3230 }
 0x5a9   :  { %6995 = vst [vmem:[#allocation14_spill] sm:$0xff] %v6145_v44  ;;  %v2870_v24 = vsel %vm2550_vm4, %v6145_v44, -inf }
 0x5aa   :  { %2871 = vmax.xlane.f32.xlu1 %v2870_v24  ;;  %v6181_v24 = vpop.permute.xlu0 %3232 }
 0x5ae   :  { %v6149_v4 = vpop.f32.mrf.mxu1  ;;  %v6193_v61 = vpop.permute.xlu0 %3236 }
 0x5af   :  { %6996 = vst [vmem:[#allocation12_spill] sm:$0xff] %v6149_v4  ;;  %v2879_v6 = vsel %vm2550_vm4, %v6149_v4, -inf  ;;  %7004 = vst [vmem:[#allocation39_spill] sm:$0xff] %v6193_v61 }
 0x5b0   :  { %2880 = vmax.xlane.f32.xlu0 %v2879_v6  ;;  %v6153_v11 = vpop.f32.mrf.mxu1 }
 0x5b1   :  { %6997 = vst [vmem:[#allocation2_spill] sm:$0xff] %v6153_v11  ;;  %v2876_v31 = vsel %vm2550_vm4, %v6153_v11, -inf }
 0x5b2   :  { %2877 = vmax.xlane.f32.xlu1 %v2876_v31  ;;  %v6205_v30 = vpop.permute.xlu0 %3240 }
 0x5b3   :  { %7008 = vst [vmem:[#allocation43_spill] sm:$0xff] %v6205_v30 }
 0x5b6   :  { %v6157_v35 = vpop.f32.mrf.mxu1  ;;  %v6213_v52 = vpop.permute.xlu0 %3244 }
 0x5b7   :  { %6998 = vst [vmem:[#allocation13_spill] sm:$0xff] %v6157_v35  ;;  %v2885_v22 = vsel %vm2550_vm4, %v6157_v35, -inf  ;;  %7011 = vst [vmem:[#allocation46_spill] sm:$0xff] %v6213_v52 }
 0x5b8   :  { %2886 = vmax.xlane.f32.xlu0 %v2885_v22  ;;  %v6161_v60 = vpop.f32.mrf.mxu1 }
 0x5b9   :  { %6999 = vst [vmem:[#allocation15_spill] sm:$0xff] %v6161_v60  ;;  %v2882_v36 = vsel %vm2550_vm4, %v6161_v60, -inf }
 0x5ba   :  { %2883 = vmax.xlane.f32.xlu1 %v2882_v36  ;;  %v6221_v29 = vpop.permute.xlu0 %3248 }
 0x5bb   :  { %7014 = vst [vmem:[#allocation49_spill] sm:$0xff] %v6221_v29 }
 0x5be   :  { %v6167_v12 = vpop.f32.mrf.mxu1  ;;  %v6233_v62 = vpop.permute.xlu0 %3252 }
 0x5bf   :  { %7000 = vst [vmem:[#allocation35_spill] sm:$0xff] %v6167_v12  ;;  %v2891_v18 = vsel %vm2550_vm4, %v6167_v12, -inf  ;;  %7018 = vst [vmem:[#allocation53_spill] sm:$0xff] %v6233_v62 }
 0x5c0   :  { %2892 = vmax.xlane.f32.xlu0 %v2891_v18  ;;  %v6175_v39 = vpop.f32.mrf.mxu1  ;;  %v6191_v18 = vpop.permute.xlu1 %3234 }
 0x5c1   :  { %7001 = vst [vmem:[#allocation36_spill] sm:$0xff] %v6175_v39  ;;  %v2888_v53 = vsel %vm2550_vm4, %v6175_v39, -inf }
 0x5c2   :  { %2889 = vmax.xlane.f32.xlu1 %v2888_v53  ;;  %v6245_v29 = vpop.permute.xlu0 %3256 }
 0x5c3   :  { %7022 = vst [vmem:[#allocation57_spill] sm:$0xff] %v6245_v29 }
 0x5c4   :  { %v6201_v1 = vpop.permute.xlu1 %3238 }
 0x5c5   :  { %7007 = vst [vmem:[#allocation42_spill] sm:$0xff] %v6201_v1 }
 0x5c6   :  { %v6183_v6 = vpop.f32.mrf.mxu1 }
 0x5c7   :  { %7002 = vst [vmem:[#allocation37_spill] sm:$0xff] %v6183_v6  ;;  %v2897_v31 = vsel %vm2550_vm4, %v6183_v6, -inf }
 0x5c8   :  { %2898 = vmax.xlane.f32.xlu0 %v2897_v31  ;;  %v6187_v22 = vpop.f32.mrf.mxu1  ;;  %v6209_v16 = vpop.permute.xlu1 %3242 }
 0x5c9   :  { %7003 = vst [vmem:[#allocation38_spill] sm:$0xff] %v6187_v22  ;;  %v2894_v36 = vsel %vm2550_vm4, %v6187_v22, -inf  ;;  %7010 = vst [vmem:[#allocation45_spill] sm:$0xff] %v6209_v16 }
 0x5ca   :  { %2895 = vmax.xlane.f32.xlu1 %v2894_v36 }
 0x5cc   :  { %v6219_v20 = vpop.permute.xlu1 %3246 }
 0x5cd   :  { %7013 = vst [vmem:[#allocation48_spill] sm:$0xff] %v6219_v20 }
 0x5ce   :  { %v6195_v53 = vpop.f32.mrf.mxu1 }
 0x5cf   :  { %7005 = vst [vmem:[#allocation40_spill] sm:$0xff] %v6195_v53  ;;  %v2903_v13 = vsel %vm2550_vm4, %v6195_v53, -inf }
 0x5d0   :  { %2904 = vmax.xlane.f32.xlu0 %v2903_v13  ;;  %v6199_v27 = vpop.f32.mrf.mxu1  ;;  %v6231_v5 = vpop.permute.xlu1 %3250 }
 0x5d1   :  { %7006 = vst [vmem:[#allocation41_spill] sm:$0xff] %v6199_v27  ;;  %v2900_v31 = vsel %vm2550_vm4, %v6199_v27, -inf  ;;  %7017 = vst [vmem:[#allocation52_spill] sm:$0xff] %v6231_v5  ;;  %v6253_v5 = vpop.permute.xlu0 %3260 }
 0x5d2   :  { %2901 = vmax.xlane.f32.xlu1 %v2900_v31  ;;  %7025 = vst [vmem:[#allocation60_spill] sm:$0xff] %v6253_v5 }
 0x5d4   :  { %v6241_v59 = vpop.permute.xlu1 %3254 }
 0x5d5   :  { %7021 = vst [vmem:[#allocation56_spill] sm:$0xff] %v6241_v59  ;;  %v6261_v29 = vpop.permute.xlu0 %3264 }
 0x5d6   :  { %v6207_v36 = vpop.f32.mrf.mxu1  ;;  %7028 = vst [vmem:[#allocation63_spill] sm:$0xff] %v6261_v29 }
 0x5d7   :  { %7009 = vst [vmem:[#allocation44_spill] sm:$0xff] %v6207_v36  ;;  %v2909_v54 = vsel %vm2550_vm4, %v6207_v36, -inf }
 0x5d8   :  { %2910 = vmax.xlane.f32.xlu0 %v2909_v54  ;;  %v6215_v13 = vpop.f32.mrf.mxu1  ;;  %v6249_v40 = vpop.permute.xlu1 %3258 }
 0x5d9   :  { %7012 = vst [vmem:[#allocation47_spill] sm:$0xff] %v6215_v13  ;;  %v2906_v45 = vsel %vm2550_vm4, %v6215_v13, -inf  ;;  %7024 = vst [vmem:[#allocation59_spill] sm:$0xff] %v6249_v40  ;;  %v6273_v17 = vpop.permute.xlu0 %3268 }
 0x5da   :  { %2907 = vmax.xlane.f32.xlu1 %v2906_v45  ;;  %7032 = vst [vmem:[#allocation67_spill] sm:$0xff] %v6273_v17 }
 0x5dc   :  { %v6259_v47 = vpop.permute.xlu1 %3262 }
 0x5dd   :  { %7027 = vst [vmem:[#allocation62_spill] sm:$0xff] %v6259_v47  ;;  %v6277_v47 = vpop.permute.xlu0 %3272 }
 0x5de   :  { %v6223_v31 = vpop.f32.mrf.mxu1  ;;  %7034 = vst [vmem:[#allocation69_spill] sm:$0xff] %v6277_v47 }
 0x5df   :  { %7015 = vst [vmem:[#allocation50_spill] sm:$0xff] %v6223_v31  ;;  %v2915_v21 = vsel %vm2550_vm4, %v6223_v31, -inf }
 0x5e0   :  { %2916 = vmax.xlane.f32.xlu0 %v2915_v21  ;;  %v6227_v14 = vpop.f32.mrf.mxu1  ;;  %v6271_v5 = vpop.permute.xlu1 %3266 }
 0x5e1   :  { %7016 = vst [vmem:[#allocation51_spill] sm:$0xff] %v6227_v14  ;;  %v2912_v54 = vsel %vm2550_vm4, %v6227_v14, -inf  ;;  %7031 = vst [vmem:[#allocation66_spill] sm:$0xff] %v6271_v5  ;;  %v6281_v20 = vpop.permute.xlu0 %3276 }
 0x5e2   :  { %2913 = vmax.xlane.f32.xlu1 %v2912_v54  ;;  %7036 = vst [vmem:[#allocation71_spill] sm:$0xff] %v6281_v20 }
 0x5e6   :  { %v6235_v45 = vpop.f32.mrf.mxu1 }
 0x5e7   :  { %7019 = vst [vmem:[#allocation54_spill] sm:$0xff] %v6235_v45  ;;  %v2921_v10 = vsel %vm2550_vm4, %v6235_v45, -inf }
 0x5e8   :  { %2922 = vmax.xlane.f32.xlu0 %v2921_v10  ;;  %v6239_v57 = vpop.f32.mrf.mxu1 }
 0x5e9   :  { %7020 = vst [vmem:[#allocation55_spill] sm:$0xff] %v6239_v57  ;;  %v2918_v21 = vsel %vm2550_vm4, %v6239_v57, -inf }
 0x5ea   :  { %2919 = vmax.xlane.f32.xlu1 %v2918_v21 }
 0x5f0   :  { %v6247_v54 = vpop.f32.mrf.mxu1 }
 0x5f1   :  { %7023 = vst [vmem:[#allocation58_spill] sm:$0xff] %v6247_v54  ;;  %v2927_v62 = vsel %vm2550_vm4, %v6247_v54, -inf }
 0x5f2   :  { %2928 = vmax.xlane.f32.xlu0 %v2927_v62  ;;  %v6255_v10 = vpop.f32.mrf.mxu1 }
 0x5f3   :  { %7026 = vst [vmem:[#allocation61_spill] sm:$0xff] %v6255_v10  ;;  %v2924_v59 = vsel %vm2550_vm4, %v6255_v10, -inf }
 0x5f4   :  { %2925 = vmax.xlane.f32.xlu1 %v2924_v59  ;;  %v6275_v59 = vpop.permute.xlu1 %3270 }
 0x5f5   :  { %7033 = vst [vmem:[#allocation68_spill] sm:$0xff] %v6275_v59 }
 0x5f8   :  { %v6263_v21 = vpop.f32.mrf.mxu1  ;;  %v6279_v29 = vpop.permute.xlu1 %3274 }
 0x5f9   :  { %7029 = vst [vmem:[#allocation64_spill] sm:$0xff] %v6263_v21  ;;  %v2933_v40 = vsel %vm2550_vm4, %v6263_v21, -inf  ;;  %7035 = vst [vmem:[#allocation70_spill] sm:$0xff] %v6279_v29 }
 0x5fa   :  { %2934 = vmax.xlane.f32.xlu0 %v2933_v40  ;;  %v6267_v52 = vpop.f32.mrf.mxu1  ;;  %v7037_v40 = vld [vmem:[#allocation9_spill] sm:$0xff] }
 0x5fb   :  { %7030 = vst [vmem:[#allocation65_spill] sm:$0xff] %v6267_v52  ;;  %v2930_v62 = vsel %vm2550_vm4, %v6267_v52, -inf }
 0x5fc   :  { %2931 = vmax.xlane.f32.xlu1 %v2930_v62  ;;  %v6285_v30 = vpop.permute.xlu1 %3278 }
 0x5fd   :  { %7038 = vst [vmem:[#allocation9_spill] sm:$0xff] %v6285_v30 }
 0x60d   :  { %3282 = vrot.lane.b32.xlu1 %v7037_v40, %s4463_s19 }
 0x60e   :  { %v2845_v5 = vpop.xlane.xlu1 %2844 }
 0x60f   :  { %v2937_v17 = vsub.f32 %v6101_v58, %v2845_v5 }
 0x610   :  { %v2842_v28 = vpop.xlane.xlu0 %2841  ;;  %3280 = vrot.lane.b32.xlu0 %v5833_v26, %s4463_s19 }
 0x611   :  { %v2936_v47 = vsub.f32 %v6105_v0, %v2842_v28  ;;  %v2970_v25 = vmul.f32 1.442695, %v2937_v17 }
 0x613   :  { %v2968_v16 = vmul.f32 1.442695, %v2936_v47  ;;  %4335 = vpow2.f32 %v2970_v25 }
 0x614   :  { %v2851_v62 = vpop.xlane.xlu0 %2850 }
 0x615   :  { %v2939_v29 = vsub.f32 %v6109_v37, %v2851_v62  ;;  %4337 = vpow2.f32 %v2968_v16 }
 0x617   :  { %v2974_v30 = vmul.f32 1.442695, %v2939_v29 }
 0x618   :  { %v2848_v59 = vpop.xlane.xlu0 %2847 }
 0x619   :  { %v2938_v40 = vsub.f32 %v6113_v50, %v2848_v59  ;;  %4339 = vpow2.f32 %v2974_v30 }
 0x61b   :  { %v2854_v56 = vpop.xlane.xlu1 %2853  ;;  %v2972_v26 = vmul.f32 1.442695, %v2938_v40 }
 0x61c   :  { %v2857_v20 = vpop.xlane.xlu0 %2856  ;;  %v2940_v46 = vsub.f32 %v6121_v32, %v2854_v56 }
 0x61d   :  { %v2941_v61 = vsub.f32 %v6117_v8, %v2857_v20  ;;  %4341 = vpow2.f32 %v2972_v26 }
 0x61e   :  { %v2976_v28 = vmul.f32 1.442695, %v2940_v46 }
 0x61f   :  { %v2978_v5 = vmul.f32 1.442695, %v2941_v61 }
 0x620   :  { %v6297_v29 = vpop.eup %4335 }
 0x621   :  { %v2863_v1 = vpop.xlane.xlu0 %2862  ;;  %4343 = vpow2.f32 %v2978_v5  ;;  %v3035_v61 = vsel %vm2550_vm4, %v6297_v29, 0.0 }
 0x622   :  { %v2943_v17 = vsub.f32 %v6125_v43, %v2863_v1  ;;  %4345 = vpow2.f32 %v2976_v28  ;;  %v6300_v16 = vpop.eup %4337 }
 0x623   :  { %v2860_v62 = vpop.xlane.xlu1 %2859  ;;  %v3032_v5 = vsel %vm2550_vm4, %v6300_v16, 0.0 }
 0x624   :  { %v2982_v47 = vmul.f32 1.442695, %v2943_v17  ;;  %v2942_v59 = vsub.f32 %v6129_v42, %v2860_v62 }
 0x626   :  { %v2980_v25 = vmul.f32 1.442695, %v2942_v59  ;;  %4347 = vpow2.f32 %v2982_v47  ;;  %v6305_v40 = vpop.eup %4339 }
 0x627   :  { %v3041_v17 = vsel %vm2550_vm4, %v6305_v40, 0.0 }
 0x628   :  { %4349 = vpow2.f32 %v2980_v25 }
 0x629   :  { %v2869_v20 = vpop.xlane.xlu0 %2868 }
 0x62a   :  { %v2945_v56 = vsub.f32 %v6133_v38, %v2869_v20  ;;  %v6309_v28 = vpop.eup %4341 }
 0x62b   :  { %v2866_v30 = vpop.xlane.xlu1 %2865  ;;  %v3038_v25 = vsel %vm2550_vm4, %v6309_v28, 0.0 }
 0x62c   :  { %v2986_v46 = vmul.f32 1.442695, %v2945_v56  ;;  %v2944_v1 = vsub.f32 %v6137_v23, %v2866_v30 }
 0x62e   :  { %4351 = vpow2.f32 %v2986_v46  ;;  %v2984_v26 = vmul.f32 1.442695, %v2944_v1  ;;  %v6313_v62 = vpop.eup %4343 }
 0x62f   :  { %3036 = vadd.xlane.f32.xlu0 %v3035_v61  ;;  %v6318_v20 = vpop.eup %4345  ;;  %v3047_v1 = vsel %vm2550_vm4, %v6313_v62, 0.0 }
 0x630   :  { %4353 = vpow2.f32 %v2984_v26 }
 0x631   :  { %3033 = vadd.xlane.f32.xlu1 %v3032_v5  ;;  %v2875_v47 = vpop.xlane.xlu0 %2874  ;;  %v3044_v5 = vsel %vm2550_vm4, %v6318_v20, 0.0 }
 0x632   :  { %v2947_v59 = vsub.f32 %v6141_v41, %v2875_v47 }
 0x633   :  { %3042 = vadd.xlane.f32.xlu0 %v3041_v17  ;;  %v2872_v56 = vpop.xlane.xlu1 %2871  ;;  %v6323_v61 = vpop.eup %4347 }
 0x634   :  { %v2990_v30 = vmul.f32 1.442695, %v2947_v59  ;;  %v2946_v46 = vsub.f32 %v6145_v44, %v2872_v56  ;;  %v3053_v47 = vsel %vm2550_vm4, %v6323_v61, 0.0 }
 0x635   :  { %3039 = vadd.xlane.f32.xlu1 %v3038_v25  ;;  %v6327_v17 = vpop.eup %4349 }
 0x636   :  { %4355 = vpow2.f32 %v2990_v30  ;;  %v2988_v26 = vmul.f32 1.442695, %v2946_v46  ;;  %v3050_v56 = vsel %vm2550_vm4, %v6327_v17, 0.0 }
 0x637   :  { %3048 = vadd.xlane.f32.xlu0 %v3047_v1 }
 0x638   :  { %4357 = vpow2.f32 %v2988_v26 }
 0x639   :  { %3045 = vadd.xlane.f32.xlu1 %v3044_v5  ;;  %v2881_v59 = vpop.xlane.xlu0 %2880 }
 0x63a   :  { %v2949_v25 = vsub.f32 %v6149_v4, %v2881_v59 }
 0x63b   :  { %3054 = vadd.xlane.f32.xlu0 %v3053_v47  ;;  %v6334_v1 = vpop.eup %4351  ;;  %v2878_v30 = vpop.xlane.xlu1 %2877 }
 0x63c   :  { %v2994_v46 = vmul.f32 1.442695, %v2949_v25  ;;  %v2948_v44 = vsub.f32 %v6153_v11, %v2878_v30  ;;  %v3059_v26 = vsel %vm2550_vm4, %v6334_v1, 0.0 }
 0x63d   :  { %3051 = vadd.xlane.f32.xlu1 %v3050_v56  ;;  %v6339_v5 = vpop.eup %4353 }
 0x63e   :  { %4359 = vpow2.f32 %v2994_v46  ;;  %v2992_v47 = vmul.f32 1.442695, %v2948_v44  ;;  %v3056_v59 = vsel %vm2550_vm4, %v6339_v5, 0.0 }
 0x63f   :  { %3060 = vadd.xlane.f32.xlu0 %v3059_v26 }
 0x640   :  { %4361 = vpow2.f32 %v2992_v47 }
 0x641   :  { %3057 = vadd.xlane.f32.xlu1 %v3056_v59  ;;  %v2887_v4 = vpop.xlane.xlu0 %2886 }
 0x642   :  { %v2951_v41 = vsub.f32 %v6157_v35, %v2887_v4 }
 0x643   :  { %v6344_v56 = vpop.eup %4355  ;;  %v2884_v25 = vpop.xlane.xlu1 %2883 }
 0x644   :  { %v2998_v30 = vmul.f32 1.442695, %v2951_v41  ;;  %v2950_v11 = vsub.f32 %v6161_v60, %v2884_v25  ;;  %v3065_v23 = vsel %vm2550_vm4, %v6344_v56, 0.0 }
 0x645   :  { %v6349_v26 = vpop.eup %4357  ;;  %3066 = vadd.xlane.f32.xlu0 %v3065_v23 }
 0x646   :  { %4363 = vpow2.f32 %v2998_v30  ;;  %v2996_v44 = vmul.f32 1.442695, %v2950_v11  ;;  %v3062_v46 = vsel %vm2550_vm4, %v6349_v26, 0.0 }
 0x647   :  { %3063 = vadd.xlane.f32.xlu1 %v3062_v46 }
 0x648   :  { %4365 = vpow2.f32 %v2996_v44 }
 0x649   :  { %v2893_v4 = vpop.xlane.xlu0 %2892 }
 0x64a   :  { %v2953_v47 = vsub.f32 %v6167_v12, %v2893_v4 }
 0x64b   :  { %v6354_v59 = vpop.eup %4359  ;;  %v2890_v41 = vpop.xlane.xlu1 %2889 }
 0x64c   :  { %v3002_v25 = vmul.f32 1.442695, %v2953_v47  ;;  %v2952_v60 = vsub.f32 %v6175_v39, %v2890_v41  ;;  %v3071_v35 = vsel %vm2550_vm4, %v6354_v59, 0.0 }
 0x64d   :  { %v6359_v23 = vpop.eup %4361  ;;  %3072 = vadd.xlane.f32.xlu0 %v3071_v35 }
 0x64e   :  { %4367 = vpow2.f32 %v3002_v25  ;;  %v3000_v11 = vmul.f32 1.442695, %v2952_v60  ;;  %v3068_v30 = vsel %vm2550_vm4, %v6359_v23, 0.0 }
 0x64f   :  { %3069 = vadd.xlane.f32.xlu1 %v3068_v30 }
 0x650   :  { %4369 = vpow2.f32 %v3000_v11 }
 0x651   :  { %v2899_v44 = vpop.xlane.xlu0 %2898 }
 0x652   :  { %v2955_v46 = vsub.f32 %v6183_v6, %v2899_v44 }
 0x653   :  { %v6364_v4 = vpop.eup %4363  ;;  %v2896_v47 = vpop.xlane.xlu1 %2895 }
 0x654   :  { %v3006_v41 = vmul.f32 1.442695, %v2955_v46  ;;  %v2954_v39 = vsub.f32 %v6187_v22, %v2896_v47  ;;  %v3077_v12 = vsel %vm2550_vm4, %v6364_v4, 0.0 }
 0x655   :  { %v6369_v35 = vpop.eup %4365  ;;  %3078 = vadd.xlane.f32.xlu0 %v3077_v12 }
 0x656   :  { %4371 = vpow2.f32 %v3006_v41  ;;  %v3004_v60 = vmul.f32 1.442695, %v2954_v39  ;;  %v3074_v25 = vsel %vm2550_vm4, %v6369_v35, 0.0 }
 0x657   :  { %3075 = vadd.xlane.f32.xlu1 %v3074_v25 }
 0x658   :  { %4373 = vpow2.f32 %v3004_v60 }
 0x659   :  { %v2905_v11 = vpop.xlane.xlu0 %2904 }
 0x65a   :  { %v2957_v30 = vsub.f32 %v6195_v53, %v2905_v11 }
 0x65b   :  { %v6374_v44 = vpop.eup %4367  ;;  %v2902_v46 = vpop.xlane.xlu1 %2901 }
 0x65c   :  { %v3010_v47 = vmul.f32 1.442695, %v2957_v30  ;;  %v2956_v22 = vsub.f32 %v6199_v27, %v2902_v46  ;;  %v3083_v6 = vsel %vm2550_vm4, %v6374_v44, 0.0 }
 0x65d   :  { %v6379_v12 = vpop.eup %4369  ;;  %3084 = vadd.xlane.f32.xlu0 %v3083_v6 }
 0x65e   :  { %4375 = vpow2.f32 %v3010_v47  ;;  %v3008_v39 = vmul.f32 1.442695, %v2956_v22  ;;  %v3080_v41 = vsel %vm2550_vm4, %v6379_v12, 0.0 }
 0x65f   :  { %3081 = vadd.xlane.f32.xlu1 %v3080_v41 }
 0x660   :  { %4377 = vpow2.f32 %v3008_v39 }
 0x661   :  { %v2911_v60 = vpop.xlane.xlu0 %2910 }
 0x662   :  { %v2959_v25 = vsub.f32 %v6207_v36, %v2911_v60 }
 0x663   :  { %v6384_v11 = vpop.eup %4371  ;;  %v2908_v30 = vpop.xlane.xlu1 %2907 }
 0x664   :  { %v3014_v46 = vmul.f32 1.442695, %v2959_v25  ;;  %v2958_v27 = vsub.f32 %v6215_v13, %v2908_v30  ;;  %v3089_v53 = vsel %vm2550_vm4, %v6384_v11, 0.0 }
 0x665   :  { %v6389_v6 = vpop.eup %4373  ;;  %3090 = vadd.xlane.f32.xlu0 %v3089_v53 }
 0x666   :  { %4379 = vpow2.f32 %v3014_v46  ;;  %v3012_v22 = vmul.f32 1.442695, %v2958_v27  ;;  %v3086_v47 = vsel %vm2550_vm4, %v6389_v6, 0.0 }
 0x667   :  { %3087 = vadd.xlane.f32.xlu1 %v3086_v47 }
 0x668   :  { %4381 = vpow2.f32 %v3012_v22 }
 0x669   :  { %v2917_v39 = vpop.xlane.xlu0 %2916 }
 0x66a   :  { %v2961_v41 = vsub.f32 %v6223_v31, %v2917_v39 }
 0x66b   :  { %v6394_v60 = vpop.eup %4375  ;;  %v2914_v25 = vpop.xlane.xlu1 %2913 }
 0x66c   :  { %v3018_v30 = vmul.f32 1.442695, %v2961_v41  ;;  %v2960_v13 = vsub.f32 %v6227_v14, %v2914_v25  ;;  %v3095_v36 = vsel %vm2550_vm4, %v6394_v60, 0.0 }
 0x66d   :  { %v6399_v53 = vpop.eup %4377  ;;  %3096 = vadd.xlane.f32.xlu0 %v3095_v36 }
 0x66e   :  { %4383 = vpow2.f32 %v3018_v30  ;;  %v3016_v27 = vmul.f32 1.442695, %v2960_v13  ;;  %v3092_v46 = vsel %vm2550_vm4, %v6399_v53, 0.0 }
 0x66f   :  { %3093 = vadd.xlane.f32.xlu1 %v3092_v46 }
 0x670   :  { %4385 = vpow2.f32 %v3016_v27 }
 0x671   :  { %v2923_v22 = vpop.xlane.xlu0 %2922 }
 0x672   :  { %v2963_v47 = vsub.f32 %v6235_v45, %v2923_v22 }
 0x673   :  { %v6404_v39 = vpop.eup %4379  ;;  %v2920_v41 = vpop.xlane.xlu1 %2919 }
 0x674   :  { %v3022_v25 = vmul.f32 1.442695, %v2963_v47  ;;  %v2962_v14 = vsub.f32 %v6239_v57, %v2920_v41  ;;  %v3101_v31 = vsel %vm2550_vm4, %v6404_v39, 0.0 }
 0x675   :  { %v6409_v36 = vpop.eup %4381  ;;  %3102 = vadd.xlane.f32.xlu0 %v3101_v31 }
 0x676   :  { %4387 = vpow2.f32 %v3022_v25  ;;  %v3020_v13 = vmul.f32 1.442695, %v2962_v14  ;;  %v3098_v30 = vsel %vm2550_vm4, %v6409_v36, 0.0 }
 0x677   :  { %3099 = vadd.xlane.f32.xlu1 %v3098_v30 }
 0x678   :  { %4389 = vpow2.f32 %v3020_v13 }
 0x67b   :  { %v2929_v27 = vpop.xlane.xlu0 %2928  ;;  %v6414_v22 = vpop.eup %4383 }
 0x67c   :  { %v2965_v46 = vsub.f32 %v6247_v54, %v2929_v27  ;;  %v3107_v45 = vsel %vm2550_vm4, %v6414_v22, 0.0 }
 0x67d   :  { %v2926_v47 = vpop.xlane.xlu1 %2925  ;;  %v6419_v31 = vpop.eup %4385  ;;  %3108 = vadd.xlane.f32.xlu0 %v3107_v45 }
 0x67e   :  { %v3026_v41 = vmul.f32 1.442695, %v2965_v46  ;;  %v2964_v57 = vsub.f32 %v6255_v10, %v2926_v47  ;;  %v3104_v25 = vsel %vm2550_vm4, %v6419_v31, 0.0 }
 0x67f   :  { %3105 = vadd.xlane.f32.xlu1 %v3104_v25 }
 0x680   :  { %4391 = vpow2.f32 %v3026_v41  ;;  %v3024_v14 = vmul.f32 1.442695, %v2964_v57 }
 0x682   :  { %4393 = vpow2.f32 %v3024_v14 }
 0x683   :  { %v2935_v13 = vpop.xlane.xlu0 %2934  ;;  %v6424_v27 = vpop.eup %4387 }
 0x684   :  { %v2967_v30 = vsub.f32 %v6263_v21, %v2935_v13  ;;  %v3113_v10 = vsel %vm2550_vm4, %v6424_v27, 0.0 }
 0x685   :  { %v2932_v46 = vpop.xlane.xlu1 %2931  ;;  %v6429_v45 = vpop.eup %4389  ;;  %3114 = vadd.xlane.f32.xlu0 %v3113_v10 }
 0x686   :  { %v3030_v47 = vmul.f32 1.442695, %v2967_v30  ;;  %v2966_v54 = vsub.f32 %v6267_v52, %v2932_v46  ;;  %v3110_v41 = vsel %vm2550_vm4, %v6429_v45, 0.0 }
 0x687   :  { %3111 = vadd.xlane.f32.xlu1 %v3110_v41 }
 0x688   :  { %4395 = vpow2.f32 %v3030_v47  ;;  %v3028_v57 = vmul.f32 1.442695, %v2966_v54 }
 0x689   :  { %v6455_v41 = vpop.permute.xlu1 %3282 }
 0x68a   :  { %4397 = vpow2.f32 %v3028_v57  ;;  %v6453_v57 = vpop.permute.xlu0 %3280 }
 0x68b   :  { %7041 = vst [vmem:[#allocation74_spill] sm:$0xff] %v6453_v57 }
 0x68d   :  { %v6433_v14 = vpop.eup %4391 }
 0x68e   :  { %v3119_v25 = vsel %vm2550_vm4, %v6433_v14, 0.0 }
 0x68f   :  { %v6437_v13 = vpop.eup %4393  ;;  %3120 = vadd.xlane.f32.xlu0 %v3119_v25 }
 0x690   :  { %v3116_v30 = vsel %vm2550_vm4, %v6437_v13, 0.0 }
 0x691   :  { %3117 = vadd.xlane.f32.xlu1 %v3116_v30 }
 0x695   :  { %v6441_v10 = vpop.eup %4395 }
 0x696   :  { %7039 = vst [vmem:[#allocation72_spill] sm:$0xff] %v6441_v10  ;;  %v3125_v54 = vsel %vm2550_vm4, %v6441_v10, 0.0 }
 0x697   :  { %v6445_v46 = vpop.eup %4397  ;;  %3126 = vadd.xlane.f32.xlu0 %v3125_v54 }
 0x698   :  { %7040 = vst [vmem:[#allocation73_spill] sm:$0xff] %v6445_v46  ;;  %v3122_v47 = vsel %vm2550_vm4, %v6445_v46, 0.0 }
 0x699   :  { %3123 = vadd.xlane.f32.xlu1 %v3122_v47 }
 0x6aa   :  { %3286 = vrot.lane.b32.xlu1 %v5840_v63, %s4463_s19 }
 0x6ad   :  { %3284 = vrot.lane.b32.xlu0 %v5846_v51, %s4463_s19 }
 0x6b8   :  { %v3037_v25 = vpop.xlane.xlu0 %3036 }
 0x6b9   :  { %4399 = vrcp.f32 %v3037_v25 }
 0x6ba   :  { %v3034_v30 = vpop.xlane.xlu1 %3033 }
 0x6bb   :  { %4401 = vrcp.f32 %v3034_v30 }
 0x6bc   :  { %v3043_v52 = vpop.xlane.xlu0 %3042 }
 0x6bd   :  { %4403 = vrcp.f32 %v3043_v52 }
 0x6be   :  { %v3040_v54 = vpop.xlane.xlu1 %3039 }
 0x6bf   :  { %4405 = vrcp.f32 %v3040_v54 }
 0x6c0   :  { %v3049_v21 = vpop.xlane.xlu0 %3048 }
 0x6c1   :  { %4407 = vrcp.f32 %v3049_v21 }
 0x6c2   :  { %v3046_v47 = vpop.xlane.xlu1 %3045 }
 0x6c3   :  { %4409 = vrcp.f32 %v3046_v47 }
 0x6c4   :  { %v3055_v63 = vpop.xlane.xlu0 %3054 }
 0x6c5   :  { %4411 = vrcp.f32 %v3055_v63 }
 0x6c6   :  { %v4400_v46 = vpop.eup %4399  ;;  %v3052_v51 = vpop.xlane.xlu1 %3051 }
 0x6c7   :  { %v3161_v10 = vmul.f32 %v4400_v46, %v6297_v29  ;;  %4413 = vrcp.f32 %v3052_v51 }
 0x6c8   :  { %v4402_v57 = vpop.eup %4401  ;;  %v3061_v25 = vpop.xlane.xlu0 %3060 }
 0x6c9   :  { %v3321_v30 = vsel %vm2550_vm4, %v3161_v10, %v6101_v58  ;;  %v3160_v52 = vmul.f32 %v4402_v57, %v6300_v16  ;;  %4415 = vrcp.f32 %v3061_v25 }
 0x6ca   :  { %v4404_v54 = vpop.eup %4403  ;;  %v3354_v21 = vsel %vm3352_vm5, %v3321_v30, 0.0  ;;  %v3058_v47 = vpop.xlane.xlu1 %3057 }
 0x6cb   :  { %v3386_v63 = vsel %vm369_vm0, %v3354_v21, %v5858_v49  ;;  %v3320_v29 = vsel %vm2550_vm4, %v3160_v52, %v6105_v0  ;;  %v3163_v46 = vmul.f32 %v4404_v54, %v6305_v40  ;;  %4417 = vrcp.f32 %v3058_v47 }
 0x6cc   :  { %v4406_v51 = vpop.eup %4405  ;;  %v3418_v58 = vsel %vm402_vm1, %v3386_v63, %v6173_v33  ;;  %v3353_v16 = vsel %vm3352_vm5, %v3320_v29, 0.0 }
 0x6cd   :  { %v3451_v10 = vsel %vm3449_vm6, %v3418_v58, 0.0  ;;  %v3385_v57 = vsel %vm369_vm0, %v3353_v16, %v5852_v15  ;;  %v3323_v49 = vsel %vm2550_vm4, %v3163_v46, %v6109_v37  ;;  %v3162_v25 = vmul.f32 %v4406_v51, %v6309_v28 }
 0x6ce   :  { %v4408_v0 = vpop.eup %4407  ;;  %3483 = vst.msk [vmem:[%s6875_s4 + $0x8] sm:$0xff] %vm494_vm3, %v3451_v10  ;;  %v3417_v33 = vsel %vm402_vm1, %v3385_v57, %v6163_v9  ;;  %v3356_v40 = vsel %vm3352_vm5, %v3323_v49, 0.0  ;;  %v3067_v21 = vpop.xlane.xlu0 %3066 }
 0x6cf   :  { %v3450_v30 = vsel %vm3449_vm6, %v3417_v33, 0.0  ;;  %v3388_v15 = vsel %vm369_vm0, %v3356_v40, %v5864_v55  ;;  %v3322_v37 = vsel %vm2550_vm4, %v3162_v25, %v6113_v50  ;;  %v3165_v28 = vmul.f32 %v4408_v0, %v6313_v62  ;;  %v7042_v33 = vld [vmem:[#allocation42_spill] sm:$0xff] }
 0x6d0   :  { %v4410_v52 = vpop.eup %4409  ;;  %3482 = vst.msk [vmem:[%s6875_s4] sm:$0xff] %vm494_vm3, %v3450_v30  ;;  %v3420_v9 = vsel %vm402_vm1, %v3388_v15, %v6179_v34  ;;  %v3355_v54 = vsel %vm3352_vm5, %v3322_v37, 0.0  ;;  %4419 = vrcp.f32 %v3067_v21  ;;  %v3064_v46 = vpop.xlane.xlu1 %3063 }
 0x6d1   :  { %v3453_v47 = vsel %vm3449_vm6, %v3420_v9, 0.0  ;;  %v3387_v55 = vsel %vm369_vm0, %v3355_v54, %v5867_v7  ;;  %v3325_v50 = vsel %vm2550_vm4, %v3165_v28, %v6117_v8  ;;  %v3164_v62 = vmul.f32 %v4410_v52, %v6318_v20  ;;  %v7044_v28 = vld [vmem:[#allocation39_spill] sm:$0xff] }
 0x6d2   :  { %v4412_v63 = vpop.eup %4411  ;;  %3485 = vst.msk [vmem:[%s6875_s4 + $0x18] sm:$0xff] %vm494_vm3, %v3453_v47  ;;  %v3419_v34 = vsel %vm402_vm1, %v3387_v55, %v6169_v3  ;;  %v3358_v29 = vsel %vm3352_vm5, %v3325_v50, 0.0  ;;  %4421 = vrcp.f32 %v3064_v46  ;;  %v7045_v47 = vld [vmem:[#allocation3_spill] sm:$0xff]  ;;  %v7047_v50 = vld [vmem:[#allocation45_spill] sm:$0xff] }
 0x6d3   :  { %v3452_v7 = vsel %vm3449_vm6, %v3419_v34, 0.0  ;;  %v3390_v8 = vsel %vm369_vm0, %v3358_v29, %v5874_v48  ;;  %v3324_v20 = vsel %vm2550_vm4, %v3164_v62, %v6121_v32  ;;  %v3167_v51 = vmul.f32 %v4412_v63, %v6323_v61  ;;  %v7048_v29 = vld [vmem:[#allocation6_spill] sm:$0xff] }
 0x6d4   :  { %v4414_v58 = vpop.eup %4413  ;;  %3484 = vst.msk [vmem:[%s6875_s4 + $0x10] sm:$0xff] %vm494_vm3, %v3452_v7  ;;  %v3422_v3 = vsel %vm402_vm1, %v3390_v8, %v6191_v18  ;;  %v3357_v16 = vsel %vm3352_vm5, %v3324_v20, 0.0  ;;  %v7049_v7 = vld [vmem:[#allocation43_spill] sm:$0xff] }
 0x6d5   :  { %v3455_v10 = vsel %vm3449_vm6, %v3422_v3, 0.0  ;;  %v3389_v48 = vsel %vm369_vm0, %v3357_v16, %v5879_v19  ;;  %v3327_v32 = vsel %vm2550_vm4, %v3167_v51, %v6125_v43  ;;  %v3166_v61 = vmul.f32 %v4414_v58, %v6327_v17 }
 0x6d6   :  { %v4416_v57 = vpop.eup %4415  ;;  %3487 = vst.msk [vmem:[%s6875_s4 + $0x28] sm:$0xff] %vm494_vm3, %v3455_v10  ;;  %v3421_v18 = vsel %vm402_vm1, %v3389_v48, %v6181_v24  ;;  %v3360_v49 = vsel %vm3352_vm5, %v3327_v32, 0.0  ;;  %v3073_v30 = vpop.xlane.xlu0 %3072  ;;  %v7050_v10 = vld [vmem:[#allocation10_spill] sm:$0xff] }
 0x6d7   :  { %v3454_v25 = vsel %vm3449_vm6, %v3421_v18, 0.0  ;;  %v3392_v19 = vsel %vm369_vm0, %v3360_v49, %v5884_v2  ;;  %v3326_v43 = vsel %vm2550_vm4, %v3166_v61, %v6129_v42  ;;  %v3169_v17 = vmul.f32 %v4416_v57, %v6334_v1  ;;  %v7043_v2 = vld [vmem:[#allocation4_spill] sm:$0xff]  ;;  %v7051_v18 = vld [vmem:[#allocation5_spill] sm:$0xff] }
 0x6d8   :  { %v4418_v0 = vpop.eup %4417  ;;  %3486 = vst.msk [vmem:[%s6875_s4 + $0x20] sm:$0xff] %vm494_vm3, %v3454_v25  ;;  %v3424_v24 = vsel %vm402_vm1, %v3392_v19, %v7042_v33  ;;  %v3359_v40 = vsel %vm3352_vm5, %v3326_v43, 0.0  ;;  %4423 = vrcp.f32 %v3073_v30  ;;  %v3070_v54 = vpop.xlane.xlu1 %3069  ;;  %v7052_v25 = vld [vmem:[#allocation14_spill] sm:$0xff]  ;;  %v7053_v43 = vld [vmem:[#allocation48_spill] sm:$0xff]  ;;  %v7054_v33 = vld [vmem:[#allocation7_spill] sm:$0xff] }
 0x6d9   :  { %v3457_v15 = vsel %vm3449_vm6, %v3424_v24, 0.0  ;;  %v3391_v37 = vsel %vm369_vm0, %v3359_v40, %v7043_v2  ;;  %v3329_v42 = vsel %vm2550_vm4, %v3169_v17, %v6133_v38  ;;  %v3168_v1 = vmul.f32 %v4418_v0, %v6339_v5  ;;  %v7046_v38 = vld [vmem:[#allocation11_spill] sm:$0xff]  ;;  %v7055_v40 = vld [vmem:[#allocation46_spill] sm:$0xff] }
 0x6da   :  { %3489 = vst.msk [vmem:[%s6875_s4 + $0x38] sm:$0xff] %vm494_vm3, %v3457_v15  ;;  %v3423_v52 = vsel %vm402_vm1, %v3391_v37, %v7044_v28  ;;  %v3362_v9 = vsel %vm3352_vm5, %v3329_v42, 0.0  ;;  %4425 = vrcp.f32 %v3070_v54  ;;  %v7056_v28 = vld [vmem:[#allocation12_spill] sm:$0xff] }
 0x6db   :  { %v3456_v21 = vsel %vm3449_vm6, %v3423_v52, 0.0  ;;  %v3394_v55 = vsel %vm369_vm0, %v3362_v9, %v7045_v47  ;;  %v3328_v5 = vsel %vm2550_vm4, %v3168_v1, %v7046_v38 }
 0x6dc   :  { %3488 = vst.msk [vmem:[%s6875_s4 + $0x30] sm:$0xff] %vm494_vm3, %v3456_v21  ;;  %v3426_v62 = vsel %vm402_vm1, %v3394_v55, %v7047_v50  ;;  %v3361_v63 = vsel %vm3352_vm5, %v3328_v5, 0.0  ;;  %v7057_v21 = vld [vmem:[#allocation2_spill] sm:$0xff]  ;;  %v7059_v5 = vld [vmem:[#allocation52_spill] sm:$0xff] }
 0x6dd   :  { %v3459_v34 = vsel %vm3449_vm6, %v3426_v62, 0.0  ;;  %v3393_v46 = vsel %vm369_vm0, %v3361_v63, %v7048_v29  ;;  %v4420_v20 = vpop.eup %4419  ;;  %v7061_v29 = vld [vmem:[#allocation49_spill] sm:$0xff] }
 0x6de   :  { %3491 = vst.msk [vmem:[%s6875_s4 + $0x48] sm:$0xff] %vm494_vm3, %v3459_v34  ;;  %v3425_v8 = vsel %vm402_vm1, %v3393_v46, %v7049_v7  ;;  %v3171_v58 = vmul.f32 %v4420_v20, %v6344_v56  ;;  %v3079_v3 = vpop.xlane.xlu0 %3078 }
 0x6df   :  { %v3458_v51 = vsel %vm3449_vm6, %v3425_v8, 0.0  ;;  %v4422_v16 = vpop.eup %4421  ;;  %4427 = vrcp.f32 %v3079_v3 }
 0x6e0   :  { %3490 = vst.msk [vmem:[%s6875_s4 + $0x40] sm:$0xff] %vm494_vm3, %v3458_v51  ;;  %v3331_v48 = vsel %vm2550_vm4, %v3171_v58, %v7050_v10  ;;  %v3170_v32 = vmul.f32 %v4422_v16, %v6349_v26  ;;  %v3076_v61 = vpop.xlane.xlu1 %3075  ;;  %v7062_v58 = vld [vmem:[#allocation13_spill] sm:$0xff] }
 0x6e1   :  { %v3364_v57 = vsel %vm3352_vm5, %v3331_v48, 0.0  ;;  %4429 = vrcp.f32 %v3076_v61 }
 0x6e2   :  { %v3396_v49 = vsel %vm369_vm0, %v3364_v57, %v7051_v18  ;;  %v3330_v19 = vsel %vm2550_vm4, %v3170_v32, %v7052_v25  ;;  %v7063_v32 = vld [vmem:[#allocation17_spill] sm:$0xff]  ;;  %v7065_v18 = vld [vmem:[#allocation56_spill] sm:$0xff] }
 0x6e3   :  { %v3428_v56 = vsel %vm402_vm1, %v3396_v49, %v7053_v43  ;;  %v3363_v17 = vsel %vm3352_vm5, %v3330_v19, 0.0  ;;  %v7066_v43 = vld [vmem:[#allocation18_spill] sm:$0xff] }
 0x6e4   :  { %v3461_v0 = vsel %vm3449_vm6, %v3428_v56, 0.0  ;;  %v3395_v26 = vsel %vm369_vm0, %v3363_v17, %v7054_v33  ;;  %v7067_v17 = vld [vmem:[#allocation53_spill] sm:$0xff] }
 0x6e5   :  { %v4424_v24 = vpop.eup %4423  ;;  %3493 = vst.msk [vmem:[%s6875_s4 + $0x58] sm:$0xff] %vm494_vm3, %v3461_v0  ;;  %v3427_v30 = vsel %vm402_vm1, %v3395_v26, %v7055_v40 }
 0x6e6   :  { %v3460_v2 = vsel %vm3449_vm6, %v3427_v30, 0.0  ;;  %v3173_v37 = vmul.f32 %v4424_v24, %v6354_v59  ;;  %v3085_v42 = vpop.xlane.xlu0 %3084  ;;  %v7058_v59 = vld [vmem:[#allocation8_spill] sm:$0xff]  ;;  %v7068_v30 = vld [vmem:[#allocation35_spill] sm:$0xff] }
 0x6e7   :  { %v4426_v15 = vpop.eup %4425  ;;  %3492 = vst.msk [vmem:[%s6875_s4 + $0x50] sm:$0xff] %vm494_vm3, %v3460_v2  ;;  %4431 = vrcp.f32 %v3085_v42 }
 0x6e8   :  { %v3172_v1 = vmul.f32 %v4426_v15, %v6359_v23  ;;  %v3333_v52 = vsel %vm2550_vm4, %v3173_v37, %v7056_v28  ;;  %v3082_v9 = vpop.xlane.xlu1 %3081  ;;  %v7060_v23 = vld [vmem:[#allocation16_spill] sm:$0xff] }
 0x6e9   :  { %v3366_v54 = vsel %vm3352_vm5, %v3333_v52, 0.0  ;;  %4433 = vrcp.f32 %v3082_v9  ;;  %v7071_v9 = vld [vmem:[#allocation59_spill] sm:$0xff] }
 0x6ea   :  { %v3332_v47 = vsel %vm2550_vm4, %v3172_v1, %v7057_v21  ;;  %v3398_v55 = vsel %vm369_vm0, %v3366_v54, %v7058_v59  ;;  %v7069_v1 = vld [vmem:[#allocation19_spill] sm:$0xff]  ;;  %v7072_v59 = vld [vmem:[#allocation20_spill] sm:$0xff] }
 0x6eb   :  { %v3365_v38 = vsel %vm3352_vm5, %v3332_v47, 0.0  ;;  %v3430_v50 = vsel %vm402_vm1, %v3398_v55, %v7059_v5 }
 0x6ec   :  { %v3397_v62 = vsel %vm369_vm0, %v3365_v38, %v7060_v23  ;;  %v4428_v63 = vpop.eup %4427  ;;  %v3463_v34 = vsel %vm3449_vm6, %v3430_v50, 0.0  ;;  %v7073_v38 = vld [vmem:[#allocation57_spill] sm:$0xff] }
 0x6ed   :  { %v3429_v46 = vsel %vm402_vm1, %v3397_v62, %v7061_v29  ;;  %3495 = vst.msk [vmem:[%s6875_s4 + $0x68] sm:$0xff] %vm494_vm3, %v3463_v34  ;;  %v3175_v8 = vmul.f32 %v4428_v63, %v6364_v4  ;;  %v7064_v4 = vld [vmem:[#allocation15_spill] sm:$0xff]  ;;  %v7074_v34 = vld [vmem:[#allocation37_spill] sm:$0xff] }
 0x6ee   :  { %v3462_v7 = vsel %vm3449_vm6, %v3429_v46, 0.0  ;;  %v4430_v20 = vpop.eup %4429  ;;  %v3091_v51 = vpop.xlane.xlu0 %3090 }
 0x6ef   :  { %3494 = vst.msk [vmem:[%s6875_s4 + $0x60] sm:$0xff] %vm494_vm3, %v3462_v7  ;;  %v3335_v3 = vsel %vm2550_vm4, %v3175_v8, %v7062_v58  ;;  %v3174_v16 = vmul.f32 %v4430_v20, %v6369_v35  ;;  %4435 = vrcp.f32 %v3091_v51  ;;  %v7075_v20 = vld [vmem:[#allocation21_spill] sm:$0xff] }
 0x6f0   :  { %v3368_v10 = vsel %vm3352_vm5, %v3335_v3, 0.0  ;;  %v3088_v48 = vpop.xlane.xlu1 %3087  ;;  %v7077_v3 = vld [vmem:[#allocation62_spill] sm:$0xff] }
 0x6f1   :  { %v3400_v61 = vsel %vm369_vm0, %v3368_v10, %v7063_v32  ;;  %v3334_v57 = vsel %vm2550_vm4, %v3174_v16, %v7064_v4  ;;  %4437 = vrcp.f32 %v3088_v48  ;;  %v7078_v32 = vld [vmem:[#allocation22_spill] sm:$0xff]  ;;  %v7079_v4 = vld [vmem:[#allocation60_spill] sm:$0xff] }
 0x6f2   :  { %v3432_v49 = vsel %vm402_vm1, %v3400_v61, %v7065_v18  ;;  %v3367_v25 = vsel %vm3352_vm5, %v3334_v57, 0.0 }
 0x6f3   :  { %v3465_v19 = vsel %vm3449_vm6, %v3432_v49, 0.0  ;;  %v3399_v35 = vsel %vm369_vm0, %v3367_v25, %v7066_v43  ;;  %v7080_v43 = vld [vmem:[#allocation40_spill] sm:$0xff] }
 0x6f4   :  { %v4432_v56 = vpop.eup %4431  ;;  %3497 = vst.msk [vmem:[%s6875_s4 + $0x78] sm:$0xff] %vm494_vm3, %v3465_v19  ;;  %v3431_v0 = vsel %vm402_vm1, %v3399_v35, %v7067_v17 }
 0x6f5   :  { %v3464_v33 = vsel %vm3449_vm6, %v3431_v0, 0.0  ;;  %v3177_v26 = vmul.f32 %v4432_v56, %v6374_v44  ;;  %v7070_v44 = vld [vmem:[#allocation36_spill] sm:$0xff] }
 0x6f6   :  { %v4434_v24 = vpop.eup %4433  ;;  %3496 = vst.msk [vmem:[%s6875_s4 + $0x70] sm:$0xff] %vm494_vm3, %v3464_v33  ;;  %v3097_v40 = vpop.xlane.xlu0 %3096  ;;  %v7081_v33 = vld [vmem:[#allocation23_spill] sm:$0xff] }
 0x6f7   :  { %v3337_v15 = vsel %vm2550_vm4, %v3177_v26, %v7068_v30  ;;  %v3176_v2 = vmul.f32 %v4434_v24, %v6379_v12  ;;  %4439 = vrcp.f32 %v3097_v40  ;;  %v7083_v40 = vld [vmem:[#allocation66_spill] sm:$0xff] }
 0x6f8   :  { %v3370_v37 = vsel %vm3352_vm5, %v3337_v15, 0.0  ;;  %v3094_v42 = vpop.xlane.xlu1 %3093 }
 0x6f9   :  { %v3402_v28 = vsel %vm369_vm0, %v3370_v37, %v7069_v1  ;;  %v3336_v52 = vsel %vm2550_vm4, %v3176_v2, %v7070_v44  ;;  %4441 = vrcp.f32 %v3094_v42  ;;  %v7084_v37 = vld [vmem:[#allocation24_spill] sm:$0xff]  ;;  %v7085_v1 = vld [vmem:[#allocation63_spill] sm:$0xff] }
 0x6fa   :  { %v3434_v54 = vsel %vm402_vm1, %v3402_v28, %v7071_v9  ;;  %v3369_v21 = vsel %vm3352_vm5, %v3336_v52, 0.0 }
 0x6fb   :  { %v3467_v47 = vsel %vm3449_vm6, %v3434_v54, 0.0  ;;  %v3401_v12 = vsel %vm369_vm0, %v3369_v21, %v7072_v59  ;;  %v7086_v21 = vld [vmem:[#allocation44_spill] sm:$0xff] }
 0x6fc   :  { %v4436_v55 = vpop.eup %4435  ;;  %3499 = vst.msk [vmem:[%s6875_s4 + $0x88] sm:$0xff] %vm494_vm3, %v3467_v47  ;;  %v3433_v5 = vsel %vm402_vm1, %v3401_v12, %v7073_v38  ;;  %v7087_v38 = vld [vmem:[#allocation25_spill] sm:$0xff] }
 0x6fd   :  { %v3466_v50 = vsel %vm3449_vm6, %v3433_v5, 0.0  ;;  %v3179_v23 = vmul.f32 %v4436_v55, %v6384_v11  ;;  %v7076_v11 = vld [vmem:[#allocation38_spill] sm:$0xff] }
 0x6fe   :  { %v4438_v62 = vpop.eup %4437  ;;  %3498 = vst.msk [vmem:[%s6875_s4 + $0x80] sm:$0xff] %vm494_vm3, %v3466_v50  ;;  %v3103_v63 = vpop.xlane.xlu0 %3102 }
 0x6ff   :  { %v3339_v29 = vsel %vm2550_vm4, %v3179_v23, %v7074_v34  ;;  %v3178_v46 = vmul.f32 %v4438_v62, %v6389_v6  ;;  %4443 = vrcp.f32 %v3103_v63  ;;  %v7089_v23 = vld [vmem:[#allocation68_spill] sm:$0xff] }
 0x700   :  { %v3372_v7 = vsel %vm3352_vm5, %v3339_v29, 0.0  ;;  %v3100_v8 = vpop.xlane.xlu1 %3099  ;;  %v7090_v29 = vld [vmem:[#allocation26_spill] sm:$0xff] }
 0x701   :  { %v3404_v51 = vsel %vm369_vm0, %v3372_v7, %v7075_v20  ;;  %v3338_v58 = vsel %vm2550_vm4, %v3178_v46, %v7076_v11  ;;  %4445 = vrcp.f32 %v3100_v8  ;;  %v7091_v7 = vld [vmem:[#allocation67_spill] sm:$0xff] }
 0x702   :  { %v3436_v16 = vsel %vm402_vm1, %v3404_v51, %v7077_v3  ;;  %v3371_v10 = vsel %vm3352_vm5, %v3338_v58, 0.0  ;;  %v7092_v3 = vld [vmem:[#allocation50_spill] sm:$0xff] }
 0x703   :  { %v3469_v48 = vsel %vm3449_vm6, %v3436_v16, 0.0  ;;  %v3403_v6 = vsel %vm369_vm0, %v3371_v10, %v7078_v32 }
 0x704   :  { %v4440_v61 = vpop.eup %4439  ;;  %3501 = vst.msk [vmem:[%s6875_s4 + $0x98] sm:$0xff] %vm494_vm3, %v3469_v48  ;;  %v3435_v57 = vsel %vm402_vm1, %v3403_v6, %v7079_v4  ;;  %v7093_v6 = vld [vmem:[#allocation27_spill] sm:$0xff] }
 0x705   :  { %v3468_v18 = vsel %vm3449_vm6, %v3435_v57, 0.0  ;;  %v3181_v49 = vmul.f32 %v4440_v61, %v6394_v60  ;;  %v7082_v60 = vld [vmem:[#allocation41_spill] sm:$0xff]  ;;  %v7095_v57 = vld [vmem:[#allocation70_spill] sm:$0xff] }
 0x706   :  { %v4442_v25 = vpop.eup %4441  ;;  %3500 = vst.msk [vmem:[%s6875_s4 + $0x90] sm:$0xff] %vm494_vm3, %v3468_v18  ;;  %v3109_v19 = vpop.xlane.xlu0 %3108 }
 0x707   :  { %v3341_v35 = vsel %vm2550_vm4, %v3181_v49, %v7080_v43  ;;  %v3180_v56 = vmul.f32 %v4442_v25, %v6399_v53  ;;  %4447 = vrcp.f32 %v3109_v19  ;;  %v7096_v19 = vld [vmem:[#allocation28_spill] sm:$0xff] }
 0x708   :  { %v3374_v17 = vsel %vm3352_vm5, %v3341_v35, 0.0  ;;  %v3106_v0 = vpop.xlane.xlu1 %3105  ;;  %v7097_v35 = vld [vmem:[#allocation69_spill] sm:$0xff] }
 0x709   :  { %v3406_v26 = vsel %vm369_vm0, %v3374_v17, %v7081_v33  ;;  %v3340_v24 = vsel %vm2550_vm4, %v3180_v56, %v7082_v60  ;;  %4449 = vrcp.f32 %v3106_v0  ;;  %v7098_v60 = vld [vmem:[#allocation54_spill] sm:$0xff] }
 0x70a   :  { %v3438_v30 = vsel %vm402_vm1, %v3406_v26, %v7083_v40  ;;  %v3373_v15 = vsel %vm3352_vm5, %v3340_v24, 0.0 }
 0x70b   :  { %v3471_v2 = vsel %vm3449_vm6, %v3438_v30, 0.0  ;;  %v3405_v53 = vsel %vm369_vm0, %v3373_v15, %v7084_v37 }
 0x70c   :  { %v4444_v42 = vpop.eup %4443  ;;  %3503 = vst.msk [vmem:[%s6875_s4 + $0xa8] sm:$0xff] %vm494_vm3, %v3471_v2  ;;  %v3437_v28 = vsel %vm402_vm1, %v3405_v53, %v7085_v1  ;;  %v7099_v2 = vld [vmem:[#allocation29_spill] sm:$0xff] }
 0x70d   :  { %v3470_v44 = vsel %vm3449_vm6, %v3437_v28, 0.0  ;;  %v3183_v52 = vmul.f32 %v4444_v42, %v6404_v39  ;;  %v7088_v39 = vld [vmem:[#allocation47_spill] sm:$0xff]  ;;  %v7101_v42 = vld [vmem:[#allocation9_spill] sm:$0xff] }
 0x70e   :  { %v4446_v9 = vpop.eup %4445  ;;  %3502 = vst.msk [vmem:[%s6875_s4 + $0xa0] sm:$0xff] %vm494_vm3, %v3470_v44  ;;  %v3115_v54 = vpop.xlane.xlu0 %3114 }
 0x70f   :  { %v3343_v47 = vsel %vm2550_vm4, %v3183_v52, %v7086_v21  ;;  %v3182_v59 = vmul.f32 %v4446_v9, %v6409_v36  ;;  %4451 = vrcp.f32 %v3115_v54  ;;  %v7102_v52 = vld [vmem:[#allocation30_spill] sm:$0xff]  ;;  %v7103_v54 = vld [vmem:[#allocation71_spill] sm:$0xff] }
 0x710   :  { %v3376_v12 = vsel %vm3352_vm5, %v3343_v47, 0.0  ;;  %v3112_v55 = vpop.xlane.xlu1 %3111 }
 0x711   :  { %v3408_v5 = vsel %vm369_vm0, %v3376_v12, %v7087_v38  ;;  %v3342_v50 = vsel %vm2550_vm4, %v3182_v59, %v7088_v39  ;;  %4453 = vrcp.f32 %v3112_v55  ;;  %v7104_v55 = vld [vmem:[#allocation58_spill] sm:$0xff] }
 0x712   :  { %v3440_v62 = vsel %vm402_vm1, %v3408_v5, %v7089_v23  ;;  %v3375_v63 = vsel %vm3352_vm5, %v3342_v50, 0.0  ;;  %v7105_v50 = vld [vmem:[#allocation31_spill] sm:$0xff] }
 0x713   :  { %v3473_v34 = vsel %vm3449_vm6, %v3440_v62, 0.0  ;;  %v3407_v36 = vsel %vm369_vm0, %v3375_v63, %v7090_v29  ;;  %v7106_v62 = vld [vmem:[#allocation61_spill] sm:$0xff] }
 0x714   :  { %v4448_v46 = vpop.eup %4447  ;;  %3505 = vst.msk [vmem:[%s6875_s4 + $0xb8] sm:$0xff] %vm494_vm3, %v3473_v34  ;;  %v3439_v8 = vsel %vm402_vm1, %v3407_v36, %v7091_v7  ;;  %v7107_v36 = vld [vmem:[#allocation32_spill] sm:$0xff] }
 0x715   :  { %v3472_v20 = vsel %vm3449_vm6, %v3439_v8, 0.0  ;;  %v3185_v51 = vmul.f32 %v4448_v46, %v6414_v22  ;;  %v7094_v22 = vld [vmem:[#allocation51_spill] sm:$0xff] }
 0x716   :  { %v4450_v11 = vpop.eup %4449  ;;  %3504 = vst.msk [vmem:[%s6875_s4 + $0xb0] sm:$0xff] %vm494_vm3, %v3472_v20 }
 0x717   :  { %v3345_v16 = vsel %vm2550_vm4, %v3185_v51, %v7092_v3  ;;  %v3184_v10 = vmul.f32 %v4450_v11, %v6419_v31  ;;  %v7109_v51 = vld [vmem:[#allocation72_spill] sm:$0xff] }
 0x718   :  { %v3121_v58 = vpop.xlane.xlu0 %3120  ;;  %v3378_v48 = vsel %vm3352_vm5, %v3345_v16, 0.0  ;;  %v7111_v16 = vld [vmem:[#allocation64_spill] sm:$0xff] }
 0x719   :  { %4455 = vrcp.f32 %v3121_v58  ;;  %v3410_v61 = vsel %vm369_vm0, %v3378_v48, %v7093_v6  ;;  %v3344_v4 = vsel %vm2550_vm4, %v3184_v10, %v7094_v22  ;;  %v7110_v58 = vld [vmem:[#allocation73_spill] sm:$0xff] }
 0x71a   :  { %v3118_v32 = vpop.xlane.xlu1 %3117  ;;  %v3442_v18 = vsel %vm402_vm1, %v3410_v61, %v7095_v57  ;;  %v3377_v49 = vsel %vm3352_vm5, %v3344_v4, 0.0  ;;  %v7113_v61 = vld [vmem:[#allocation33_spill] sm:$0xff] }
 0x71b   :  { %4457 = vrcp.f32 %v3118_v32  ;;  %v3475_v25 = vsel %vm3449_vm6, %v3442_v18, 0.0  ;;  %v3409_v31 = vsel %vm369_vm0, %v3377_v49, %v7096_v19  ;;  %v7112_v32 = vld [vmem:[#allocation65_spill] sm:$0xff] }
 0x71c   :  { %v4452_v43 = vpop.eup %4451  ;;  %3507 = vst.msk [vmem:[%s6875_s4 + $0xc8] sm:$0xff] %vm494_vm3, %v3475_v25  ;;  %v3441_v56 = vsel %vm402_vm1, %v3409_v31, %v7097_v35  ;;  %v7114_v25 = vld [vmem:[#allocation34_spill] sm:$0xff] }
 0x71d   :  { %v3474_v17 = vsel %vm3449_vm6, %v3441_v56, 0.0  ;;  %v3187_v0 = vmul.f32 %v4452_v43, %v6424_v27  ;;  %v7100_v27 = vld [vmem:[#allocation55_spill] sm:$0xff] }
 0x71e   :  { %v4454_v33 = vpop.eup %4453  ;;  %3506 = vst.msk [vmem:[%s6875_s4 + $0xc0] sm:$0xff] %vm494_vm3, %v3474_v17 }
 0x71f   :  { %v3347_v24 = vsel %vm2550_vm4, %v3187_v0, %v7098_v60  ;;  %v3186_v40 = vmul.f32 %v4454_v33, %v6429_v45 }
 0x720   :  { %v3127_v26 = vpop.xlane.xlu0 %3126  ;;  %v3380_v30 = vsel %vm3352_vm5, %v3347_v24, 0.0 }
 0x721   :  { %4459 = vrcp.f32 %v3127_v26  ;;  %v3412_v37 = vsel %vm369_vm0, %v3380_v30, %v7099_v2  ;;  %v3346_v53 = vsel %vm2550_vm4, %v3186_v40, %v7100_v27 }
 0x722   :  { %v3124_v15 = vpop.xlane.xlu1 %3123  ;;  %v3444_v1 = vsel %vm402_vm1, %v3412_v37, %v7101_v42  ;;  %v3379_v28 = vsel %vm3352_vm5, %v3346_v53, 0.0 }
 0x723   :  { %4461 = vrcp.f32 %v3124_v15  ;;  %v3477_v44 = vsel %vm3449_vm6, %v3444_v1, 0.0  ;;  %v3411_v45 = vsel %vm369_vm0, %v3379_v28, %v7102_v52 }
 0x724   :  { %3509 = vst.msk [vmem:[%s6875_s4 + $0xd8] sm:$0xff] %vm494_vm3, %v3477_v44  ;;  %v3443_v21 = vsel %vm402_vm1, %v3411_v45, %v7103_v54  ;;  %v3285_v49 = vpop.permute.xlu0 %3284 }
 0x725   :  { %v3476_v47 = vsel %vm3449_vm6, %v3443_v21, 0.0 }
 0x726   :  { %v4456_v9 = vpop.eup %4455  ;;  %3508 = vst.msk [vmem:[%s6875_s4 + $0xd0] sm:$0xff] %vm494_vm3, %v3476_v47  ;;  %v3287_v4 = vpop.permute.xlu1 %3286 }
 0x727   :  { %v3189_v59 = vmul.f32 %v4456_v9, %v6433_v14 }
 0x728   :  { %v4458_v12 = vpop.eup %4457 }
 0x729   :  { %v3349_v38 = vsel %vm2550_vm4, %v3189_v59, %v7104_v55  ;;  %v3188_v5 = vmul.f32 %v4458_v12, %v6437_v13  ;;  %v7108_v13 = vld [vmem:[#allocation74_spill] sm:$0xff] }
 0x72a   :  { %v3382_v39 = vsel %vm3352_vm5, %v3349_v38, 0.0 }
 0x72b   :  { %v3414_v23 = vsel %vm369_vm0, %v3382_v39, %v7105_v50  ;;  %v3348_v63 = vsel %vm2550_vm4, %v3188_v5, %v7106_v62 }
 0x72c   :  { %v3446_v14 = vsel %vm402_vm1, %v3414_v23, %v6455_v41  ;;  %v3381_v34 = vsel %vm3352_vm5, %v3348_v63, 0.0 }
 0x72d   :  { %v3479_v29 = vsel %vm3449_vm6, %v3446_v14, 0.0  ;;  %v3413_v46 = vsel %vm369_vm0, %v3381_v34, %v7107_v36 }
 0x72e   :  { %v4460_v7 = vpop.eup %4459  ;;  %3511 = vst.msk [vmem:[%s6875_s4 + $0xe8] sm:$0xff] %vm494_vm3, %v3479_v29  ;;  %v3445_v8 = vsel %vm402_vm1, %v3413_v46, %v7108_v13 }
 0x72f   :  { %v3478_v20 = vsel %vm3449_vm6, %v3445_v8, 0.0  ;;  %v3191_v41 = vmul.f32 %v4460_v7, %v7109_v51 }
 0x730   :  { %v4462_v11 = vpop.eup %4461  ;;  %3510 = vst.msk [vmem:[%s6875_s4 + $0xe0] sm:$0xff] %vm494_vm3, %v3478_v20 }
 0x731   :  { %v3190_v3 = vmul.f32 %v4462_v11, %v7110_v58  ;;  %v3351_v10 = vsel %vm2550_vm4, %v3191_v41, %v7111_v16 }
 0x732   :  { %v3384_v48 = vsel %vm3352_vm5, %v3351_v10, 0.0 }
 0x733   :  { %v3350_v6 = vsel %vm2550_vm4, %v3190_v3, %v7112_v32  ;;  %v3416_v22 = vsel %vm369_vm0, %v3384_v48, %v7113_v61 }
 0x734   :  { %v3383_v57 = vsel %vm3352_vm5, %v3350_v6, 0.0  ;;  %v3448_v18 = vsel %vm402_vm1, %v3416_v22, %v3287_v4 }
 0x735   :  { %v3415_v19 = vsel %vm369_vm0, %v3383_v57, %v7114_v25  ;;  %v3481_v31 = vsel %vm3449_vm6, %v3448_v18, 0.0 }
 0x736   :  { %v3447_v43 = vsel %vm402_vm1, %v3415_v19, %v3285_v49  ;;  %3513 = vst.msk [vmem:[%s6875_s4 + $0xf8] sm:$0xff] %vm494_vm3, %v3481_v31 }
 0x737   :  { %v3480_v35 = vsel %vm3449_vm6, %v3447_v43, 0.0 }
 0x738   :  { %3512 = vst.msk [vmem:[%s6875_s4 + $0xf0] sm:$0xff] %vm494_vm3, %v3480_v35 }

</bundles_post_ra>
